<compile_context>
chip_gen: v7x
topology: tpu7x:2x2x1
jax: 0.10.0
libtpu: 0.0.40
codegen_flags: <defaults>
</compile_context>

<pallas_src>
import functools

import numpy as np
import jax
import jax.numpy as jnp
from jax import lax
from jax.experimental import pallas as pl
from jax.experimental.pallas import tpu as pltpu

INPUT_SIZE = 2
HIDDEN = 50        # logical hidden size (nn.LSTM(hidden_size=50))
HP = 128           # padded gate tile width: each gate occupies one full 128-lane tile
BP = 8             # padded batch rows per timestep: one full sublane tile
DIR_OFF = 64       # lane offset of the backward direction inside each packed gate tile
UNROLL = 8         # partial unroll of the serial recurrence loops

_VMEM = pl.BlockSpec(memory_space=pltpu.MemorySpace.VMEM)


# ----------------------------------------------------------------------------
# Fused Pallas kernel: 2 bidirectional LSTM layers + Linear epilogue
# ----------------------------------------------------------------------------
def _sigmoid(x):
    # One EUP pass (tanh) + cheap VPU scale/shift instead of exp + reciprocal.
    return 0.5 * jnp.tanh(0.5 * x) + 0.5


def _lstm_cell(gates, c):
    """gates: (BP, 4*HP) lane-aligned [i|f|g|o] tiles; c: (BP, HP).
    Lane-agnostic: zero pre-activation lanes stay exactly zero in c and h."""
    i = _sigmoid(gates[:, 0 * HP:1 * HP])
    f = _sigmoid(gates[:, 1 * HP:2 * HP])
    g = jnp.tanh(gates[:, 2 * HP:3 * HP])
    o = _sigmoid(gates[:, 3 * HP:4 * HP])
    c_new = f * c + i * g
    h_new = o * jnp.tanh(c_new)
    return h_new, c_new


def _bilstm_kernel(x_ref,
                   wih0f_ref, wih0b_ref, b0_ref, whh0_ref,
                   wih1f_ref, b1f_ref, whh1f_ref,
                   wih1b_ref, b1b_ref,
                   wout_ref, bout_ref,
                   out_ref,
                   gin_f, gin_b, y0,
                   *, T, B, unroll):
    f32 = jnp.float32
    z = jnp.zeros((BP, HP), f32)

    # Packed-lane mask (hoisted out of the loop): fwd lanes [0,64), bwd lanes [64,128).
    is_fwd_lane = lax.broadcasted_iota(jnp.int32, (BP, HP), 1) < DIR_OFF

    # ---------------- layer 0: hoisted input projections ----------------
    # gin_f is live at fwd gate lanes (and carries both directions' biases, added once
    # per step); gin_b is live at bwd gate lanes, both in forward time order.
    x = x_ref[...]                                                         # (T*BP, D)
    gin_f[...] = jnp.dot(x, wih0f_ref[...], preferred_element_type=f32) + b0_ref[...]
    gin_b[...] = jnp.dot(x, wih0b_ref[...], preferred_element_type=f32)

    whh0 = whh0_ref[...]        # (HP, 4*HP) block-structured fwd/bwd recurrent weights

    def l0_step(t, carry):
        h, c = carry            # packed state: fwd at lanes [0,64), bwd at [64,128)
        rf = pl.multiple_of(t * BP, BP)              # fwd stream processes time t
        rb = pl.multiple_of((T - 1 - t) * BP, BP)    # bwd stream processes time T-1-t
        gates = (gin_f[pl.ds(rf, BP), :] + gin_b[pl.ds(rb, BP), :]
                 + jnp.dot(h, whh0, preferred_element_type=f32))
        h, c = _lstm_cell(gates, c)
        # Time-aligned split store: y0[t] fwd half <- h fwd half,
        # y0[T-1-t] bwd half <- h bwd half.  Each y0 row is written exactly twice at
        # disjoint lane halves (the preserved half is either already final or later
        # overwritten by its own step), so y0 is fully defined after the loop.
        row_f = y0[pl.ds(rf, BP), :]
        y0[pl.ds(rf, BP), :] = jnp.where(is_fwd_lane, h, row_f)
        row_b = y0[pl.ds(rb, BP), :]
        y0[pl.ds(rb, BP), :] = jnp.where(is_fwd_lane, row_b, h)
        return h, c

    lax.fori_loop(0, T, l0_step, (z, z), unroll=unroll)

    # ---------------- layer 1 forward: only h(T-1) is consumed downstream -----------
    # Hoisted input projection reuses the gin_f scratch; nothing is stored per step.
    gin_f[...] = jnp.dot(y0[...], wih1f_ref[...], preferred_element_type=f32) + b1f_ref[...]
    whh1f = whh1f_ref[...]

    def l1_step(t, carry):
        h, c = carry
        r = pl.multiple_of(t * BP, BP)
        gates = gin_f[pl.ds(r, BP), :] + jnp.dot(h, whh1f, preferred_element_type=f32)
        return _lstm_cell(gates, c)

    hf1, _ = lax.fori_loop(0, T, l1_step, (z, z), unroll=unroll)   # = h_fwd^(1)(T-1)

    # ---------------- layer 1 backward shortcut ----------------
    # r_out[:, -1, :] only needs h_bwd^(1)(T-1), which is a single cell step from zero
    # state on y0[T-1]; the other T-1 backward steps, the full backward input
    # projection and W_hh^(1,bwd) are dead work and skipped entirely.
    y0_last = y0[(T - 1) * BP:T * BP, :]
    gates_b = jnp.dot(y0_last, wih1b_ref[...], preferred_element_type=f32) + b1b_ref[...]
    hb1, _ = _lstm_cell(gates_b, z)               # live at bwd lanes [64, 64+HIDDEN)

    # ---------------- epilogue: Linear(100, 1) on [h_fwd(T-1) | h_bwd(T-1)] ----------
    h_last = hf1 + hb1                            # disjoint live lane halves
    res = jnp.dot(h_last, wout_ref[...], preferred_element_type=f32)   # (BP, HP), col 0
    out_ref[...] = res[0:B, 0:1] + bout_ref[...]


# ----------------------------------------------------------------------------
# Wrapper: one pallas_call for the whole network
# ----------------------------------------------------------------------------
@jax.jit
def bilstm_net(kparams, x_btd):
    """x_btd: (B, T, D) batch_first input (like the PyTorch module). Returns (B, 1)."""
    B, T, D = x_btd.shape
    assert B <= BP, "this fused kernel packs the batch into one 8-row sublane tile"
    # time-major, pad the batch/sublane axis to BP rows per timestep, flatten to 2-D
    x_tbd = jnp.transpose(x_btd, (1, 0, 2)).astype(jnp.float32)        # (T, B, D)
    x_pad = jnp.zeros((T, BP, D), jnp.float32).at[:, :B, :].set(x_tbd)
    x_flat = x_pad.reshape(T * BP, D)

    p = kparams
    # VMEM budget: weights + I/O + the three scratch buffers, with headroom; never
    # below the 32 MiB default, capped below physical VMEM (64 MiB parts exist).
    param_bytes = sum(int(np.prod(v.shape)) * v.dtype.itemsize for v in p.values())
    scratch_bytes = (2 * 4 * HP + HP) * BP * T * 4          # gin_f + gin_b + y0 (f32)
    io_bytes = (x_flat.size + B) * 4
    need = param_bytes + scratch_bytes + io_bytes
    try:
        phys = int(pltpu.get_tpu_info().vmem_capacity_bytes)
    except Exception:
        phys = 64 << 20                                     # v7x-sized safe fallback
    vmem_limit = int(min(max(need * 5 // 4 + (2 << 20), 32 << 20), phys * 7 // 8))

    kernel = functools.partial(_bilstm_kernel, T=T, B=B, unroll=min(UNROLL, T))
    return pl.pallas_call(
        kernel,
        out_shape=jax.ShapeDtypeStruct((B, 1), jnp.float32),
        in_specs=[_VMEM] * 12,
        out_specs=_VMEM,
        scratch_shapes=[
            pltpu.VMEM((T * BP, 4 * HP), jnp.float32),  # gin_f (layer-0 fwd, reused by layer-1 fwd)
            pltpu.VMEM((T * BP, 4 * HP), jnp.float32),  # gin_b (layer-0 bwd)
            pltpu.VMEM((T * BP, HP), jnp.float32),      # y0: packed layer-0 output [fwd|bwd] lanes
        ],
        compiler_params=pltpu.CompilerParams(vmem_limit_bytes=vmem_limit),
    )(x_flat,
      p["wih0f"], p["wih0b"], p["b0"], p["whh0"],
      p["wih1f"], p["b1f"], p["whh1f"],
      p["wih1b"], p["b1b"],
      p["wout"], p["bout"])


# ----------------------------------------------------------------------------
# Parameters: PyTorch-layout init + one-time packing to the kernel layout
# ----------------------------------------------------------------------------
def init_params(key):
    """Unpadded parameters in nn.LSTM layout (gate order i,f,g,o), f32."""
    H = HIDDEN
    k_lstm = 1.0 / np.sqrt(H)
    keys = jax.random.split(key, 18)
    idx = 0

    def uni(shape, bound):
        nonlocal idx
        v = jax.random.uniform(keys[idx], shape, jnp.float32, -bound, bound)
        idx += 1
        return v

    params = {}
    for name, din in (("l0f", INPUT_SIZE), ("l0b", INPUT_SIZE),
                      ("l1f", 2 * H), ("l1b", 2 * H)):
        wih = uni((din, 4 * H), k_lstm)   # weight_ih.T
        whh = uni((H, 4 * H), k_lstm)     # weight_hh.T
        bih = uni((4 * H,), k_lstm)
        bhh = uni((4 * H,), k_lstm)
        params[name] = (wih, whh, (bih + bhh).reshape(1, 4 * H))

    k_lin = 1.0 / np.sqrt(2 * H)
    params["w_out"] = uni((2 * H, 1), k_lin)     # Linear(100,1).weight.T
    params["b_out"] = uni((1, 1), k_lin)
    return params


def _place_gate_cols(w, lane_off):
    """(rows, 4*H) -> (rows, 4*HP): gate k's H columns moved to lanes
    [k*HP + lane_off, k*HP + lane_off + H) of gate tile k."""
    w = np.asarray(w, np.float32)
    out = np.zeros((w.shape[0], 4 * HP), np.float32)
    for k in range(4):
        out[:, k * HP + lane_off:k * HP + lane_off + HIDDEN] = \
            w[:, k * HIDDEN:(k + 1) * HIDDEN]
    return out


def _place_hidden_rows(blocks):
    """Pack HIDDEN-row blocks at packed-lane row offsets into a (HP, cols) matrix.
    blocks: list of (row_offset, (HIDDEN, cols) array)."""
    cols = blocks[0][1].shape[1]
    out = np.zeros((HP, cols), np.float32)
    for off, blk in blocks:
        out[off:off + HIDDEN, :] = blk
    return out


def prepare_kernel_params(params):
    """One-time host-side repack of the PyTorch-layout params into the packed,
    lane-aligned layout the fused kernel expects (fwd at lanes [0,64), bwd at [64,128))."""
    def np32(a):
        return np.asarray(a, np.float32)

    H = HIDDEN
    out = {}

    # ---- layer 0 ----
    wih0f, whh0f, b0f = (np32(a) for a in params["l0f"])
    wih0b, whh0b, b0b = (np32(a) for a in params["l0b"])
    out["wih0f"] = jnp.asarray(_place_gate_cols(wih0f, 0))
    out["wih0b"] = jnp.asarray(_place_gate_cols(wih0b, DIR_OFF))
    out["b0"] = jnp.asarray(_place_gate_cols(b0f, 0) + _place_gate_cols(b0b, DIR_OFF))
    out["whh0"] = jnp.asarray(_place_hidden_rows([
        (0, _place_gate_cols(whh0f, 0)),
        (DIR_OFF, _place_gate_cols(whh0b, DIR_OFF)),
    ]))

    # ---- layer 1 (input rows: fwd hidden at [0,H), bwd hidden at [DIR_OFF, DIR_OFF+H)) ----
    wih1f, whh1f, b1f = (np32(a) for a in params["l1f"])
    wih1b, _whh1b_dead, b1b = (np32(a) for a in params["l1b"])  # whh1b unused (one-step shortcut)
    cf = _place_gate_cols(wih1f, 0)
    out["wih1f"] = jnp.asarray(_place_hidden_rows([(0, cf[:H]), (DIR_OFF, cf[H:2 * H])]))
    out["b1f"] = jnp.asarray(_place_gate_cols(b1f, 0))
    out["whh1f"] = jnp.asarray(_place_hidden_rows([(0, _place_gate_cols(whh1f, 0))]))
    cb = _place_gate_cols(wih1b, DIR_OFF)
    out["wih1b"] = jnp.asarray(_place_hidden_rows([(0, cb[:H]), (DIR_OFF, cb[H:2 * H])]))
    out["b1b"] = jnp.asarray(_place_gate_cols(b1b, DIR_OFF))

    # ---- output Linear(100, 1): fwd rows at [0,H), bwd rows at [DIR_OFF, DIR_OFF+H) ----
    w_out = np32(params["w_out"])                     # (2H, 1)
    wout = np.zeros((HP, HP), np.float32)             # lane-pad output columns to 128
    wout[0:H, 0] = w_out[0:H, 0]
    wout[DIR_OFF:DIR_OFF + H, 0] = w_out[H:2 * H, 0]
    out["wout"] = jnp.asarray(wout)
    out["bout"] = jnp.asarray(np32(params["b_out"]))
    return out


# ----------------------------------------------------------------------------
# Pure-JAX reference (numerical sanity check only)
# ----------------------------------------------------------------------------
def _lstm_layer_ref(x_tbd, wih, whh, b):
    H = whh.shape[0]
    B = x_tbd.shape[1]

    def step(carry, xt):
        h, c = carry
        gates = xt @ wih + h @ whh + b
        i = jax.nn.sigmoid(gates[:, :H])
        f = jax.nn.sigmoid(gates[:, H:2 * H])
        g = jnp.tanh(gates[:, 2 * H:3 * H])
        o = jax.nn.sigmoid(gates[:, 3 * H:])
        c = f * c + i * g
        h = o * jnp.tanh(c)
        return (h, c), h

    z = jnp.zeros((B, H), jnp.float32)
    _, ys = lax.scan(step, (z, z), x_tbd)
    return ys


def _bilstm_net_ref(params, x_btd):
    x_tbd = jnp.transpose(x_btd, (1, 0, 2)).astype(jnp.float32)

    def bidir(x, pf, pb):
        yf = _lstm_layer_ref(x, *pf)
        yb = _lstm_layer_ref(x[::-1], *pb)[::-1]
        return jnp.concatenate([yf, yb], axis=-1)

    h1 = bidir(x_tbd, params["l0f"], params["l0b"])
    h2 = bidir(h1, params["l1f"], params["l1b"])
    return h2[-1] @ params["w_out"] + params["b_out"]


# ----------------------------------------------------------------------------
if __name__ == "__main__":
    B, T = 2, 8
    x = jax.random.normal(jax.random.PRNGKey(0), (B, T, INPUT_SIZE), jnp.float32)
    params = init_params(jax.random.PRNGKey(1))
    kparams = prepare_kernel_params(params)

    out = bilstm_net(kparams, x)          # (B, 1), one fused pallas_call
    jax.block_until_ready(out)

    ref = _bilstm_net_ref(params, x)
    np.testing.assert_allclose(np.asarray(out), np.asarray(ref), rtol=2e-3, atol=2e-3)

    print("KERNEL_OK")
</pallas_src>

<mosaic_0001>
module attributes {stable_mosaic.version = 11 : i64} {
  func.func @_bilstm_kernel(%arg0: memref<64x2xf32, #tpu.memory_space<vmem>>, %arg1: memref<2x512xf32, #tpu.memory_space<vmem>>, %arg2: memref<2x512xf32, #tpu.memory_space<vmem>>, %arg3: memref<1x512xf32, #tpu.memory_space<vmem>>, %arg4: memref<128x512xf32, #tpu.memory_space<vmem>>, %arg5: memref<128x512xf32, #tpu.memory_space<vmem>>, %arg6: memref<1x512xf32, #tpu.memory_space<vmem>>, %arg7: memref<128x512xf32, #tpu.memory_space<vmem>>, %arg8: memref<128x512xf32, #tpu.memory_space<vmem>>, %arg9: memref<1x512xf32, #tpu.memory_space<vmem>>, %arg10: memref<128x128xf32, #tpu.memory_space<vmem>>, %arg11: memref<1x1xf32, #tpu.memory_space<vmem>>, %arg12: memref<2x1xf32, #tpu.memory_space<vmem>>, %arg13: memref<64x512xf32, #tpu.memory_space<vmem>>, %arg14: memref<64x512xf32, #tpu.memory_space<vmem>>, %arg15: memref<64x128xf32, #tpu.memory_space<vmem>>) attributes {dimension_semantics = [], scalar_prefetch = 0 : i64, scratch_operands = 3 : i64, tpu.core_type = #tpu.core_type<tc>} {
    %cst = arith.constant 0.000000e+00 : f32
    %0 = vector.broadcast %cst : f32 to vector<8x128xf32>
    %1 = tpu.iota {dimensions = array<i32: 1>} : vector<8x128xi32>
    %c64_i32 = arith.constant 64 : i32
    %2 = vector.broadcast %c64_i32 : i32 to vector<8x128xi32>
    %3 = arith.cmpi slt, %1, %2 : vector<8x128xi32>
    %c0 = arith.constant 0 : index
    %c0_0 = arith.constant 0 : index
    %4 = vector.load %arg0[%c0, %c0_0] : memref<64x2xf32, #tpu.memory_space<vmem>>, vector<64x2xf32>
    %c0_1 = arith.constant 0 : index
    %c0_2 = arith.constant 0 : index
    %5 = vector.load %arg1[%c0_1, %c0_2] : memref<2x512xf32, #tpu.memory_space<vmem>>, vector<2x512xf32>
    %cst_3 = arith.constant dense<0.000000e+00> : vector<64x512xf32>
    %6 = tpu.matmul %4, %5, %cst_3 {dimension_numbers = #tpu.dot_dimension_numbers<[1], [0], [0], [1], [0, 0, 1, 1], [], []>} : vector<64x2xf32>, vector<2x512xf32>, vector<64x512xf32> -> vector<64x512xf32>
    %c0_4 = arith.constant 0 : index
    %c0_5 = arith.constant 0 : index
    %7 = vector.load %arg3[%c0_4, %c0_5] : memref<1x512xf32, #tpu.memory_space<vmem>>, vector<1x512xf32>
    %8 = vector.broadcast %7 : vector<1x512xf32> to vector<64x512xf32>
    %9 = arith.addf %6, %8 : vector<64x512xf32>
    %c0_6 = arith.constant 0 : index
    %c0_7 = arith.constant 0 : index
    %10 = vector.load %arg13[%c0_6, %c0_7] : memref<64x512xf32, #tpu.memory_space<vmem>>, vector<64x512xf32>
    tpu.vector_store %arg13[%c0_6, %c0_7], %9 {strides = array<i32>} : memref<64x512xf32, #tpu.memory_space<vmem>>, vector<64x512xf32>,
    %c0_8 = arith.constant 0 : index
    %c0_9 = arith.constant 0 : index
    %11 = vector.load %arg2[%c0_8, %c0_9] : memref<2x512xf32, #tpu.memory_space<vmem>>, vector<2x512xf32>
    %cst_10 = arith.constant dense<0.000000e+00> : vector<64x512xf32>
    %12 = tpu.matmul %4, %11, %cst_10 {dimension_numbers = #tpu.dot_dimension_numbers<[1], [0], [0], [1], [0, 0, 1, 1], [], []>} : vector<64x2xf32>, vector<2x512xf32>, vector<64x512xf32> -> vector<64x512xf32>
    %c0_11 = arith.constant 0 : index
    %c0_12 = arith.constant 0 : index
    %13 = vector.load %arg14[%c0_11, %c0_12] : memref<64x512xf32, #tpu.memory_space<vmem>>, vector<64x512xf32>
    tpu.vector_store %arg14[%c0_11, %c0_12], %12 {strides = array<i32>} : memref<64x512xf32, #tpu.memory_space<vmem>>, vector<64x512xf32>,
    %c0_13 = arith.constant 0 : index
    %c0_14 = arith.constant 0 : index
    %14 = vector.load %arg4[%c0_13, %c0_14] : memref<128x512xf32, #tpu.memory_space<vmem>>, vector<128x512xf32>
    %c0_i32 = arith.constant 0 : i32
    %c8_i32 = arith.constant 8 : i32
    %15 = arith.muli %c0_i32, %c8_i32 : i32
    %16 = tpu.assume_multiple %15, 8 : i32
    %c7_i32 = arith.constant 7 : i32
    %17 = arith.subi %c7_i32, %c0_i32 : i32
    %c8_i32_15 = arith.constant 8 : i32
    %18 = arith.muli %17, %c8_i32_15 : i32
    %19 = tpu.assume_multiple %18, 8 : i32
    %20 = arith.index_cast %16 : i32 to index
    %c0_16 = arith.constant 0 : index
    %21 = vector.load %arg13[%20, %c0_16] : memref<64x512xf32, #tpu.memory_space<vmem>>, vector<8x512xf32>
    %22 = arith.index_cast %19 : i32 to index
    %c0_17 = arith.constant 0 : index
    %23 = vector.load %arg14[%22, %c0_17] : memref<64x512xf32, #tpu.memory_space<vmem>>, vector<8x512xf32>
    %24 = arith.addf %21, %23 : vector<8x512xf32>
    %cst_18 = arith.constant dense<0.000000e+00> : vector<8x512xf32>
    %25 = tpu.matmul %0, %14, %cst_18 {dimension_numbers = #tpu.dot_dimension_numbers<[1], [0], [0], [1], [0, 0, 1, 1], [], []>} : vector<8x128xf32>, vector<128x512xf32>, vector<8x512xf32> -> vector<8x512xf32>
    %26 = arith.addf %24, %25 : vector<8x512xf32>
    %27 = vector.extract_strided_slice %26 {offsets = [0, 0], sizes = [8, 128], strides = [1, 1]} : vector<8x512xf32> to vector<8x128xf32>
    %cst_19 = arith.constant 5.000000e-01 : f32
    %28 = vector.broadcast %cst_19 : f32 to vector<8x128xf32>
    %29 = arith.mulf %28, %27 : vector<8x128xf32>
    %30 = math.tanh %29 : vector<8x128xf32>
    %cst_20 = arith.constant 5.000000e-01 : f32
    %31 = vector.broadcast %cst_20 : f32 to vector<8x128xf32>
    %32 = arith.mulf %31, %30 : vector<8x128xf32>
    %cst_21 = arith.constant 5.000000e-01 : f32
    %33 = vector.broadcast %cst_21 : f32 to vector<8x128xf32>
    %34 = arith.addf %32, %33 : vector<8x128xf32>
    %35 = vector.extract_strided_slice %26 {offsets = [0, 128], sizes = [8, 128], strides = [1, 1]} : vector<8x512xf32> to vector<8x128xf32>
    %cst_22 = arith.constant 5.000000e-01 : f32
    %36 = vector.broadcast %cst_22 : f32 to vector<8x128xf32>
    %37 = arith.mulf %36, %35 : vector<8x128xf32>
    %38 = math.tanh %37 : vector<8x128xf32>
    %cst_23 = arith.constant 5.000000e-01 : f32
    %39 = vector.broadcast %cst_23 : f32 to vector<8x128xf32>
    %40 = arith.mulf %39, %38 : vector<8x128xf32>
    %cst_24 = arith.constant 5.000000e-01 : f32
    %41 = vector.broadcast %cst_24 : f32 to vector<8x128xf32>
    %42 = arith.addf %40, %41 : vector<8x128xf32>
    %43 = vector.extract_strided_slice %26 {offsets = [0, 256], sizes = [8, 128], strides = [1, 1]} : vector<8x512xf32> to vector<8x128xf32>
    %44 = math.tanh %43 : vector<8x128xf32>
    %45 = vector.extract_strided_slice %26 {offsets = [0, 384], sizes = [8, 128], strides = [1, 1]} : vector<8x512xf32> to vector<8x128xf32>
    %cst_25 = arith.constant 5.000000e-01 : f32
    %46 = vector.broadcast %cst_25 : f32 to vector<8x128xf32>
    %47 = arith.mulf %46, %45 : vector<8x128xf32>
    %48 = math.tanh %47 : vector<8x128xf32>
    %cst_26 = arith.constant 5.000000e-01 : f32
    %49 = vector.broadcast %cst_26 : f32 to vector<8x128xf32>
    %50 = arith.mulf %49, %48 : vector<8x128xf32>
    %cst_27 = arith.constant 5.000000e-01 : f32
    %51 = vector.broadcast %cst_27 : f32 to vector<8x128xf32>
    %52 = arith.addf %50, %51 : vector<8x128xf32>
    %53 = arith.mulf %42, %0 : vector<8x128xf32>
    %54 = arith.mulf %34, %44 : vector<8x128xf32>
    %55 = arith.addf %53, %54 : vector<8x128xf32>
    %56 = math.tanh %55 : vector<8x128xf32>
    %57 = arith.mulf %52, %56 : vector<8x128xf32>
    %58 = arith.index_cast %16 : i32 to index
    %c0_28 = arith.constant 0 : index
    %59 = vector.load %arg15[%58, %c0_28] : memref<64x128xf32, #tpu.memory_space<vmem>>, vector<8x128xf32>
    %60 = arith.select %3, %57, %59 : vector<8x128xi1>, vector<8x128xf32>
    %61 = arith.index_cast %16 : i32 to index
    %c0_29 = arith.constant 0 : index
    %62 = vector.load %arg15[%61, %c0_29] : memref<64x128xf32, #tpu.memory_space<vmem>>, vector<8x128xf32>
    tpu.vector_store %arg15[%61, %c0_29], %60 {strides = array<i32>} : memref<64x128xf32, #tpu.memory_space<vmem>>, vector<8x128xf32>,
    %63 = arith.index_cast %19 : i32 to index
    %c0_30 = arith.constant 0 : index
    %64 = vector.load %arg15[%63, %c0_30] : memref<64x128xf32, #tpu.memory_space<vmem>>, vector<8x128xf32>
    %65 = arith.select %3, %64, %57 : vector<8x128xi1>, vector<8x128xf32>
    %66 = arith.index_cast %19 : i32 to index
    %c0_31 = arith.constant 0 : index
    %67 = vector.load %arg15[%66, %c0_31] : memref<64x128xf32, #tpu.memory_space<vmem>>, vector<8x128xf32>
    tpu.vector_store %arg15[%66, %c0_31], %65 {strides = array<i32>} : memref<64x128xf32, #tpu.memory_space<vmem>>, vector<8x128xf32>,
    %c1_i32 = arith.constant 1 : i32
    %c8_i32_32 = arith.constant 8 : i32
    %68 = arith.muli %c1_i32, %c8_i32_32 : i32
    %69 = tpu.assume_multiple %68, 8 : i32
    %c7_i32_33 = arith.constant 7 : i32
    %70 = arith.subi %c7_i32_33, %c1_i32 : i32
    %c8_i32_34 = arith.constant 8 : i32
    %71 = arith.muli %70, %c8_i32_34 : i32
    %72 = tpu.assume_multiple %71, 8 : i32
    %73 = arith.index_cast %69 : i32 to index
    %c0_35 = arith.constant 0 : index
    %74 = vector.load %arg13[%73, %c0_35] : memref<64x512xf32, #tpu.memory_space<vmem>>, vector<8x512xf32>
    %75 = arith.index_cast %72 : i32 to index
    %c0_36 = arith.constant 0 : index
    %76 = vector.load %arg14[%75, %c0_36] : memref<64x512xf32, #tpu.memory_space<vmem>>, vector<8x512xf32>
    %77 = arith.addf %74, %76 : vector<8x512xf32>
    %cst_37 = arith.constant dense<0.000000e+00> : vector<8x512xf32>
    %78 = tpu.matmul %57, %14, %cst_37 {dimension_numbers = #tpu.dot_dimension_numbers<[1], [0], [0], [1], [0, 0, 1, 1], [], []>} : vector<8x128xf32>, vector<128x512xf32>, vector<8x512xf32> -> vector<8x512xf32>
    %79 = arith.addf %77, %78 : vector<8x512xf32>
    %80 = vector.extract_strided_slice %79 {offsets = [0, 0], sizes = [8, 128], strides = [1, 1]} : vector<8x512xf32> to vector<8x128xf32>
    %cst_38 = arith.constant 5.000000e-01 : f32
    %81 = vector.broadcast %cst_38 : f32 to vector<8x128xf32>
    %82 = arith.mulf %81, %80 : vector<8x128xf32>
    %83 = math.tanh %82 : vector<8x128xf32>
    %cst_39 = arith.constant 5.000000e-01 : f32
    %84 = vector.broadcast %cst_39 : f32 to vector<8x128xf32>
    %85 = arith.mulf %84, %83 : vector<8x128xf32>
    %cst_40 = arith.constant 5.000000e-01 : f32
    %86 = vector.broadcast %cst_40 : f32 to vector<8x128xf32>
    %87 = arith.addf %85, %86 : vector<8x128xf32>
    %88 = vector.extract_strided_slice %79 {offsets = [0, 128], sizes = [8, 128], strides = [1, 1]} : vector<8x512xf32> to vector<8x128xf32>
    %cst_41 = arith.constant 5.000000e-01 : f32
    %89 = vector.broadcast %cst_41 : f32 to vector<8x128xf32>
    %90 = arith.mulf %89, %88 : vector<8x128xf32>
    %91 = math.tanh %90 : vector<8x128xf32>
    %cst_42 = arith.constant 5.000000e-01 : f32
    %92 = vector.broadcast %cst_42 : f32 to vector<8x128xf32>
    %93 = arith.mulf %92, %91 : vector<8x128xf32>
    %cst_43 = arith.constant 5.000000e-01 : f32
    %94 = vector.broadcast %cst_43 : f32 to vector<8x128xf32>
    %95 = arith.addf %93, %94 : vector<8x128xf32>
    %96 = vector.extract_strided_slice %79 {offsets = [0, 256], sizes = [8, 128], strides = [1, 1]} : vector<8x512xf32> to vector<8x128xf32>
    %97 = math.tanh %96 : vector<8x128xf32>
    %98 = vector.extract_strided_slice %79 {offsets = [0, 384], sizes = [8, 128], strides = [1, 1]} : vector<8x512xf32> to vector<8x128xf32>
    %cst_44 = arith.constant 5.000000e-01 : f32
    %99 = vector.broadcast %cst_44 : f32 to vector<8x128xf32>
    %100 = arith.mulf %99, %98 : vector<8x128xf32>
    %101 = math.tanh %100 : vector<8x128xf32>
    %cst_45 = arith.constant 5.000000e-01 : f32
    %102 = vector.broadcast %cst_45 : f32 to vector<8x128xf32>
    %103 = arith.mulf %102, %101 : vector<8x128xf32>
    %cst_46 = arith.constant 5.000000e-01 : f32
    %104 = vector.broadcast %cst_46 : f32 to vector<8x128xf32>
    %105 = arith.addf %103, %104 : vector<8x128xf32>
    %106 = arith.mulf %95, %55 : vector<8x128xf32>
    %107 = arith.mulf %87, %97 : vector<8x128xf32>
    %108 = arith.addf %106, %107 : vector<8x128xf32>
    %109 = math.tanh %108 : vector<8x128xf32>
    %110 = arith.mulf %105, %109 : vector<8x128xf32>
    %111 = arith.index_cast %69 : i32 to index
    %c0_47 = arith.constant 0 : index
    %112 = vector.load %arg15[%111, %c0_47] : memref<64x128xf32, #tpu.memory_space<vmem>>, vector<8x128xf32>
    %113 = arith.select %3, %110, %112 : vector<8x128xi1>, vector<8x128xf32>
    %114 = arith.index_cast %69 : i32 to index
    %c0_48 = arith.constant 0 : index
    %115 = vector.load %arg15[%114, %c0_48] : memref<64x128xf32, #tpu.memory_space<vmem>>, vector<8x128xf32>
    tpu.vector_store %arg15[%114, %c0_48], %113 {strides = array<i32>} : memref<64x128xf32, #tpu.memory_space<vmem>>, vector<8x128xf32>,
    %116 = arith.index_cast %72 : i32 to index
    %c0_49 = arith.constant 0 : index
    %117 = vector.load %arg15[%116, %c0_49] : memref<64x128xf32, #tpu.memory_space<vmem>>, vector<8x128xf32>
    %118 = arith.select %3, %117, %110 : vector<8x128xi1>, vector<8x128xf32>
    %119 = arith.index_cast %72 : i32 to index
    %c0_50 = arith.constant 0 : index
    %120 = vector.load %arg15[%119, %c0_50] : memref<64x128xf32, #tpu.memory_space<vmem>>, vector<8x128xf32>
    tpu.vector_store %arg15[%119, %c0_50], %118 {strides = array<i32>} : memref<64x128xf32, #tpu.memory_space<vmem>>, vector<8x128xf32>,
    %c2_i32 = arith.constant 2 : i32
    %c8_i32_51 = arith.constant 8 : i32
    %121 = arith.muli %c2_i32, %c8_i32_51 : i32
    %122 = tpu.assume_multiple %121, 8 : i32
    %c7_i32_52 = arith.constant 7 : i32
    %123 = arith.subi %c7_i32_52, %c2_i32 : i32
    %c8_i32_53 = arith.constant 8 : i32
    %124 = arith.muli %123, %c8_i32_53 : i32
    %125 = tpu.assume_multiple %124, 8 : i32
    %126 = arith.index_cast %122 : i32 to index
    %c0_54 = arith.constant 0 : index
    %127 = vector.load %arg13[%126, %c0_54] : memref<64x512xf32, #tpu.memory_space<vmem>>, vector<8x512xf32>
    %128 = arith.index_cast %125 : i32 to index
    %c0_55 = arith.constant 0 : index
    %129 = vector.load %arg14[%128, %c0_55] : memref<64x512xf32, #tpu.memory_space<vmem>>, vector<8x512xf32>
    %130 = arith.addf %127, %129 : vector<8x512xf32>
    %cst_56 = arith.constant dense<0.000000e+00> : vector<8x512xf32>
    %131 = tpu.matmul %110, %14, %cst_56 {dimension_numbers = #tpu.dot_dimension_numbers<[1], [0], [0], [1], [0, 0, 1, 1], [], []>} : vector<8x128xf32>, vector<128x512xf32>, vector<8x512xf32> -> vector<8x512xf32>
    %132 = arith.addf %130, %131 : vector<8x512xf32>
    %133 = vector.extract_strided_slice %132 {offsets = [0, 0], sizes = [8, 128], strides = [1, 1]} : vector<8x512xf32> to vector<8x128xf32>
    %cst_57 = arith.constant 5.000000e-01 : f32
    %134 = vector.broadcast %cst_57 : f32 to vector<8x128xf32>
    %135 = arith.mulf %134, %133 : vector<8x128xf32>
    %136 = math.tanh %135 : vector<8x128xf32>
    %cst_58 = arith.constant 5.000000e-01 : f32
    %137 = vector.broadcast %cst_58 : f32 to vector<8x128xf32>
    %138 = arith.mulf %137, %136 : vector<8x128xf32>
    %cst_59 = arith.constant 5.000000e-01 : f32
    %139 = vector.broadcast %cst_59 : f32 to vector<8x128xf32>
    %140 = arith.addf %138, %139 : vector<8x128xf32>
    %141 = vector.extract_strided_slice %132 {offsets = [0, 128], sizes = [8, 128], strides = [1, 1]} : vector<8x512xf32> to vector<8x128xf32>
    %cst_60 = arith.constant 5.000000e-01 : f32
    %142 = vector.broadcast %cst_60 : f32 to vector<8x128xf32>
    %143 = arith.mulf %142, %141 : vector<8x128xf32>
    %144 = math.tanh %143 : vector<8x128xf32>
    %cst_61 = arith.constant 5.000000e-01 : f32
    %145 = vector.broadcast %cst_61 : f32 to vector<8x128xf32>
    %146 = arith.mulf %145, %144 : vector<8x128xf32>
    %cst_62 = arith.constant 5.000000e-01 : f32
    %147 = vector.broadcast %cst_62 : f32 to vector<8x128xf32>
    %148 = arith.addf %146, %147 : vector<8x128xf32>
    %149 = vector.extract_strided_slice %132 {offsets = [0, 256], sizes = [8, 128], strides = [1, 1]} : vector<8x512xf32> to vector<8x128xf32>
    %150 = math.tanh %149 : vector<8x128xf32>
    %151 = vector.extract_strided_slice %132 {offsets = [0, 384], sizes = [8, 128], strides = [1, 1]} : vector<8x512xf32> to vector<8x128xf32>
    %cst_63 = arith.constant 5.000000e-01 : f32
    %152 = vector.broadcast %cst_63 : f32 to vector<8x128xf32>
    %153 = arith.mulf %152, %151 : vector<8x128xf32>
    %154 = math.tanh %153 : vector<8x128xf32>
    %cst_64 = arith.constant 5.000000e-01 : f32
    %155 = vector.broadcast %cst_64 : f32 to vector<8x128xf32>
    %156 = arith.mulf %155, %154 : vector<8x128xf32>
    %cst_65 = arith.constant 5.000000e-01 : f32
    %157 = vector.broadcast %cst_65 : f32 to vector<8x128xf32>
    %158 = arith.addf %156, %157 : vector<8x128xf32>
    %159 = arith.mulf %148, %108 : vector<8x128xf32>
    %160 = arith.mulf %140, %150 : vector<8x128xf32>
    %161 = arith.addf %159, %160 : vector<8x128xf32>
    %162 = math.tanh %161 : vector<8x128xf32>
    %163 = arith.mulf %158, %162 : vector<8x128xf32>
    %164 = arith.index_cast %122 : i32 to index
    %c0_66 = arith.constant 0 : index
    %165 = vector.load %arg15[%164, %c0_66] : memref<64x128xf32, #tpu.memory_space<vmem>>, vector<8x128xf32>
    %166 = arith.select %3, %163, %165 : vector<8x128xi1>, vector<8x128xf32>
    %167 = arith.index_cast %122 : i32 to index
    %c0_67 = arith.constant 0 : index
    %168 = vector.load %arg15[%167, %c0_67] : memref<64x128xf32, #tpu.memory_space<vmem>>, vector<8x128xf32>
    tpu.vector_store %arg15[%167, %c0_67], %166 {strides = array<i32>} : memref<64x128xf32, #tpu.memory_space<vmem>>, vector<8x128xf32>,
    %169 = arith.index_cast %125 : i32 to index
    %c0_68 = arith.constant 0 : index
    %170 = vector.load %arg15[%169, %c0_68] : memref<64x128xf32, #tpu.memory_space<vmem>>, vector<8x128xf32>
    %171 = arith.select %3, %170, %163 : vector<8x128xi1>, vector<8x128xf32>
    %172 = arith.index_cast %125 : i32 to index
    %c0_69 = arith.constant 0 : index
    %173 = vector.load %arg15[%172, %c0_69] : memref<64x128xf32, #tpu.memory_space<vmem>>, vector<8x128xf32>
    tpu.vector_store %arg15[%172, %c0_69], %171 {strides = array<i32>} : memref<64x128xf32, #tpu.memory_space<vmem>>, vector<8x128xf32>,
    %c3_i32 = arith.constant 3 : i32
    %c8_i32_70 = arith.constant 8 : i32
    %174 = arith.muli %c3_i32, %c8_i32_70 : i32
    %175 = tpu.assume_multiple %174, 8 : i32
    %c7_i32_71 = arith.constant 7 : i32
    %176 = arith.subi %c7_i32_71, %c3_i32 : i32
    %c8_i32_72 = arith.constant 8 : i32
    %177 = arith.muli %176, %c8_i32_72 : i32
    %178 = tpu.assume_multiple %177, 8 : i32
    %179 = arith.index_cast %175 : i32 to index
    %c0_73 = arith.constant 0 : index
    %180 = vector.load %arg13[%179, %c0_73] : memref<64x512xf32, #tpu.memory_space<vmem>>, vector<8x512xf32>
    %181 = arith.index_cast %178 : i32 to index
    %c0_74 = arith.constant 0 : index
    %182 = vector.load %arg14[%181, %c0_74] : memref<64x512xf32, #tpu.memory_space<vmem>>, vector<8x512xf32>
    %183 = arith.addf %180, %182 : vector<8x512xf32>
    %cst_75 = arith.constant dense<0.000000e+00> : vector<8x512xf32>
    %184 = tpu.matmul %163, %14, %cst_75 {dimension_numbers = #tpu.dot_dimension_numbers<[1], [0], [0], [1], [0, 0, 1, 1], [], []>} : vector<8x128xf32>, vector<128x512xf32>, vector<8x512xf32> -> vector<8x512xf32>
    %185 = arith.addf %183, %184 : vector<8x512xf32>
    %186 = vector.extract_strided_slice %185 {offsets = [0, 0], sizes = [8, 128], strides = [1, 1]} : vector<8x512xf32> to vector<8x128xf32>
    %cst_76 = arith.constant 5.000000e-01 : f32
    %187 = vector.broadcast %cst_76 : f32 to vector<8x128xf32>
    %188 = arith.mulf %187, %186 : vector<8x128xf32>
    %189 = math.tanh %188 : vector<8x128xf32>
    %cst_77 = arith.constant 5.000000e-01 : f32
    %190 = vector.broadcast %cst_77 : f32 to vector<8x128xf32>
    %191 = arith.mulf %190, %189 : vector<8x128xf32>
    %cst_78 = arith.constant 5.000000e-01 : f32
    %192 = vector.broadcast %cst_78 : f32 to vector<8x128xf32>
    %193 = arith.addf %191, %192 : vector<8x128xf32>
    %194 = vector.extract_strided_slice %185 {offsets = [0, 128], sizes = [8, 128], strides = [1, 1]} : vector<8x512xf32> to vector<8x128xf32>
    %cst_79 = arith.constant 5.000000e-01 : f32
    %195 = vector.broadcast %cst_79 : f32 to vector<8x128xf32>
    %196 = arith.mulf %195, %194 : vector<8x128xf32>
    %197 = math.tanh %196 : vector<8x128xf32>
    %cst_80 = arith.constant 5.000000e-01 : f32
    %198 = vector.broadcast %cst_80 : f32 to vector<8x128xf32>
    %199 = arith.mulf %198, %197 : vector<8x128xf32>
    %cst_81 = arith.constant 5.000000e-01 : f32
    %200 = vector.broadcast %cst_81 : f32 to vector<8x128xf32>
    %201 = arith.addf %199, %200 : vector<8x128xf32>
    %202 = vector.extract_strided_slice %185 {offsets = [0, 256], sizes = [8, 128], strides = [1, 1]} : vector<8x512xf32> to vector<8x128xf32>
    %203 = math.tanh %202 : vector<8x128xf32>
    %204 = vector.extract_strided_slice %185 {offsets = [0, 384], sizes = [8, 128], strides = [1, 1]} : vector<8x512xf32> to vector<8x128xf32>
    %cst_82 = arith.constant 5.000000e-01 : f32
    %205 = vector.broadcast %cst_82 : f32 to vector<8x128xf32>
    %206 = arith.mulf %205, %204 : vector<8x128xf32>
    %207 = math.tanh %206 : vector<8x128xf32>
    %cst_83 = arith.constant 5.000000e-01 : f32
    %208 = vector.broadcast %cst_83 : f32 to vector<8x128xf32>
    %209 = arith.mulf %208, %207 : vector<8x128xf32>
    %cst_84 = arith.constant 5.000000e-01 : f32
    %210 = vector.broadcast %cst_84 : f32 to vector<8x128xf32>
    %211 = arith.addf %209, %210 : vector<8x128xf32>
    %212 = arith.mulf %201, %161 : vector<8x128xf32>
    %213 = arith.mulf %193, %203 : vector<8x128xf32>
    %214 = arith.addf %212, %213 : vector<8x128xf32>
    %215 = math.tanh %214 : vector<8x128xf32>
    %216 = arith.mulf %211, %215 : vector<8x128xf32>
    %217 = arith.index_cast %175 : i32 to index
    %c0_85 = arith.constant 0 : index
    %218 = vector.load %arg15[%217, %c0_85] : memref<64x128xf32, #tpu.memory_space<vmem>>, vector<8x128xf32>
    %219 = arith.select %3, %216, %218 : vector<8x128xi1>, vector<8x128xf32>
    %220 = arith.index_cast %175 : i32 to index
    %c0_86 = arith.constant 0 : index
    %221 = vector.load %arg15[%220, %c0_86] : memref<64x128xf32, #tpu.memory_space<vmem>>, vector<8x128xf32>
    tpu.vector_store %arg15[%220, %c0_86], %219 {strides = array<i32>} : memref<64x128xf32, #tpu.memory_space<vmem>>, vector<8x128xf32>,
    %222 = arith.index_cast %178 : i32 to index
    %c0_87 = arith.constant 0 : index
    %223 = vector.load %arg15[%222, %c0_87] : memref<64x128xf32, #tpu.memory_space<vmem>>, vector<8x128xf32>
    %224 = arith.select %3, %223, %216 : vector<8x128xi1>, vector<8x128xf32>
    %225 = arith.index_cast %178 : i32 to index
    %c0_88 = arith.constant 0 : index
    %226 = vector.load %arg15[%225, %c0_88] : memref<64x128xf32, #tpu.memory_space<vmem>>, vector<8x128xf32>
    tpu.vector_store %arg15[%225, %c0_88], %224 {strides = array<i32>} : memref<64x128xf32, #tpu.memory_space<vmem>>, vector<8x128xf32>,
    %c4_i32 = arith.constant 4 : i32
    %c8_i32_89 = arith.constant 8 : i32
    %227 = arith.muli %c4_i32, %c8_i32_89 : i32
    %228 = tpu.assume_multiple %227, 8 : i32
    %c7_i32_90 = arith.constant 7 : i32
    %229 = arith.subi %c7_i32_90, %c4_i32 : i32
    %c8_i32_91 = arith.constant 8 : i32
    %230 = arith.muli %229, %c8_i32_91 : i32
    %231 = tpu.assume_multiple %230, 8 : i32
    %232 = arith.index_cast %228 : i32 to index
    %c0_92 = arith.constant 0 : index
    %233 = vector.load %arg13[%232, %c0_92] : memref<64x512xf32, #tpu.memory_space<vmem>>, vector<8x512xf32>
    %234 = arith.index_cast %231 : i32 to index
    %c0_93 = arith.constant 0 : index
    %235 = vector.load %arg14[%234, %c0_93] : memref<64x512xf32, #tpu.memory_space<vmem>>, vector<8x512xf32>
    %236 = arith.addf %233, %235 : vector<8x512xf32>
    %cst_94 = arith.constant dense<0.000000e+00> : vector<8x512xf32>
    %237 = tpu.matmul %216, %14, %cst_94 {dimension_numbers = #tpu.dot_dimension_numbers<[1], [0], [0], [1], [0, 0, 1, 1], [], []>} : vector<8x128xf32>, vector<128x512xf32>, vector<8x512xf32> -> vector<8x512xf32>
    %238 = arith.addf %236, %237 : vector<8x512xf32>
    %239 = vector.extract_strided_slice %238 {offsets = [0, 0], sizes = [8, 128], strides = [1, 1]} : vector<8x512xf32> to vector<8x128xf32>
    %cst_95 = arith.constant 5.000000e-01 : f32
    %240 = vector.broadcast %cst_95 : f32 to vector<8x128xf32>
    %241 = arith.mulf %240, %239 : vector<8x128xf32>
    %242 = math.tanh %241 : vector<8x128xf32>
    %cst_96 = arith.constant 5.000000e-01 : f32
    %243 = vector.broadcast %cst_96 : f32 to vector<8x128xf32>
    %244 = arith.mulf %243, %242 : vector<8x128xf32>
    %cst_97 = arith.constant 5.000000e-01 : f32
    %245 = vector.broadcast %cst_97 : f32 to vector<8x128xf32>
    %246 = arith.addf %244, %245 : vector<8x128xf32>
    %247 = vector.extract_strided_slice %238 {offsets = [0, 128], sizes = [8, 128], strides = [1, 1]} : vector<8x512xf32> to vector<8x128xf32>
    %cst_98 = arith.constant 5.000000e-01 : f32
    %248 = vector.broadcast %cst_98 : f32 to vector<8x128xf32>
    %249 = arith.mulf %248, %247 : vector<8x128xf32>
    %250 = math.tanh %249 : vector<8x128xf32>
    %cst_99 = arith.constant 5.000000e-01 : f32
    %251 = vector.broadcast %cst_99 : f32 to vector<8x128xf32>
    %252 = arith.mulf %251, %250 : vector<8x128xf32>
    %cst_100 = arith.constant 5.000000e-01 : f32
    %253 = vector.broadcast %cst_100 : f32 to vector<8x128xf32>
    %254 = arith.addf %252, %253 : vector<8x128xf32>
    %255 = vector.extract_strided_slice %238 {offsets = [0, 256], sizes = [8, 128], strides = [1, 1]} : vector<8x512xf32> to vector<8x128xf32>
    %256 = math.tanh %255 : vector<8x128xf32>
    %257 = vector.extract_strided_slice %238 {offsets = [0, 384], sizes = [8, 128], strides = [1, 1]} : vector<8x512xf32> to vector<8x128xf32>
    %cst_101 = arith.constant 5.000000e-01 : f32
    %258 = vector.broadcast %cst_101 : f32 to vector<8x128xf32>
    %259 = arith.mulf %258, %257 : vector<8x128xf32>
    %260 = math.tanh %259 : vector<8x128xf32>
    %cst_102 = arith.constant 5.000000e-01 : f32
    %261 = vector.broadcast %cst_102 : f32 to vector<8x128xf32>
    %262 = arith.mulf %261, %260 : vector<8x128xf32>
    %cst_103 = arith.constant 5.000000e-01 : f32
    %263 = vector.broadcast %cst_103 : f32 to vector<8x128xf32>
    %264 = arith.addf %262, %263 : vector<8x128xf32>
    %265 = arith.mulf %254, %214 : vector<8x128xf32>
    %266 = arith.mulf %246, %256 : vector<8x128xf32>
    %267 = arith.addf %265, %266 : vector<8x128xf32>
    %268 = math.tanh %267 : vector<8x128xf32>
    %269 = arith.mulf %264, %268 : vector<8x128xf32>
    %270 = arith.index_cast %228 : i32 to index
    %c0_104 = arith.constant 0 : index
    %271 = vector.load %arg15[%270, %c0_104] : memref<64x128xf32, #tpu.memory_space<vmem>>, vector<8x128xf32>
    %272 = arith.select %3, %269, %271 : vector<8x128xi1>, vector<8x128xf32>
    %273 = arith.index_cast %228 : i32 to index
    %c0_105 = arith.constant 0 : index
    %274 = vector.load %arg15[%273, %c0_105] : memref<64x128xf32, #tpu.memory_space<vmem>>, vector<8x128xf32>
    tpu.vector_store %arg15[%273, %c0_105], %272 {strides = array<i32>} : memref<64x128xf32, #tpu.memory_space<vmem>>, vector<8x128xf32>,
    %275 = arith.index_cast %231 : i32 to index
    %c0_106 = arith.constant 0 : index
    %276 = vector.load %arg15[%275, %c0_106] : memref<64x128xf32, #tpu.memory_space<vmem>>, vector<8x128xf32>
    %277 = arith.select %3, %276, %269 : vector<8x128xi1>, vector<8x128xf32>
    %278 = arith.index_cast %231 : i32 to index
    %c0_107 = arith.constant 0 : index
    %279 = vector.load %arg15[%278, %c0_107] : memref<64x128xf32, #tpu.memory_space<vmem>>, vector<8x128xf32>
    tpu.vector_store %arg15[%278, %c0_107], %277 {strides = array<i32>} : memref<64x128xf32, #tpu.memory_space<vmem>>, vector<8x128xf32>,
    %c5_i32 = arith.constant 5 : i32
    %c8_i32_108 = arith.constant 8 : i32
    %280 = arith.muli %c5_i32, %c8_i32_108 : i32
    %281 = tpu.assume_multiple %280, 8 : i32
    %c7_i32_109 = arith.constant 7 : i32
    %282 = arith.subi %c7_i32_109, %c5_i32 : i32
    %c8_i32_110 = arith.constant 8 : i32
    %283 = arith.muli %282, %c8_i32_110 : i32
    %284 = tpu.assume_multiple %283, 8 : i32
    %285 = arith.index_cast %281 : i32 to index
    %c0_111 = arith.constant 0 : index
    %286 = vector.load %arg13[%285, %c0_111] : memref<64x512xf32, #tpu.memory_space<vmem>>, vector<8x512xf32>
    %287 = arith.index_cast %284 : i32 to index
    %c0_112 = arith.constant 0 : index
    %288 = vector.load %arg14[%287, %c0_112] : memref<64x512xf32, #tpu.memory_space<vmem>>, vector<8x512xf32>
    %289 = arith.addf %286, %288 : vector<8x512xf32>
    %cst_113 = arith.constant dense<0.000000e+00> : vector<8x512xf32>
    %290 = tpu.matmul %269, %14, %cst_113 {dimension_numbers = #tpu.dot_dimension_numbers<[1], [0], [0], [1], [0, 0, 1, 1], [], []>} : vector<8x128xf32>, vector<128x512xf32>, vector<8x512xf32> -> vector<8x512xf32>
    %291 = arith.addf %289, %290 : vector<8x512xf32>
    %292 = vector.extract_strided_slice %291 {offsets = [0, 0], sizes = [8, 128], strides = [1, 1]} : vector<8x512xf32> to vector<8x128xf32>
    %cst_114 = arith.constant 5.000000e-01 : f32
    %293 = vector.broadcast %cst_114 : f32 to vector<8x128xf32>
    %294 = arith.mulf %293, %292 : vector<8x128xf32>
    %295 = math.tanh %294 : vector<8x128xf32>
    %cst_115 = arith.constant 5.000000e-01 : f32
    %296 = vector.broadcast %cst_115 : f32 to vector<8x128xf32>
    %297 = arith.mulf %296, %295 : vector<8x128xf32>
    %cst_116 = arith.constant 5.000000e-01 : f32
    %298 = vector.broadcast %cst_116 : f32 to vector<8x128xf32>
    %299 = arith.addf %297, %298 : vector<8x128xf32>
    %300 = vector.extract_strided_slice %291 {offsets = [0, 128], sizes = [8, 128], strides = [1, 1]} : vector<8x512xf32> to vector<8x128xf32>
    %cst_117 = arith.constant 5.000000e-01 : f32
    %301 = vector.broadcast %cst_117 : f32 to vector<8x128xf32>
    %302 = arith.mulf %301, %300 : vector<8x128xf32>
    %303 = math.tanh %302 : vector<8x128xf32>
    %cst_118 = arith.constant 5.000000e-01 : f32
    %304 = vector.broadcast %cst_118 : f32 to vector<8x128xf32>
    %305 = arith.mulf %304, %303 : vector<8x128xf32>
    %cst_119 = arith.constant 5.000000e-01 : f32
    %306 = vector.broadcast %cst_119 : f32 to vector<8x128xf32>
    %307 = arith.addf %305, %306 : vector<8x128xf32>
    %308 = vector.extract_strided_slice %291 {offsets = [0, 256], sizes = [8, 128], strides = [1, 1]} : vector<8x512xf32> to vector<8x128xf32>
    %309 = math.tanh %308 : vector<8x128xf32>
    %310 = vector.extract_strided_slice %291 {offsets = [0, 384], sizes = [8, 128], strides = [1, 1]} : vector<8x512xf32> to vector<8x128xf32>
    %cst_120 = arith.constant 5.000000e-01 : f32
    %311 = vector.broadcast %cst_120 : f32 to vector<8x128xf32>
    %312 = arith.mulf %311, %310 : vector<8x128xf32>
    %313 = math.tanh %312 : vector<8x128xf32>
    %cst_121 = arith.constant 5.000000e-01 : f32
    %314 = vector.broadcast %cst_121 : f32 to vector<8x128xf32>
    %315 = arith.mulf %314, %313 : vector<8x128xf32>
    %cst_122 = arith.constant 5.000000e-01 : f32
    %316 = vector.broadcast %cst_122 : f32 to vector<8x128xf32>
    %317 = arith.addf %315, %316 : vector<8x128xf32>
    %318 = arith.mulf %307, %267 : vector<8x128xf32>
    %319 = arith.mulf %299, %309 : vector<8x128xf32>
    %320 = arith.addf %318, %319 : vector<8x128xf32>
    %321 = math.tanh %320 : vector<8x128xf32>
    %322 = arith.mulf %317, %321 : vector<8x128xf32>
    %323 = arith.index_cast %281 : i32 to index
    %c0_123 = arith.constant 0 : index
    %324 = vector.load %arg15[%323, %c0_123] : memref<64x128xf32, #tpu.memory_space<vmem>>, vector<8x128xf32>
    %325 = arith.select %3, %322, %324 : vector<8x128xi1>, vector<8x128xf32>
    %326 = arith.index_cast %281 : i32 to index
    %c0_124 = arith.constant 0 : index
    %327 = vector.load %arg15[%326, %c0_124] : memref<64x128xf32, #tpu.memory_space<vmem>>, vector<8x128xf32>
    tpu.vector_store %arg15[%326, %c0_124], %325 {strides = array<i32>} : memref<64x128xf32, #tpu.memory_space<vmem>>, vector<8x128xf32>,
    %328 = arith.index_cast %284 : i32 to index
    %c0_125 = arith.constant 0 : index
    %329 = vector.load %arg15[%328, %c0_125] : memref<64x128xf32, #tpu.memory_space<vmem>>, vector<8x128xf32>
    %330 = arith.select %3, %329, %322 : vector<8x128xi1>, vector<8x128xf32>
    %331 = arith.index_cast %284 : i32 to index
    %c0_126 = arith.constant 0 : index
    %332 = vector.load %arg15[%331, %c0_126] : memref<64x128xf32, #tpu.memory_space<vmem>>, vector<8x128xf32>
    tpu.vector_store %arg15[%331, %c0_126], %330 {strides = array<i32>} : memref<64x128xf32, #tpu.memory_space<vmem>>, vector<8x128xf32>,
    %c6_i32 = arith.constant 6 : i32
    %c8_i32_127 = arith.constant 8 : i32
    %333 = arith.muli %c6_i32, %c8_i32_127 : i32
    %334 = tpu.assume_multiple %333, 8 : i32
    %c7_i32_128 = arith.constant 7 : i32
    %335 = arith.subi %c7_i32_128, %c6_i32 : i32
    %c8_i32_129 = arith.constant 8 : i32
    %336 = arith.muli %335, %c8_i32_129 : i32
    %337 = tpu.assume_multiple %336, 8 : i32
    %338 = arith.index_cast %334 : i32 to index
    %c0_130 = arith.constant 0 : index
    %339 = vector.load %arg13[%338, %c0_130] : memref<64x512xf32, #tpu.memory_space<vmem>>, vector<8x512xf32>
    %340 = arith.index_cast %337 : i32 to index
    %c0_131 = arith.constant 0 : index
    %341 = vector.load %arg14[%340, %c0_131] : memref<64x512xf32, #tpu.memory_space<vmem>>, vector<8x512xf32>
    %342 = arith.addf %339, %341 : vector<8x512xf32>
    %cst_132 = arith.constant dense<0.000000e+00> : vector<8x512xf32>
    %343 = tpu.matmul %322, %14, %cst_132 {dimension_numbers = #tpu.dot_dimension_numbers<[1], [0], [0], [1], [0, 0, 1, 1], [], []>} : vector<8x128xf32>, vector<128x512xf32>, vector<8x512xf32> -> vector<8x512xf32>
    %344 = arith.addf %342, %343 : vector<8x512xf32>
    %345 = vector.extract_strided_slice %344 {offsets = [0, 0], sizes = [8, 128], strides = [1, 1]} : vector<8x512xf32> to vector<8x128xf32>
    %cst_133 = arith.constant 5.000000e-01 : f32
    %346 = vector.broadcast %cst_133 : f32 to vector<8x128xf32>
    %347 = arith.mulf %346, %345 : vector<8x128xf32>
    %348 = math.tanh %347 : vector<8x128xf32>
    %cst_134 = arith.constant 5.000000e-01 : f32
    %349 = vector.broadcast %cst_134 : f32 to vector<8x128xf32>
    %350 = arith.mulf %349, %348 : vector<8x128xf32>
    %cst_135 = arith.constant 5.000000e-01 : f32
    %351 = vector.broadcast %cst_135 : f32 to vector<8x128xf32>
    %352 = arith.addf %350, %351 : vector<8x128xf32>
    %353 = vector.extract_strided_slice %344 {offsets = [0, 128], sizes = [8, 128], strides = [1, 1]} : vector<8x512xf32> to vector<8x128xf32>
    %cst_136 = arith.constant 5.000000e-01 : f32
    %354 = vector.broadcast %cst_136 : f32 to vector<8x128xf32>
    %355 = arith.mulf %354, %353 : vector<8x128xf32>
    %356 = math.tanh %355 : vector<8x128xf32>
    %cst_137 = arith.constant 5.000000e-01 : f32
    %357 = vector.broadcast %cst_137 : f32 to vector<8x128xf32>
    %358 = arith.mulf %357, %356 : vector<8x128xf32>
    %cst_138 = arith.constant 5.000000e-01 : f32
    %359 = vector.broadcast %cst_138 : f32 to vector<8x128xf32>
    %360 = arith.addf %358, %359 : vector<8x128xf32>
    %361 = vector.extract_strided_slice %344 {offsets = [0, 256], sizes = [8, 128], strides = [1, 1]} : vector<8x512xf32> to vector<8x128xf32>
    %362 = math.tanh %361 : vector<8x128xf32>
    %363 = vector.extract_strided_slice %344 {offsets = [0, 384], sizes = [8, 128], strides = [1, 1]} : vector<8x512xf32> to vector<8x128xf32>
    %cst_139 = arith.constant 5.000000e-01 : f32
    %364 = vector.broadcast %cst_139 : f32 to vector<8x128xf32>
    %365 = arith.mulf %364, %363 : vector<8x128xf32>
    %366 = math.tanh %365 : vector<8x128xf32>
    %cst_140 = arith.constant 5.000000e-01 : f32
    %367 = vector.broadcast %cst_140 : f32 to vector<8x128xf32>
    %368 = arith.mulf %367, %366 : vector<8x128xf32>
    %cst_141 = arith.constant 5.000000e-01 : f32
    %369 = vector.broadcast %cst_141 : f32 to vector<8x128xf32>
    %370 = arith.addf %368, %369 : vector<8x128xf32>
    %371 = arith.mulf %360, %320 : vector<8x128xf32>
    %372 = arith.mulf %352, %362 : vector<8x128xf32>
    %373 = arith.addf %371, %372 : vector<8x128xf32>
    %374 = math.tanh %373 : vector<8x128xf32>
    %375 = arith.mulf %370, %374 : vector<8x128xf32>
    %376 = arith.index_cast %334 : i32 to index
    %c0_142 = arith.constant 0 : index
    %377 = vector.load %arg15[%376, %c0_142] : memref<64x128xf32, #tpu.memory_space<vmem>>, vector<8x128xf32>
    %378 = arith.select %3, %375, %377 : vector<8x128xi1>, vector<8x128xf32>
    %379 = arith.index_cast %334 : i32 to index
    %c0_143 = arith.constant 0 : index
    %380 = vector.load %arg15[%379, %c0_143] : memref<64x128xf32, #tpu.memory_space<vmem>>, vector<8x128xf32>
    tpu.vector_store %arg15[%379, %c0_143], %378 {strides = array<i32>} : memref<64x128xf32, #tpu.memory_space<vmem>>, vector<8x128xf32>,
    %381 = arith.index_cast %337 : i32 to index
    %c0_144 = arith.constant 0 : index
    %382 = vector.load %arg15[%381, %c0_144] : memref<64x128xf32, #tpu.memory_space<vmem>>, vector<8x128xf32>
    %383 = arith.select %3, %382, %375 : vector<8x128xi1>, vector<8x128xf32>
    %384 = arith.index_cast %337 : i32 to index
    %c0_145 = arith.constant 0 : index
    %385 = vector.load %arg15[%384, %c0_145] : memref<64x128xf32, #tpu.memory_space<vmem>>, vector<8x128xf32>
    tpu.vector_store %arg15[%384, %c0_145], %383 {strides = array<i32>} : memref<64x128xf32, #tpu.memory_space<vmem>>, vector<8x128xf32>,
    %c7_i32_146 = arith.constant 7 : i32
    %c8_i32_147 = arith.constant 8 : i32
    %386 = arith.muli %c7_i32_146, %c8_i32_147 : i32
    %387 = tpu.assume_multiple %386, 8 : i32
    %c7_i32_148 = arith.constant 7 : i32
    %388 = arith.subi %c7_i32_148, %c7_i32_146 : i32
    %c8_i32_149 = arith.constant 8 : i32
    %389 = arith.muli %388, %c8_i32_149 : i32
    %390 = tpu.assume_multiple %389, 8 : i32
    %391 = arith.index_cast %387 : i32 to index
    %c0_150 = arith.constant 0 : index
    %392 = vector.load %arg13[%391, %c0_150] : memref<64x512xf32, #tpu.memory_space<vmem>>, vector<8x512xf32>
    %393 = arith.index_cast %390 : i32 to index
    %c0_151 = arith.constant 0 : index
    %394 = vector.load %arg14[%393, %c0_151] : memref<64x512xf32, #tpu.memory_space<vmem>>, vector<8x512xf32>
    %395 = arith.addf %392, %394 : vector<8x512xf32>
    %cst_152 = arith.constant dense<0.000000e+00> : vector<8x512xf32>
    %396 = tpu.matmul %375, %14, %cst_152 {dimension_numbers = #tpu.dot_dimension_numbers<[1], [0], [0], [1], [0, 0, 1, 1], [], []>} : vector<8x128xf32>, vector<128x512xf32>, vector<8x512xf32> -> vector<8x512xf32>
    %397 = arith.addf %395, %396 : vector<8x512xf32>
    %398 = vector.extract_strided_slice %397 {offsets = [0, 0], sizes = [8, 128], strides = [1, 1]} : vector<8x512xf32> to vector<8x128xf32>
    %cst_153 = arith.constant 5.000000e-01 : f32
    %399 = vector.broadcast %cst_153 : f32 to vector<8x128xf32>
    %400 = arith.mulf %399, %398 : vector<8x128xf32>
    %401 = math.tanh %400 : vector<8x128xf32>
    %cst_154 = arith.constant 5.000000e-01 : f32
    %402 = vector.broadcast %cst_154 : f32 to vector<8x128xf32>
    %403 = arith.mulf %402, %401 : vector<8x128xf32>
    %cst_155 = arith.constant 5.000000e-01 : f32
    %404 = vector.broadcast %cst_155 : f32 to vector<8x128xf32>
    %405 = arith.addf %403, %404 : vector<8x128xf32>
    %406 = vector.extract_strided_slice %397 {offsets = [0, 128], sizes = [8, 128], strides = [1, 1]} : vector<8x512xf32> to vector<8x128xf32>
    %cst_156 = arith.constant 5.000000e-01 : f32
    %407 = vector.broadcast %cst_156 : f32 to vector<8x128xf32>
    %408 = arith.mulf %407, %406 : vector<8x128xf32>
    %409 = math.tanh %408 : vector<8x128xf32>
    %cst_157 = arith.constant 5.000000e-01 : f32
    %410 = vector.broadcast %cst_157 : f32 to vector<8x128xf32>
    %411 = arith.mulf %410, %409 : vector<8x128xf32>
    %cst_158 = arith.constant 5.000000e-01 : f32
    %412 = vector.broadcast %cst_158 : f32 to vector<8x128xf32>
    %413 = arith.addf %411, %412 : vector<8x128xf32>
    %414 = vector.extract_strided_slice %397 {offsets = [0, 256], sizes = [8, 128], strides = [1, 1]} : vector<8x512xf32> to vector<8x128xf32>
    %415 = math.tanh %414 : vector<8x128xf32>
    %416 = vector.extract_strided_slice %397 {offsets = [0, 384], sizes = [8, 128], strides = [1, 1]} : vector<8x512xf32> to vector<8x128xf32>
    %cst_159 = arith.constant 5.000000e-01 : f32
    %417 = vector.broadcast %cst_159 : f32 to vector<8x128xf32>
    %418 = arith.mulf %417, %416 : vector<8x128xf32>
    %419 = math.tanh %418 : vector<8x128xf32>
    %cst_160 = arith.constant 5.000000e-01 : f32
    %420 = vector.broadcast %cst_160 : f32 to vector<8x128xf32>
    %421 = arith.mulf %420, %419 : vector<8x128xf32>
    %cst_161 = arith.constant 5.000000e-01 : f32
    %422 = vector.broadcast %cst_161 : f32 to vector<8x128xf32>
    %423 = arith.addf %421, %422 : vector<8x128xf32>
    %424 = arith.mulf %413, %373 : vector<8x128xf32>
    %425 = arith.mulf %405, %415 : vector<8x128xf32>
    %426 = arith.addf %424, %425 : vector<8x128xf32>
    %427 = math.tanh %426 : vector<8x128xf32>
    %428 = arith.mulf %423, %427 : vector<8x128xf32>
    %429 = arith.index_cast %387 : i32 to index
    %c0_162 = arith.constant 0 : index
    %430 = vector.load %arg15[%429, %c0_162] : memref<64x128xf32, #tpu.memory_space<vmem>>, vector<8x128xf32>
    %431 = arith.select %3, %428, %430 : vector<8x128xi1>, vector<8x128xf32>
    %432 = arith.index_cast %387 : i32 to index
    %c0_163 = arith.constant 0 : index
    %433 = vector.load %arg15[%432, %c0_163] : memref<64x128xf32, #tpu.memory_space<vmem>>, vector<8x128xf32>
    tpu.vector_store %arg15[%432, %c0_163], %431 {strides = array<i32>} : memref<64x128xf32, #tpu.memory_space<vmem>>, vector<8x128xf32>,
    %434 = arith.index_cast %390 : i32 to index
    %c0_164 = arith.constant 0 : index
    %435 = vector.load %arg15[%434, %c0_164] : memref<64x128xf32, #tpu.memory_space<vmem>>, vector<8x128xf32>
    %436 = arith.select %3, %435, %428 : vector<8x128xi1>, vector<8x128xf32>
    %437 = arith.index_cast %390 : i32 to index
    %c0_165 = arith.constant 0 : index
    %438 = vector.load %arg15[%437, %c0_165] : memref<64x128xf32, #tpu.memory_space<vmem>>, vector<8x128xf32>
    tpu.vector_store %arg15[%437, %c0_165], %436 {strides = array<i32>} : memref<64x128xf32, #tpu.memory_space<vmem>>, vector<8x128xf32>,
    %c8_i32_166 = arith.constant 8 : i32
    %c0_167 = arith.constant 0 : index
    %c0_168 = arith.constant 0 : index
    %439 = vector.load %arg15[%c0_167, %c0_168] : memref<64x128xf32, #tpu.memory_space<vmem>>, vector<64x128xf32>
    %c0_169 = arith.constant 0 : index
    %c0_170 = arith.constant 0 : index
    %440 = vector.load %arg5[%c0_169, %c0_170] : memref<128x512xf32, #tpu.memory_space<vmem>>, vector<128x512xf32>
    %cst_171 = arith.constant dense<0.000000e+00> : vector<64x512xf32>
    %441 = tpu.matmul %439, %440, %cst_171 {dimension_numbers = #tpu.dot_dimension_numbers<[1], [0], [0], [1], [0, 0, 1, 1], [], []>} : vector<64x128xf32>, vector<128x512xf32>, vector<64x512xf32> -> vector<64x512xf32>
    %c0_172 = arith.constant 0 : index
    %c0_173 = arith.constant 0 : index
    %442 = vector.load %arg6[%c0_172, %c0_173] : memref<1x512xf32, #tpu.memory_space<vmem>>, vector<1x512xf32>
    %443 = vector.broadcast %442 : vector<1x512xf32> to vector<64x512xf32>
    %444 = arith.addf %441, %443 : vector<64x512xf32>
    %c0_174 = arith.constant 0 : index
    %c0_175 = arith.constant 0 : index
    %445 = vector.load %arg13[%c0_174, %c0_175] : memref<64x512xf32, #tpu.memory_space<vmem>>, vector<64x512xf32>
    tpu.vector_store %arg13[%c0_174, %c0_175], %444 {strides = array<i32>} : memref<64x512xf32, #tpu.memory_space<vmem>>, vector<64x512xf32>,
    %c0_176 = arith.constant 0 : index
    %c0_177 = arith.constant 0 : index
    %446 = vector.load %arg7[%c0_176, %c0_177] : memref<128x512xf32, #tpu.memory_space<vmem>>, vector<128x512xf32>
    %c0_i32_178 = arith.constant 0 : i32
    %c8_i32_179 = arith.constant 8 : i32
    %447 = arith.muli %c0_i32_178, %c8_i32_179 : i32
    %448 = tpu.assume_multiple %447, 8 : i32
    %449 = arith.index_cast %448 : i32 to index
    %c0_180 = arith.constant 0 : index
    %450 = vector.load %arg13[%449, %c0_180] : memref<64x512xf32, #tpu.memory_space<vmem>>, vector<8x512xf32>
    %cst_181 = arith.constant dense<0.000000e+00> : vector<8x512xf32>
    %451 = tpu.matmul %0, %446, %cst_181 {dimension_numbers = #tpu.dot_dimension_numbers<[1], [0], [0], [1], [0, 0, 1, 1], [], []>} : vector<8x128xf32>, vector<128x512xf32>, vector<8x512xf32> -> vector<8x512xf32>
    %452 = arith.addf %450, %451 : vector<8x512xf32>
    %453 = vector.extract_strided_slice %452 {offsets = [0, 0], sizes = [8, 128], strides = [1, 1]} : vector<8x512xf32> to vector<8x128xf32>
    %cst_182 = arith.constant 5.000000e-01 : f32
    %454 = vector.broadcast %cst_182 : f32 to vector<8x128xf32>
    %455 = arith.mulf %454, %453 : vector<8x128xf32>
    %456 = math.tanh %455 : vector<8x128xf32>
    %cst_183 = arith.constant 5.000000e-01 : f32
    %457 = vector.broadcast %cst_183 : f32 to vector<8x128xf32>
    %458 = arith.mulf %457, %456 : vector<8x128xf32>
    %cst_184 = arith.constant 5.000000e-01 : f32
    %459 = vector.broadcast %cst_184 : f32 to vector<8x128xf32>
    %460 = arith.addf %458, %459 : vector<8x128xf32>
    %461 = vector.extract_strided_slice %452 {offsets = [0, 128], sizes = [8, 128], strides = [1, 1]} : vector<8x512xf32> to vector<8x128xf32>
    %cst_185 = arith.constant 5.000000e-01 : f32
    %462 = vector.broadcast %cst_185 : f32 to vector<8x128xf32>
    %463 = arith.mulf %462, %461 : vector<8x128xf32>
    %464 = math.tanh %463 : vector<8x128xf32>
    %cst_186 = arith.constant 5.000000e-01 : f32
    %465 = vector.broadcast %cst_186 : f32 to vector<8x128xf32>
    %466 = arith.mulf %465, %464 : vector<8x128xf32>
    %cst_187 = arith.constant 5.000000e-01 : f32
    %467 = vector.broadcast %cst_187 : f32 to vector<8x128xf32>
    %468 = arith.addf %466, %467 : vector<8x128xf32>
    %469 = vector.extract_strided_slice %452 {offsets = [0, 256], sizes = [8, 128], strides = [1, 1]} : vector<8x512xf32> to vector<8x128xf32>
    %470 = math.tanh %469 : vector<8x128xf32>
    %471 = vector.extract_strided_slice %452 {offsets = [0, 384], sizes = [8, 128], strides = [1, 1]} : vector<8x512xf32> to vector<8x128xf32>
    %cst_188 = arith.constant 5.000000e-01 : f32
    %472 = vector.broadcast %cst_188 : f32 to vector<8x128xf32>
    %473 = arith.mulf %472, %471 : vector<8x128xf32>
    %474 = math.tanh %473 : vector<8x128xf32>
    %cst_189 = arith.constant 5.000000e-01 : f32
    %475 = vector.broadcast %cst_189 : f32 to vector<8x128xf32>
    %476 = arith.mulf %475, %474 : vector<8x128xf32>
    %cst_190 = arith.constant 5.000000e-01 : f32
    %477 = vector.broadcast %cst_190 : f32 to vector<8x128xf32>
    %478 = arith.addf %476, %477 : vector<8x128xf32>
    %479 = arith.mulf %468, %0 : vector<8x128xf32>
    %480 = arith.mulf %460, %470 : vector<8x128xf32>
    %481 = arith.addf %479, %480 : vector<8x128xf32>
    %482 = math.tanh %481 : vector<8x128xf32>
    %483 = arith.mulf %478, %482 : vector<8x128xf32>
    %c1_i32_191 = arith.constant 1 : i32
    %c8_i32_192 = arith.constant 8 : i32
    %484 = arith.muli %c1_i32_191, %c8_i32_192 : i32
    %485 = tpu.assume_multiple %484, 8 : i32
    %486 = arith.index_cast %485 : i32 to index
    %c0_193 = arith.constant 0 : index
    %487 = vector.load %arg13[%486, %c0_193] : memref<64x512xf32, #tpu.memory_space<vmem>>, vector<8x512xf32>
    %cst_194 = arith.constant dense<0.000000e+00> : vector<8x512xf32>
    %488 = tpu.matmul %483, %446, %cst_194 {dimension_numbers = #tpu.dot_dimension_numbers<[1], [0], [0], [1], [0, 0, 1, 1], [], []>} : vector<8x128xf32>, vector<128x512xf32>, vector<8x512xf32> -> vector<8x512xf32>
    %489 = arith.addf %487, %488 : vector<8x512xf32>
    %490 = vector.extract_strided_slice %489 {offsets = [0, 0], sizes = [8, 128], strides = [1, 1]} : vector<8x512xf32> to vector<8x128xf32>
    %cst_195 = arith.constant 5.000000e-01 : f32
    %491 = vector.broadcast %cst_195 : f32 to vector<8x128xf32>
    %492 = arith.mulf %491, %490 : vector<8x128xf32>
    %493 = math.tanh %492 : vector<8x128xf32>
    %cst_196 = arith.constant 5.000000e-01 : f32
    %494 = vector.broadcast %cst_196 : f32 to vector<8x128xf32>
    %495 = arith.mulf %494, %493 : vector<8x128xf32>
    %cst_197 = arith.constant 5.000000e-01 : f32
    %496 = vector.broadcast %cst_197 : f32 to vector<8x128xf32>
    %497 = arith.addf %495, %496 : vector<8x128xf32>
    %498 = vector.extract_strided_slice %489 {offsets = [0, 128], sizes = [8, 128], strides = [1, 1]} : vector<8x512xf32> to vector<8x128xf32>
    %cst_198 = arith.constant 5.000000e-01 : f32
    %499 = vector.broadcast %cst_198 : f32 to vector<8x128xf32>
    %500 = arith.mulf %499, %498 : vector<8x128xf32>
    %501 = math.tanh %500 : vector<8x128xf32>
    %cst_199 = arith.constant 5.000000e-01 : f32
    %502 = vector.broadcast %cst_199 : f32 to vector<8x128xf32>
    %503 = arith.mulf %502, %501 : vector<8x128xf32>
    %cst_200 = arith.constant 5.000000e-01 : f32
    %504 = vector.broadcast %cst_200 : f32 to vector<8x128xf32>
    %505 = arith.addf %503, %504 : vector<8x128xf32>
    %506 = vector.extract_strided_slice %489 {offsets = [0, 256], sizes = [8, 128], strides = [1, 1]} : vector<8x512xf32> to vector<8x128xf32>
    %507 = math.tanh %506 : vector<8x128xf32>
    %508 = vector.extract_strided_slice %489 {offsets = [0, 384], sizes = [8, 128], strides = [1, 1]} : vector<8x512xf32> to vector<8x128xf32>
    %cst_201 = arith.constant 5.000000e-01 : f32
    %509 = vector.broadcast %cst_201 : f32 to vector<8x128xf32>
    %510 = arith.mulf %509, %508 : vector<8x128xf32>
    %511 = math.tanh %510 : vector<8x128xf32>
    %cst_202 = arith.constant 5.000000e-01 : f32
    %512 = vector.broadcast %cst_202 : f32 to vector<8x128xf32>
    %513 = arith.mulf %512, %511 : vector<8x128xf32>
    %cst_203 = arith.constant 5.000000e-01 : f32
    %514 = vector.broadcast %cst_203 : f32 to vector<8x128xf32>
    %515 = arith.addf %513, %514 : vector<8x128xf32>
    %516 = arith.mulf %505, %481 : vector<8x128xf32>
    %517 = arith.mulf %497, %507 : vector<8x128xf32>
    %518 = arith.addf %516, %517 : vector<8x128xf32>
    %519 = math.tanh %518 : vector<8x128xf32>
    %520 = arith.mulf %515, %519 : vector<8x128xf32>
    %c2_i32_204 = arith.constant 2 : i32
    %c8_i32_205 = arith.constant 8 : i32
    %521 = arith.muli %c2_i32_204, %c8_i32_205 : i32
    %522 = tpu.assume_multiple %521, 8 : i32
    %523 = arith.index_cast %522 : i32 to index
    %c0_206 = arith.constant 0 : index
    %524 = vector.load %arg13[%523, %c0_206] : memref<64x512xf32, #tpu.memory_space<vmem>>, vector<8x512xf32>
    %cst_207 = arith.constant dense<0.000000e+00> : vector<8x512xf32>
    %525 = tpu.matmul %520, %446, %cst_207 {dimension_numbers = #tpu.dot_dimension_numbers<[1], [0], [0], [1], [0, 0, 1, 1], [], []>} : vector<8x128xf32>, vector<128x512xf32>, vector<8x512xf32> -> vector<8x512xf32>
    %526 = arith.addf %524, %525 : vector<8x512xf32>
    %527 = vector.extract_strided_slice %526 {offsets = [0, 0], sizes = [8, 128], strides = [1, 1]} : vector<8x512xf32> to vector<8x128xf32>
    %cst_208 = arith.constant 5.000000e-01 : f32
    %528 = vector.broadcast %cst_208 : f32 to vector<8x128xf32>
    %529 = arith.mulf %528, %527 : vector<8x128xf32>
    %530 = math.tanh %529 : vector<8x128xf32>
    %cst_209 = arith.constant 5.000000e-01 : f32
    %531 = vector.broadcast %cst_209 : f32 to vector<8x128xf32>
    %532 = arith.mulf %531, %530 : vector<8x128xf32>
    %cst_210 = arith.constant 5.000000e-01 : f32
    %533 = vector.broadcast %cst_210 : f32 to vector<8x128xf32>
    %534 = arith.addf %532, %533 : vector<8x128xf32>
    %535 = vector.extract_strided_slice %526 {offsets = [0, 128], sizes = [8, 128], strides = [1, 1]} : vector<8x512xf32> to vector<8x128xf32>
    %cst_211 = arith.constant 5.000000e-01 : f32
    %536 = vector.broadcast %cst_211 : f32 to vector<8x128xf32>
    %537 = arith.mulf %536, %535 : vector<8x128xf32>
    %538 = math.tanh %537 : vector<8x128xf32>
    %cst_212 = arith.constant 5.000000e-01 : f32
    %539 = vector.broadcast %cst_212 : f32 to vector<8x128xf32>
    %540 = arith.mulf %539, %538 : vector<8x128xf32>
    %cst_213 = arith.constant 5.000000e-01 : f32
    %541 = vector.broadcast %cst_213 : f32 to vector<8x128xf32>
    %542 = arith.addf %540, %541 : vector<8x128xf32>
    %543 = vector.extract_strided_slice %526 {offsets = [0, 256], sizes = [8, 128], strides = [1, 1]} : vector<8x512xf32> to vector<8x128xf32>
    %544 = math.tanh %543 : vector<8x128xf32>
    %545 = vector.extract_strided_slice %526 {offsets = [0, 384], sizes = [8, 128], strides = [1, 1]} : vector<8x512xf32> to vector<8x128xf32>
    %cst_214 = arith.constant 5.000000e-01 : f32
    %546 = vector.broadcast %cst_214 : f32 to vector<8x128xf32>
    %547 = arith.mulf %546, %545 : vector<8x128xf32>
    %548 = math.tanh %547 : vector<8x128xf32>
    %cst_215 = arith.constant 5.000000e-01 : f32
    %549 = vector.broadcast %cst_215 : f32 to vector<8x128xf32>
    %550 = arith.mulf %549, %548 : vector<8x128xf32>
    %cst_216 = arith.constant 5.000000e-01 : f32
    %551 = vector.broadcast %cst_216 : f32 to vector<8x128xf32>
    %552 = arith.addf %550, %551 : vector<8x128xf32>
    %553 = arith.mulf %542, %518 : vector<8x128xf32>
    %554 = arith.mulf %534, %544 : vector<8x128xf32>
    %555 = arith.addf %553, %554 : vector<8x128xf32>
    %556 = math.tanh %555 : vector<8x128xf32>
    %557 = arith.mulf %552, %556 : vector<8x128xf32>
    %c3_i32_217 = arith.constant 3 : i32
    %c8_i32_218 = arith.constant 8 : i32
    %558 = arith.muli %c3_i32_217, %c8_i32_218 : i32
    %559 = tpu.assume_multiple %558, 8 : i32
    %560 = arith.index_cast %559 : i32 to index
    %c0_219 = arith.constant 0 : index
    %561 = vector.load %arg13[%560, %c0_219] : memref<64x512xf32, #tpu.memory_space<vmem>>, vector<8x512xf32>
    %cst_220 = arith.constant dense<0.000000e+00> : vector<8x512xf32>
    %562 = tpu.matmul %557, %446, %cst_220 {dimension_numbers = #tpu.dot_dimension_numbers<[1], [0], [0], [1], [0, 0, 1, 1], [], []>} : vector<8x128xf32>, vector<128x512xf32>, vector<8x512xf32> -> vector<8x512xf32>
    %563 = arith.addf %561, %562 : vector<8x512xf32>
    %564 = vector.extract_strided_slice %563 {offsets = [0, 0], sizes = [8, 128], strides = [1, 1]} : vector<8x512xf32> to vector<8x128xf32>
    %cst_221 = arith.constant 5.000000e-01 : f32
    %565 = vector.broadcast %cst_221 : f32 to vector<8x128xf32>
    %566 = arith.mulf %565, %564 : vector<8x128xf32>
    %567 = math.tanh %566 : vector<8x128xf32>
    %cst_222 = arith.constant 5.000000e-01 : f32
    %568 = vector.broadcast %cst_222 : f32 to vector<8x128xf32>
    %569 = arith.mulf %568, %567 : vector<8x128xf32>
    %cst_223 = arith.constant 5.000000e-01 : f32
    %570 = vector.broadcast %cst_223 : f32 to vector<8x128xf32>
    %571 = arith.addf %569, %570 : vector<8x128xf32>
    %572 = vector.extract_strided_slice %563 {offsets = [0, 128], sizes = [8, 128], strides = [1, 1]} : vector<8x512xf32> to vector<8x128xf32>
    %cst_224 = arith.constant 5.000000e-01 : f32
    %573 = vector.broadcast %cst_224 : f32 to vector<8x128xf32>
    %574 = arith.mulf %573, %572 : vector<8x128xf32>
    %575 = math.tanh %574 : vector<8x128xf32>
    %cst_225 = arith.constant 5.000000e-01 : f32
    %576 = vector.broadcast %cst_225 : f32 to vector<8x128xf32>
    %577 = arith.mulf %576, %575 : vector<8x128xf32>
    %cst_226 = arith.constant 5.000000e-01 : f32
    %578 = vector.broadcast %cst_226 : f32 to vector<8x128xf32>
    %579 = arith.addf %577, %578 : vector<8x128xf32>
    %580 = vector.extract_strided_slice %563 {offsets = [0, 256], sizes = [8, 128], strides = [1, 1]} : vector<8x512xf32> to vector<8x128xf32>
    %581 = math.tanh %580 : vector<8x128xf32>
    %582 = vector.extract_strided_slice %563 {offsets = [0, 384], sizes = [8, 128], strides = [1, 1]} : vector<8x512xf32> to vector<8x128xf32>
    %cst_227 = arith.constant 5.000000e-01 : f32
    %583 = vector.broadcast %cst_227 : f32 to vector<8x128xf32>
    %584 = arith.mulf %583, %582 : vector<8x128xf32>
    %585 = math.tanh %584 : vector<8x128xf32>
    %cst_228 = arith.constant 5.000000e-01 : f32
    %586 = vector.broadcast %cst_228 : f32 to vector<8x128xf32>
    %587 = arith.mulf %586, %585 : vector<8x128xf32>
    %cst_229 = arith.constant 5.000000e-01 : f32
    %588 = vector.broadcast %cst_229 : f32 to vector<8x128xf32>
    %589 = arith.addf %587, %588 : vector<8x128xf32>
    %590 = arith.mulf %579, %555 : vector<8x128xf32>
    %591 = arith.mulf %571, %581 : vector<8x128xf32>
    %592 = arith.addf %590, %591 : vector<8x128xf32>
    %593 = math.tanh %592 : vector<8x128xf32>
    %594 = arith.mulf %589, %593 : vector<8x128xf32>
    %c4_i32_230 = arith.constant 4 : i32
    %c8_i32_231 = arith.constant 8 : i32
    %595 = arith.muli %c4_i32_230, %c8_i32_231 : i32
    %596 = tpu.assume_multiple %595, 8 : i32
    %597 = arith.index_cast %596 : i32 to index
    %c0_232 = arith.constant 0 : index
    %598 = vector.load %arg13[%597, %c0_232] : memref<64x512xf32, #tpu.memory_space<vmem>>, vector<8x512xf32>
    %cst_233 = arith.constant dense<0.000000e+00> : vector<8x512xf32>
    %599 = tpu.matmul %594, %446, %cst_233 {dimension_numbers = #tpu.dot_dimension_numbers<[1], [0], [0], [1], [0, 0, 1, 1], [], []>} : vector<8x128xf32>, vector<128x512xf32>, vector<8x512xf32> -> vector<8x512xf32>
    %600 = arith.addf %598, %599 : vector<8x512xf32>
    %601 = vector.extract_strided_slice %600 {offsets = [0, 0], sizes = [8, 128], strides = [1, 1]} : vector<8x512xf32> to vector<8x128xf32>
    %cst_234 = arith.constant 5.000000e-01 : f32
    %602 = vector.broadcast %cst_234 : f32 to vector<8x128xf32>
    %603 = arith.mulf %602, %601 : vector<8x128xf32>
    %604 = math.tanh %603 : vector<8x128xf32>
    %cst_235 = arith.constant 5.000000e-01 : f32
    %605 = vector.broadcast %cst_235 : f32 to vector<8x128xf32>
    %606 = arith.mulf %605, %604 : vector<8x128xf32>
    %cst_236 = arith.constant 5.000000e-01 : f32
    %607 = vector.broadcast %cst_236 : f32 to vector<8x128xf32>
    %608 = arith.addf %606, %607 : vector<8x128xf32>
    %609 = vector.extract_strided_slice %600 {offsets = [0, 128], sizes = [8, 128], strides = [1, 1]} : vector<8x512xf32> to vector<8x128xf32>
    %cst_237 = arith.constant 5.000000e-01 : f32
    %610 = vector.broadcast %cst_237 : f32 to vector<8x128xf32>
    %611 = arith.mulf %610, %609 : vector<8x128xf32>
    %612 = math.tanh %611 : vector<8x128xf32>
    %cst_238 = arith.constant 5.000000e-01 : f32
    %613 = vector.broadcast %cst_238 : f32 to vector<8x128xf32>
    %614 = arith.mulf %613, %612 : vector<8x128xf32>
    %cst_239 = arith.constant 5.000000e-01 : f32
    %615 = vector.broadcast %cst_239 : f32 to vector<8x128xf32>
    %616 = arith.addf %614, %615 : vector<8x128xf32>
    %617 = vector.extract_strided_slice %600 {offsets = [0, 256], sizes = [8, 128], strides = [1, 1]} : vector<8x512xf32> to vector<8x128xf32>
    %618 = math.tanh %617 : vector<8x128xf32>
    %619 = vector.extract_strided_slice %600 {offsets = [0, 384], sizes = [8, 128], strides = [1, 1]} : vector<8x512xf32> to vector<8x128xf32>
    %cst_240 = arith.constant 5.000000e-01 : f32
    %620 = vector.broadcast %cst_240 : f32 to vector<8x128xf32>
    %621 = arith.mulf %620, %619 : vector<8x128xf32>
    %622 = math.tanh %621 : vector<8x128xf32>
    %cst_241 = arith.constant 5.000000e-01 : f32
    %623 = vector.broadcast %cst_241 : f32 to vector<8x128xf32>
    %624 = arith.mulf %623, %622 : vector<8x128xf32>
    %cst_242 = arith.constant 5.000000e-01 : f32
    %625 = vector.broadcast %cst_242 : f32 to vector<8x128xf32>
    %626 = arith.addf %624, %625 : vector<8x128xf32>
    %627 = arith.mulf %616, %592 : vector<8x128xf32>
    %628 = arith.mulf %608, %618 : vector<8x128xf32>
    %629 = arith.addf %627, %628 : vector<8x128xf32>
    %630 = math.tanh %629 : vector<8x128xf32>
    %631 = arith.mulf %626, %630 : vector<8x128xf32>
    %c5_i32_243 = arith.constant 5 : i32
    %c8_i32_244 = arith.constant 8 : i32
    %632 = arith.muli %c5_i32_243, %c8_i32_244 : i32
    %633 = tpu.assume_multiple %632, 8 : i32
    %634 = arith.index_cast %633 : i32 to index
    %c0_245 = arith.constant 0 : index
    %635 = vector.load %arg13[%634, %c0_245] : memref<64x512xf32, #tpu.memory_space<vmem>>, vector<8x512xf32>
    %cst_246 = arith.constant dense<0.000000e+00> : vector<8x512xf32>
    %636 = tpu.matmul %631, %446, %cst_246 {dimension_numbers = #tpu.dot_dimension_numbers<[1], [0], [0], [1], [0, 0, 1, 1], [], []>} : vector<8x128xf32>, vector<128x512xf32>, vector<8x512xf32> -> vector<8x512xf32>
    %637 = arith.addf %635, %636 : vector<8x512xf32>
    %638 = vector.extract_strided_slice %637 {offsets = [0, 0], sizes = [8, 128], strides = [1, 1]} : vector<8x512xf32> to vector<8x128xf32>
    %cst_247 = arith.constant 5.000000e-01 : f32
    %639 = vector.broadcast %cst_247 : f32 to vector<8x128xf32>
    %640 = arith.mulf %639, %638 : vector<8x128xf32>
    %641 = math.tanh %640 : vector<8x128xf32>
    %cst_248 = arith.constant 5.000000e-01 : f32
    %642 = vector.broadcast %cst_248 : f32 to vector<8x128xf32>
    %643 = arith.mulf %642, %641 : vector<8x128xf32>
    %cst_249 = arith.constant 5.000000e-01 : f32
    %644 = vector.broadcast %cst_249 : f32 to vector<8x128xf32>
    %645 = arith.addf %643, %644 : vector<8x128xf32>
    %646 = vector.extract_strided_slice %637 {offsets = [0, 128], sizes = [8, 128], strides = [1, 1]} : vector<8x512xf32> to vector<8x128xf32>
    %cst_250 = arith.constant 5.000000e-01 : f32
    %647 = vector.broadcast %cst_250 : f32 to vector<8x128xf32>
    %648 = arith.mulf %647, %646 : vector<8x128xf32>
    %649 = math.tanh %648 : vector<8x128xf32>
    %cst_251 = arith.constant 5.000000e-01 : f32
    %650 = vector.broadcast %cst_251 : f32 to vector<8x128xf32>
    %651 = arith.mulf %650, %649 : vector<8x128xf32>
    %cst_252 = arith.constant 5.000000e-01 : f32
    %652 = vector.broadcast %cst_252 : f32 to vector<8x128xf32>
    %653 = arith.addf %651, %652 : vector<8x128xf32>
    %654 = vector.extract_strided_slice %637 {offsets = [0, 256], sizes = [8, 128], strides = [1, 1]} : vector<8x512xf32> to vector<8x128xf32>
    %655 = math.tanh %654 : vector<8x128xf32>
    %656 = vector.extract_strided_slice %637 {offsets = [0, 384], sizes = [8, 128], strides = [1, 1]} : vector<8x512xf32> to vector<8x128xf32>
    %cst_253 = arith.constant 5.000000e-01 : f32
    %657 = vector.broadcast %cst_253 : f32 to vector<8x128xf32>
    %658 = arith.mulf %657, %656 : vector<8x128xf32>
    %659 = math.tanh %658 : vector<8x128xf32>
    %cst_254 = arith.constant 5.000000e-01 : f32
    %660 = vector.broadcast %cst_254 : f32 to vector<8x128xf32>
    %661 = arith.mulf %660, %659 : vector<8x128xf32>
    %cst_255 = arith.constant 5.000000e-01 : f32
    %662 = vector.broadcast %cst_255 : f32 to vector<8x128xf32>
    %663 = arith.addf %661, %662 : vector<8x128xf32>
    %664 = arith.mulf %653, %629 : vector<8x128xf32>
    %665 = arith.mulf %645, %655 : vector<8x128xf32>
    %666 = arith.addf %664, %665 : vector<8x128xf32>
    %667 = math.tanh %666 : vector<8x128xf32>
    %668 = arith.mulf %663, %667 : vector<8x128xf32>
    %c6_i32_256 = arith.constant 6 : i32
    %c8_i32_257 = arith.constant 8 : i32
    %669 = arith.muli %c6_i32_256, %c8_i32_257 : i32
    %670 = tpu.assume_multiple %669, 8 : i32
    %671 = arith.index_cast %670 : i32 to index
    %c0_258 = arith.constant 0 : index
    %672 = vector.load %arg13[%671, %c0_258] : memref<64x512xf32, #tpu.memory_space<vmem>>, vector<8x512xf32>
    %cst_259 = arith.constant dense<0.000000e+00> : vector<8x512xf32>
    %673 = tpu.matmul %668, %446, %cst_259 {dimension_numbers = #tpu.dot_dimension_numbers<[1], [0], [0], [1], [0, 0, 1, 1], [], []>} : vector<8x128xf32>, vector<128x512xf32>, vector<8x512xf32> -> vector<8x512xf32>
    %674 = arith.addf %672, %673 : vector<8x512xf32>
    %675 = vector.extract_strided_slice %674 {offsets = [0, 0], sizes = [8, 128], strides = [1, 1]} : vector<8x512xf32> to vector<8x128xf32>
    %cst_260 = arith.constant 5.000000e-01 : f32
    %676 = vector.broadcast %cst_260 : f32 to vector<8x128xf32>
    %677 = arith.mulf %676, %675 : vector<8x128xf32>
    %678 = math.tanh %677 : vector<8x128xf32>
    %cst_261 = arith.constant 5.000000e-01 : f32
    %679 = vector.broadcast %cst_261 : f32 to vector<8x128xf32>
    %680 = arith.mulf %679, %678 : vector<8x128xf32>
    %cst_262 = arith.constant 5.000000e-01 : f32
    %681 = vector.broadcast %cst_262 : f32 to vector<8x128xf32>
    %682 = arith.addf %680, %681 : vector<8x128xf32>
    %683 = vector.extract_strided_slice %674 {offsets = [0, 128], sizes = [8, 128], strides = [1, 1]} : vector<8x512xf32> to vector<8x128xf32>
    %cst_263 = arith.constant 5.000000e-01 : f32
    %684 = vector.broadcast %cst_263 : f32 to vector<8x128xf32>
    %685 = arith.mulf %684, %683 : vector<8x128xf32>
    %686 = math.tanh %685 : vector<8x128xf32>
    %cst_264 = arith.constant 5.000000e-01 : f32
    %687 = vector.broadcast %cst_264 : f32 to vector<8x128xf32>
    %688 = arith.mulf %687, %686 : vector<8x128xf32>
    %cst_265 = arith.constant 5.000000e-01 : f32
    %689 = vector.broadcast %cst_265 : f32 to vector<8x128xf32>
    %690 = arith.addf %688, %689 : vector<8x128xf32>
    %691 = vector.extract_strided_slice %674 {offsets = [0, 256], sizes = [8, 128], strides = [1, 1]} : vector<8x512xf32> to vector<8x128xf32>
    %692 = math.tanh %691 : vector<8x128xf32>
    %693 = vector.extract_strided_slice %674 {offsets = [0, 384], sizes = [8, 128], strides = [1, 1]} : vector<8x512xf32> to vector<8x128xf32>
    %cst_266 = arith.constant 5.000000e-01 : f32
    %694 = vector.broadcast %cst_266 : f32 to vector<8x128xf32>
    %695 = arith.mulf %694, %693 : vector<8x128xf32>
    %696 = math.tanh %695 : vector<8x128xf32>
    %cst_267 = arith.constant 5.000000e-01 : f32
    %697 = vector.broadcast %cst_267 : f32 to vector<8x128xf32>
    %698 = arith.mulf %697, %696 : vector<8x128xf32>
    %cst_268 = arith.constant 5.000000e-01 : f32
    %699 = vector.broadcast %cst_268 : f32 to vector<8x128xf32>
    %700 = arith.addf %698, %699 : vector<8x128xf32>
    %701 = arith.mulf %690, %666 : vector<8x128xf32>
    %702 = arith.mulf %682, %692 : vector<8x128xf32>
    %703 = arith.addf %701, %702 : vector<8x128xf32>
    %704 = math.tanh %703 : vector<8x128xf32>
    %705 = arith.mulf %700, %704 : vector<8x128xf32>
    %c7_i32_269 = arith.constant 7 : i32
    %c8_i32_270 = arith.constant 8 : i32
    %706 = arith.muli %c7_i32_269, %c8_i32_270 : i32
    %707 = tpu.assume_multiple %706, 8 : i32
    %708 = arith.index_cast %707 : i32 to index
    %c0_271 = arith.constant 0 : index
    %709 = vector.load %arg13[%708, %c0_271] : memref<64x512xf32, #tpu.memory_space<vmem>>, vector<8x512xf32>
    %cst_272 = arith.constant dense<0.000000e+00> : vector<8x512xf32>
    %710 = tpu.matmul %705, %446, %cst_272 {dimension_numbers = #tpu.dot_dimension_numbers<[1], [0], [0], [1], [0, 0, 1, 1], [], []>} : vector<8x128xf32>, vector<128x512xf32>, vector<8x512xf32> -> vector<8x512xf32>
    %711 = arith.addf %709, %710 : vector<8x512xf32>
    %712 = vector.extract_strided_slice %711 {offsets = [0, 0], sizes = [8, 128], strides = [1, 1]} : vector<8x512xf32> to vector<8x128xf32>
    %cst_273 = arith.constant 5.000000e-01 : f32
    %713 = vector.broadcast %cst_273 : f32 to vector<8x128xf32>
    %714 = arith.mulf %713, %712 : vector<8x128xf32>
    %715 = math.tanh %714 : vector<8x128xf32>
    %cst_274 = arith.constant 5.000000e-01 : f32
    %716 = vector.broadcast %cst_274 : f32 to vector<8x128xf32>
    %717 = arith.mulf %716, %715 : vector<8x128xf32>
    %cst_275 = arith.constant 5.000000e-01 : f32
    %718 = vector.broadcast %cst_275 : f32 to vector<8x128xf32>
    %719 = arith.addf %717, %718 : vector<8x128xf32>
    %720 = vector.extract_strided_slice %711 {offsets = [0, 128], sizes = [8, 128], strides = [1, 1]} : vector<8x512xf32> to vector<8x128xf32>
    %cst_276 = arith.constant 5.000000e-01 : f32
    %721 = vector.broadcast %cst_276 : f32 to vector<8x128xf32>
    %722 = arith.mulf %721, %720 : vector<8x128xf32>
    %723 = math.tanh %722 : vector<8x128xf32>
    %cst_277 = arith.constant 5.000000e-01 : f32
    %724 = vector.broadcast %cst_277 : f32 to vector<8x128xf32>
    %725 = arith.mulf %724, %723 : vector<8x128xf32>
    %cst_278 = arith.constant 5.000000e-01 : f32
    %726 = vector.broadcast %cst_278 : f32 to vector<8x128xf32>
    %727 = arith.addf %725, %726 : vector<8x128xf32>
    %728 = vector.extract_strided_slice %711 {offsets = [0, 256], sizes = [8, 128], strides = [1, 1]} : vector<8x512xf32> to vector<8x128xf32>
    %729 = math.tanh %728 : vector<8x128xf32>
    %730 = vector.extract_strided_slice %711 {offsets = [0, 384], sizes = [8, 128], strides = [1, 1]} : vector<8x512xf32> to vector<8x128xf32>
    %cst_279 = arith.constant 5.000000e-01 : f32
    %731 = vector.broadcast %cst_279 : f32 to vector<8x128xf32>
    %732 = arith.mulf %731, %730 : vector<8x128xf32>
    %733 = math.tanh %732 : vector<8x128xf32>
    %cst_280 = arith.constant 5.000000e-01 : f32
    %734 = vector.broadcast %cst_280 : f32 to vector<8x128xf32>
    %735 = arith.mulf %734, %733 : vector<8x128xf32>
    %cst_281 = arith.constant 5.000000e-01 : f32
    %736 = vector.broadcast %cst_281 : f32 to vector<8x128xf32>
    %737 = arith.addf %735, %736 : vector<8x128xf32>
    %738 = arith.mulf %727, %703 : vector<8x128xf32>
    %739 = arith.mulf %719, %729 : vector<8x128xf32>
    %740 = arith.addf %738, %739 : vector<8x128xf32>
    %741 = math.tanh %740 : vector<8x128xf32>
    %742 = arith.mulf %737, %741 : vector<8x128xf32>
    %c8_i32_282 = arith.constant 8 : i32
    %c56 = arith.constant 56 : index
    %c0_283 = arith.constant 0 : index
    %743 = vector.load %arg15[%c56, %c0_283] : memref<64x128xf32, #tpu.memory_space<vmem>>, vector<8x128xf32>
    %c0_284 = arith.constant 0 : index
    %c0_285 = arith.constant 0 : index
    %744 = vector.load %arg8[%c0_284, %c0_285] : memref<128x512xf32, #tpu.memory_space<vmem>>, vector<128x512xf32>
    %cst_286 = arith.constant dense<0.000000e+00> : vector<8x512xf32>
    %745 = tpu.matmul %743, %744, %cst_286 {dimension_numbers = #tpu.dot_dimension_numbers<[1], [0], [0], [1], [0, 0, 1, 1], [], []>} : vector<8x128xf32>, vector<128x512xf32>, vector<8x512xf32> -> vector<8x512xf32>
    %c0_287 = arith.constant 0 : index
    %c0_288 = arith.constant 0 : index
    %746 = vector.load %arg9[%c0_287, %c0_288] : memref<1x512xf32, #tpu.memory_space<vmem>>, vector<1x512xf32>
    %747 = vector.broadcast %746 : vector<1x512xf32> to vector<8x512xf32>
    %748 = arith.addf %745, %747 : vector<8x512xf32>
    %749 = vector.extract_strided_slice %748 {offsets = [0, 0], sizes = [8, 128], strides = [1, 1]} : vector<8x512xf32> to vector<8x128xf32>
    %cst_289 = arith.constant 5.000000e-01 : f32
    %750 = vector.broadcast %cst_289 : f32 to vector<8x128xf32>
    %751 = arith.mulf %750, %749 : vector<8x128xf32>
    %752 = math.tanh %751 : vector<8x128xf32>
    %cst_290 = arith.constant 5.000000e-01 : f32
    %753 = vector.broadcast %cst_290 : f32 to vector<8x128xf32>
    %754 = arith.mulf %753, %752 : vector<8x128xf32>
    %cst_291 = arith.constant 5.000000e-01 : f32
    %755 = vector.broadcast %cst_291 : f32 to vector<8x128xf32>
    %756 = arith.addf %754, %755 : vector<8x128xf32>
    %757 = vector.extract_strided_slice %748 {offsets = [0, 128], sizes = [8, 128], strides = [1, 1]} : vector<8x512xf32> to vector<8x128xf32>
    %cst_292 = arith.constant 5.000000e-01 : f32
    %758 = vector.broadcast %cst_292 : f32 to vector<8x128xf32>
    %759 = arith.mulf %758, %757 : vector<8x128xf32>
    %760 = math.tanh %759 : vector<8x128xf32>
    %cst_293 = arith.constant 5.000000e-01 : f32
    %761 = vector.broadcast %cst_293 : f32 to vector<8x128xf32>
    %762 = arith.mulf %761, %760 : vector<8x128xf32>
    %cst_294 = arith.constant 5.000000e-01 : f32
    %763 = vector.broadcast %cst_294 : f32 to vector<8x128xf32>
    %764 = arith.addf %762, %763 : vector<8x128xf32>
    %765 = vector.extract_strided_slice %748 {offsets = [0, 256], sizes = [8, 128], strides = [1, 1]} : vector<8x512xf32> to vector<8x128xf32>
    %766 = math.tanh %765 : vector<8x128xf32>
    %767 = vector.extract_strided_slice %748 {offsets = [0, 384], sizes = [8, 128], strides = [1, 1]} : vector<8x512xf32> to vector<8x128xf32>
    %cst_295 = arith.constant 5.000000e-01 : f32
    %768 = vector.broadcast %cst_295 : f32 to vector<8x128xf32>
    %769 = arith.mulf %768, %767 : vector<8x128xf32>
    %770 = math.tanh %769 : vector<8x128xf32>
    %cst_296 = arith.constant 5.000000e-01 : f32
    %771 = vector.broadcast %cst_296 : f32 to vector<8x128xf32>
    %772 = arith.mulf %771, %770 : vector<8x128xf32>
    %cst_297 = arith.constant 5.000000e-01 : f32
    %773 = vector.broadcast %cst_297 : f32 to vector<8x128xf32>
    %774 = arith.addf %772, %773 : vector<8x128xf32>
    %775 = arith.mulf %764, %0 : vector<8x128xf32>
    %776 = arith.mulf %756, %766 : vector<8x128xf32>
    %777 = arith.addf %775, %776 : vector<8x128xf32>
    %778 = math.tanh %777 : vector<8x128xf32>
    %779 = arith.mulf %774, %778 : vector<8x128xf32>
    %780 = arith.addf %742, %779 : vector<8x128xf32>
    %c0_298 = arith.constant 0 : index
    %c0_299 = arith.constant 0 : index
    %781 = vector.load %arg10[%c0_298, %c0_299] : memref<128x128xf32, #tpu.memory_space<vmem>>, vector<128x128xf32>
    %cst_300 = arith.constant dense<0.000000e+00> : vector<8x128xf32>
    %782 = tpu.matmul %780, %781, %cst_300 {dimension_numbers = #tpu.dot_dimension_numbers<[1], [0], [0], [1], [0, 0, 1, 1], [], []>} : vector<8x128xf32>, vector<128x128xf32>, vector<8x128xf32> -> vector<8x128xf32>
    %783 = vector.extract_strided_slice %782 {offsets = [0, 0], sizes = [2, 1], strides = [1, 1]} : vector<8x128xf32> to vector<2x1xf32>
    %c0_301 = arith.constant 0 : index
    %c0_302 = arith.constant 0 : index
    %784 = vector.load %arg11[%c0_301, %c0_302] : memref<1x1xf32, #tpu.memory_space<vmem>>, vector<1x1xf32>
    %785 = vector.broadcast %784 : vector<1x1xf32> to vector<2x1xf32>
    %786 = arith.addf %783, %785 : vector<2x1xf32>
    %c0_303 = arith.constant 0 : index
    %c0_304 = arith.constant 0 : index
    %787 = vector.load %arg12[%c0_303, %c0_304] : memref<2x1xf32, #tpu.memory_space<vmem>>, vector<2x1xf32>
    tpu.vector_store %arg12[%c0_303, %c0_304], %786 {strides = array<i32>} : memref<2x1xf32, #tpu.memory_space<vmem>>, vector<2x1xf32>,
    return
  }
}

</mosaic_0001>

<bundles_post_ra>
// kernel: bilstm_net.1
= control target key start
LH: loop header
LB: loop body
LE: loop exit
PB: predicated region body
PF: predicated region fallthrough
CT: control target
= control target key end

     0   :  { %s7473_s0 = inlined_call_operand.vmem [shape: f32[64,2], index: 0, kind: input, shape index: {}]   ;;  %s7474_s1 = inlined_call_operand.vmem [shape: f32[2,512], index: 1, kind: input, shape index: {}]   ;;  %s7475_s2 = inlined_call_operand.vmem [shape: f32[2,512], index: 2, kind: input, shape index: {}]   ;;  %s7476_s3 = inlined_call_operand.vmem [shape: f32[1,512], index: 3, kind: input, shape index: {}]   ;;  %s7477_s4 = inlined_call_operand.hbm [shape: f32[128,512], index: 4, kind: input, shape index: {}]   ;;  %s7478_s5 = inlined_call_operand.hbm [shape: f32[128,512], index: 5, kind: input, shape index: {}]   ;;  %s7479_s6 = inlined_call_operand.vmem [shape: f32[1,512], index: 6, kind: input, shape index: {}]   ;;  %s7480_s7 = inlined_call_operand.hbm [shape: f32[128,512], index: 7, kind: input, shape index: {}]   ;;  %s7481_s8 = inlined_call_operand.hbm [shape: f32[128,512], index: 8, kind: input, shape index: {}]   ;;  %s7482_s9 = inlined_call_operand.vmem [shape: f32[1,512], index: 9, kind: input, shape index: {}]   ;;  %s7483_s10 = inlined_call_operand.hbm [shape: f32[128,128], index: 10, kind: input, shape index: {}]   ;;  %s7484_s11 = inlined_call_operand.<no memory space> [shape: f32[1,1], index: 11, kind: input, shape index: {}]   ;;  %s7485_s12 = inlined_call_operand.vmem [shape: f32[2,1], index: 12, kind: output, shape index: {}]  }
   0x1   :  { %v17_v0 = vstv %s7484_s11 }
   0x2   :  { %18 = vst [vmem:[#allocation5] sm:$0x1] %v17_v0 }
   0x3   :  { %19 = vsyncpa [#allocation7], 0 }
   0x4   :  { %20 = vsyncpa [#allocation9], 0 }
   0x5   :  { %21 = vsyncpa [#allocation12], 0  ;;  %s6164_s23 = smov [#allocation8]   ;;  %s6165_s25 = smov [#allocation11]  }
   0x6   :  { %s47_s24 = sshll.u32 %s6164_s23, 4  ;;  %s73_s26 = sshll.u32 %s6165_s25, 4  ;;  %s48_s24 = int_to_ptr.vmem [resolvable:$true] %s47_s24  ;;  %s6245_s26 = int_to_ptr.vmem [resolvable:$true] %s73_s26 }
   0x7   :  { %s6048_s29 = scalar_lea.hbm %s7478_s5, 8192 }
   0x8   :  { %p6049_p0 = scmp.ne.s32.totalorder %s7478_s5, %s6048_s29  ;;  %p6052_p1 = scmp.lt.u32.totalorder %s6048_s29, %s7478_s5 }
   0xa   :  { %p6054_p2 = pnand %p6052_p1, %p6049_p0 }
   0xc   :  { %6057 = shalt.err (!%p6054_p2)
}
   0xd   :  { %s6058_s15 = scalar_lea.vmem %s48_s24, 8192  ;;  %p6063_p4 = scmp.lt.s32.totalorder %s48_s24, %s48_s24 }
   0xe   :  { %p6059_p3 = scmp.ne.s32.totalorder %s48_s24, %s6058_s15  ;;  %p6064_p5 = scmp.lt.s32.totalorder %s6058_s15, %s6058_s15 }
  0x10   :  { %p6065_p6 = por %p6064_p5, %p6063_p4 }
  0x12   :  { %p6066_p7 = pnand %p6065_p6, %p6059_p3 }
  0x14   :  { %6069 = shalt.err (!%p6066_p7)
}
  0x15   :  { %s6166_s16 = smov 512   ;;  %s6167_s17 = smov 32  }
  0x16   :  { %53 = dma.hbm_to_vmem [thread:$0]  %s7478_s5, 8192, %s48_s24, [#allocation9], %s6166_s16, %s6166_s16, %s6167_s17  }
  0x17   :  { %s6070_s22 = scalar_lea.hbm %s7481_s8, 8192 }
  0x18   :  { %p6071_p8 = scmp.ne.s32.totalorder %s7481_s8, %s6070_s22  ;;  %p6074_p9 = scmp.lt.u32.totalorder %s6070_s22, %s7481_s8 }
  0x1a   :  { %p6076_p10 = pnand %p6074_p9, %p6071_p8 }
  0x1c   :  { %6079 = shalt.err (!%p6076_p10)
}
  0x1d   :  { %s6080_s29 = scalar_lea.vmem %s6245_s26, 8192  ;;  %p6085_p12 = scmp.lt.s32.totalorder %s6245_s26, %s6245_s26 }
  0x1e   :  { %p6081_p11 = scmp.ne.s32.totalorder %s6245_s26, %s6080_s29  ;;  %p6086_p13 = scmp.lt.s32.totalorder %s6080_s29, %s6080_s29 }
  0x20   :  { %p6087_p0 = por %p6086_p13, %p6085_p12 }
  0x22   :  { %p6088_p1 = pnand %p6087_p0, %p6081_p11 }
  0x24   :  { %6091 = shalt.err (!%p6088_p1)
}
  0x25   :  { %79 = dma.hbm_to_vmem [thread:$0]  %s7481_s8, 8192, %s6245_s26, [#allocation12], %s6166_s16, %s6166_s16, %s6167_s17  }
  0x26   :  { %s6168_s30 = smov [#allocation6]   ;;  %s6169_s11 = smov [#allocation10]  }
  0x27   :  { %s35_s13 = sshll.u32 %s6168_s30, 4  ;;  %s61_s14 = sshll.u32 %s6169_s11, 4  ;;  %s36_s13 = int_to_ptr.vmem [resolvable:$true] %s35_s13  ;;  %s6282_s14 = int_to_ptr.vmem [resolvable:$true] %s61_s14 }
  0x28   :  { %s6092_s19 = scalar_lea.hbm %s7477_s4, 8192 }
  0x29   :  { %p6093_p2 = scmp.ne.s32.totalorder %s7477_s4, %s6092_s19  ;;  %p6096_p3 = scmp.lt.u32.totalorder %s6092_s19, %s7477_s4 }
  0x2b   :  { %p6098_p4 = pnand %p6096_p3, %p6093_p2 }
  0x2d   :  { %6101 = shalt.err (!%p6098_p4)
}
  0x2e   :  { %s6102_s8 = scalar_lea.vmem %s36_s13, 8192  ;;  %p6107_p6 = scmp.lt.s32.totalorder %s36_s13, %s36_s13 }
  0x2f   :  { %p6103_p5 = scmp.ne.s32.totalorder %s36_s13, %s6102_s8  ;;  %p6108_p7 = scmp.lt.s32.totalorder %s6102_s8, %s6102_s8 }
  0x31   :  { %p6109_p8 = por %p6108_p7, %p6107_p6 }
  0x33   :  { %p6110_p9 = pnand %p6109_p8, %p6103_p5 }
  0x35   :  { %6113 = shalt.err (!%p6110_p9)
}
  0x36   :  { %41 = dma.hbm_to_vmem [thread:$0]  %s7477_s4, 8192, %s36_s13, [#allocation7], %s6166_s16, %s6166_s16, %s6167_s17  }
  0x37   :  { %s6114_s29 = scalar_lea.hbm %s7480_s7, 8192 }
  0x38   :  { %p6115_p10 = scmp.ne.s32.totalorder %s7480_s7, %s6114_s29  ;;  %p6118_p11 = scmp.lt.u32.totalorder %s6114_s29, %s7480_s7 }
  0x3a   :  { %p6120_p12 = pnand %p6118_p11, %p6115_p10 }
  0x3c   :  { %6123 = shalt.err (!%p6120_p12)
}
  0x3d   :  { %s6124_s15 = scalar_lea.vmem %s6282_s14, 8192  ;;  %p6129_p0 = scmp.lt.s32.totalorder %s6282_s14, %s6282_s14 }
  0x3e   :  { %p6125_p13 = scmp.ne.s32.totalorder %s6282_s14, %s6124_s15  ;;  %p6130_p1 = scmp.lt.s32.totalorder %s6124_s15, %s6124_s15 }
  0x40   :  { %p6131_p2 = por %p6130_p1, %p6129_p0 }
  0x42   :  { %p6132_p3 = pnand %p6131_p2, %p6125_p13 }
  0x44   :  { %6135 = shalt.err (!%p6132_p3)
}
  0x45   :  { %67 = dma.hbm_to_vmem [thread:$0]  %s7480_s7, 8192, %s6282_s14, [#allocation9], %s6166_s16, %s6166_s16, %s6167_s17  }
  0x46   :  { %s6170_s18 = smov [#allocation13]   ;;  %s6136_s22 = scalar_lea.hbm %s7483_s10, 2048 }
  0x47   :  { %s87_s19 = sshll.u32 %s6170_s18, 4  ;;  %p6137_p4 = scmp.ne.s32.totalorder %s7483_s10, %s6136_s22  ;;  %s88_s19 = int_to_ptr.vmem [resolvable:$true] %s87_s19 }
  0x48   :  { %p6140_p5 = scmp.lt.u32.totalorder %s6136_s22, %s7483_s10 }
  0x4a   :  { %p6142_p6 = pnand %p6140_p5, %p6137_p4 }
  0x4c   :  { %6145 = shalt.err (!%p6142_p6)
}
  0x4d   :  { %s6146_s27 = scalar_lea.vmem %s88_s19, 2048  ;;  %p6151_p8 = scmp.lt.s32.totalorder %s88_s19, %s88_s19 }
  0x4e   :  { %p6147_p7 = scmp.ne.s32.totalorder %s88_s19, %s6146_s27  ;;  %p6152_p9 = scmp.lt.s32.totalorder %s6146_s27, %s6146_s27 }
  0x50   :  { %p6153_p10 = por %p6152_p9, %p6151_p8 }
  0x52   :  { %p6154_p11 = pnand %p6153_p10, %p6147_p7 }
  0x54   :  { %6157 = shalt.err (!%p6154_p11)
}
  0x55   :  { %s6171_s7 = smov 128   ;;  %s6172_s16 = smov 8  }
  0x56   :  { %93 = dma.hbm_to_vmem [thread:$0]  %s7483_s10, 2048, %s88_s19, [#allocation12], %s6171_s7, %s6171_s7, %s6172_s16  }
  0x57   :  { %6158 = dma.done.wait [#allocation7], 8192  }
  0x58   :  { %6159 = vsyncadd [#allocation7], 4294959104 }
  0x59   :  { %6160 = dma.done.wait [#allocation9], 16384  }
  0x5a   :  { %6161 = vsyncadd [#allocation9], 4294950912 }
  0x5b   :  { %6162 = dma.done.wait [#allocation12], 10240  }
  0x5c   :  { %6163 = vsyncadd [#allocation12], 4294957056  ;;  %v7486_v1 = vlaneseq  ;;  %v6173_v2 = vmov 1983009808   ;;  %v7487_v4 = vmov 0.0   ;;  %v122_v8 = vld [vmem:[%s7474_s1] sm:$0xff] }
  0x5d   :  { %v148_v3 = vunpack.c.l.s4 %v6173_v2  ;;  %261 = vmatprep.mubr.f32.mxu0 %v7487_v4  ;;  %285 = vmatprep.mubr.f32.mxu1 %v7487_v4  ;;  %v146_v9 = vcombine.high %v122_v8, %v122_v8  ;;  %vm188_vm0 = vcmask 1041408   ;;  %v455_v13 = vld [vmem:[%s7475_s2] sm:$0xff]  ;;  %vm163_vm1 = vcmask 15360   ;;  %v741_v21 = vld [vmem:[#allocation6 + $0x8] sm:$0xff]  ;;  %v6406_v29 = vld [vmem:[%s7473_s0 + $0x18] sm:$0xff] }
  0x5e   :  { %v6334_v5 = vshrl.u32 %v7486_v1, 7  ;;  %v6346_v14 = vld [vmem:[%s7473_s0] sm:$0xff]  ;;  %v457_v17 = vcombine.high %v455_v13, %v455_v13  ;;  %v745_v22 = vld [vmem:[#allocation6 + $0x28] sm:$0xff]  ;;  %v6411_v30 = vld [vmem:[%s7473_s0 + $0x38] sm:$0xff]  ;;  %vm6176_vm3 = vmmov 0   ;;  %vm4409_vm4 = vcmask 1024  }
  0x5f   :  { %v149_v6 = vunpack.c.0.s8 %v148_v3  ;;  %v6351_v15 = vld [vmem:[%s7473_s0 + $0x20] sm:$0xff]  ;;  %v6366_v23 = vld [vmem:[%s7473_s0 + $0x8] sm:$0xff]  ;;  %v6377_v26 = vpack.c.bf16 %v745_v22, %v741_v21  ;;  %v6388_v27 = vld [vmem:[%s7473_s0 + $0x10] sm:$0xff] }
  0x60   :  { %v6371_v24 = vld [vmem:[%s7473_s0 + $0x28] sm:$0xff]  ;;  %v6393_v28 = vld [vmem:[%s7473_s0 + $0x30] sm:$0xff]  ;;  %v743_v35 = vld [vmem:[#allocation6 + $0x18] sm:$0xff] }
  0x61   :  { %v152_v7 = vsub.s32 %v149_v6, %v6334_v5  ;;  %v740_v31 = vld [vmem:[#allocation6] sm:$0xff]  ;;  %v749_v33 = vld [vmem:[#allocation6 + $0x48] sm:$0xff]  ;;  %v747_v36 = vld [vmem:[#allocation6 + $0x38] sm:$0xff] }
  0x62   :  { %v744_v32 = vld [vmem:[#allocation6 + $0x20] sm:$0xff]  ;;  %v753_v34 = vld [vmem:[#allocation6 + $0x68] sm:$0xff]  ;;  %v6423_v41 = vpack.c.bf16 %v747_v36, %v743_v35  ;;  %v746_v21 = vld [vmem:[#allocation6 + $0x30] sm:$0xff] }
  0x63   :  { %v153_v10 = vrot.slane %v122_v8, %v152_v7  ;;  %v160_v12 = vrot.slane %v146_v9, %v152_v7  ;;  %v464_v16 = vrot.slane %v455_v13, %v152_v7  ;;  %v471_v20 = vrot.slane %v457_v17, %v152_v7  ;;  %v748_v39 = vld [vmem:[#allocation6 + $0x40] sm:$0xff]  ;;  %v757_v42 = vld [vmem:[#allocation6 + $0x88] sm:$0xff]  ;;  %v751_v22 = vld [vmem:[#allocation6 + $0x58] sm:$0xff] }
  0x64   :  { %v6419_v37 = vpack.c.bf16 %v744_v32, %v740_v31  ;;  %v6421_v38 = vpack.c.bf16 %v753_v34, %v749_v33  ;;  %v752_v40 = vld [vmem:[#allocation6 + $0x60] sm:$0xff]  ;;  %v761_v43 = vld [vmem:[#allocation6 + $0xa8] sm:$0xff]  ;;  %v750_v33 = vld [vmem:[#allocation6 + $0x50] sm:$0xff] }
  0x65   :  { %v161_v11 = vcombine.high %v153_v10, %v153_v10  ;;  %v162_v18 = vcombine.high %v160_v12, %v160_v12  ;;  %v472_v19 = vcombine.high %v464_v16, %v464_v16  ;;  %v473_v25 = vcombine.high %v471_v20, %v471_v20  ;;  %v756_v46 = vld [vmem:[#allocation6 + $0x80] sm:$0xff]  ;;  %v765_v48 = vld [vmem:[#allocation6 + $0xc8] sm:$0xff]  ;;  %v754_v34 = vld [vmem:[#allocation6 + $0x70] sm:$0xff] }
  0x66   :  { %v6433_v44 = vpack.c.bf16 %v752_v40, %v748_v39  ;;  %v6436_v45 = vpack.c.bf16 %v761_v43, %v757_v42  ;;  %v760_v47 = vld [vmem:[#allocation6 + $0xa0] sm:$0xff]  ;;  %v769_v49 = vld [vmem:[#allocation6 + $0xe8] sm:$0xff]  ;;  %v759_v35 = vld [vmem:[#allocation6 + $0x98] sm:$0xff]  ;;  %v6526_v39 = vpack.c.bf16 %v754_v34, %v750_v33 }
  0x67   :  { %4432 = vmatprep.subr.msk.mxu0 %vm188_vm0, %v161_v11  ;;  %5701 = vmatprep.subr.msk.mxu1 %vm188_vm0, %v161_v11  ;;  %v6446_v50 = vpack.c.bf16 %v760_v47, %v756_v46  ;;  %v6449_v51 = vpack.c.bf16 %v769_v49, %v765_v48  ;;  %v764_v52 = vld [vmem:[#allocation6 + $0xc0] sm:$0xff]  ;;  %v773_v54 = vld [vmem:[#allocation6 + $0x108] sm:$0xff]  ;;  %v763_v36 = vld [vmem:[#allocation6 + $0xb8] sm:$0xff] }
  0x68   :  { %4433 = vmatpush1.msk.msra.mxu0 %vm188_vm0, %v153_v10  ;;  %5702 = vmatpush1.msk.msra.mxu1 %vm188_vm0, %v153_v10  ;;  %v768_v53 = vld [vmem:[#allocation6 + $0xe0] sm:$0xff]  ;;  %v777_v55 = vld [vmem:[#allocation6 + $0x128] sm:$0xff]  ;;  %v6529_v40 = vpack.c.bf16 %v763_v36, %v759_v35  ;;  %v758_v42 = vld [vmem:[#allocation6 + $0x90] sm:$0xff] }
  0x69   :  { %4434 = vmatmul.mubr.msk.f32.vlgmr.msra.gmra.mrb[0].mxu0 %vm163_vm1, %v6346_v14  ;;  %4438 = vmatmul.mubr.msk.f32.vlgmr.msra.gmra.mrb[0].mxu1 %vm163_vm1, %v6351_v15  ;;  %v6458_v56 = vpack.c.bf16 %v768_v53, %v764_v52  ;;  %v6461_v57 = vpack.c.bf16 %v777_v55, %v773_v54  ;;  %v772_v58 = vld [vmem:[#allocation6 + $0x100] sm:$0xff]  ;;  %v781_v60 = vld [vmem:[#allocation6 + $0x148] sm:$0xff]  ;;  %v762_v43 = vld [vmem:[#allocation6 + $0xb0] sm:$0xff] }
  0x6a   :  { %4442 = vmatprep.subr.msk.mxu1 %vm188_vm0, %v162_v18  ;;  %267 = vmatprep.mubr.f32.mxu0 %v7487_v4  ;;  %v776_v59 = vld [vmem:[#allocation6 + $0x120] sm:$0xff]  ;;  %v785_v61 = vld [vmem:[#allocation6 + $0x168] sm:$0xff]  ;;  %v767_v46 = vld [vmem:[#allocation6 + $0xd8] sm:$0xff] }
  0x6b   :  { %4443 = vmatpush1.msk.msra.mxu1 %vm188_vm0, %v160_v12  ;;  %291 = vmatprep.mubr.f32.mxu1 %v7487_v4  ;;  %v6470_v62 = vpack.c.bf16 %v776_v59, %v772_v58  ;;  %v6473_v63 = vpack.c.bf16 %v785_v61, %v781_v60  ;;  %v780_v0 = vld [vmem:[#allocation6 + $0x140] sm:$0xff]  ;;  %v789_v3 = vld [vmem:[#allocation6 + $0x188] sm:$0xff]  ;;  %v771_v47 = vld [vmem:[#allocation6 + $0xf8] sm:$0xff] }
  0x6c   :  { %4452 = vmatprep.subr.msk.mxu0 %vm188_vm0, %v472_v19  ;;  %4462 = vmatprep.subr.msk.mxu1 %vm188_vm0, %v473_v25  ;;  %v784_v2 = vld [vmem:[#allocation6 + $0x160] sm:$0xff]  ;;  %v793_v6 = vld [vmem:[#allocation6 + $0x1a8] sm:$0xff]  ;;  %v755_v25 = vld [vmem:[#allocation6 + $0x78] sm:$0xff]  ;;  %v6541_v48 = vpack.c.bf16 %v771_v47, %v767_v46  ;;  %v6640_v47 = vsub.s32 1, %v6334_v5 }
  0x6d   :  { %4435 = vmatmul.mubr.msk.f32.gmra.mrb[2].mxu0 %vm163_vm1, %v6366_v23  ;;  %4439 = vmatmul.mubr.msk.f32.gmra.mrb[2].mxu1 %vm163_vm1, %v6371_v24  ;;  %v6482_v7 = vpack.c.bf16 %v784_v2, %v780_v0  ;;  %v6485_v8 = vpack.c.bf16 %v793_v6, %v789_v3  ;;  %v788_v9 = vld [vmem:[#allocation6 + $0x180] sm:$0xff]  ;;  %v797_v11 = vld [vmem:[#allocation6 + $0x1c8] sm:$0xff]  ;;  %v6519_v32 = vpack.c.bf16 %v755_v25, %v751_v22  ;;  %v766_v49 = vld [vmem:[#allocation6 + $0xd0] sm:$0xff] }
  0x6e   :  { %273 = vmatprep.mubr.f32.mxu0 %v7487_v4  ;;  %297 = vmatprep.mubr.f32.mxu1 %v7487_v4  ;;  %v792_v10 = vld [vmem:[#allocation6 + $0x1a0] sm:$0xff]  ;;  %v801_v12 = vld [vmem:[#allocation6 + $0x1e8] sm:$0xff]  ;;  %v770_v52 = vld [vmem:[#allocation6 + $0xf0] sm:$0xff]  ;;  %7501 = vst [vmem:[#allocation19_spill] sm:$0xff] %v6640_v47 }
  0x6f   :  { %4453 = vmatpush1.msk.msra.mxu0 %vm188_vm0, %v464_v16  ;;  %v6494_v13 = vpack.c.bf16 %v792_v10, %v788_v9  ;;  %v6497_v16 = vpack.c.bf16 %v801_v12, %v797_v11  ;;  %v796_v17 = vld [vmem:[#allocation6 + $0x1c0] sm:$0xff]  ;;  %v775_v53 = vld [vmem:[#allocation6 + $0x118] sm:$0xff]  ;;  %v774_v58 = vld [vmem:[#allocation6 + $0x110] sm:$0xff] }
  0x70   :  { %4526 = vmatprep.subr.bf16.mxu0 %v6377_v26  ;;  %v800_v18 = vld [vmem:[#allocation6 + $0x1e0] sm:$0xff]  ;;  %v779_v54 = vld [vmem:[#allocation6 + $0x138] sm:$0xff]  ;;  %v778_v59 = vld [vmem:[#allocation6 + $0x130] sm:$0xff] }
  0x71   :  { %4436 = vmatmul.mubr.msk.f32.gmra.mrb[4].mxu0 %vm163_vm1, %v6388_v27  ;;  %4440 = vmatmul.mubr.msk.f32.gmra.mrb[4].mxu1 %vm163_vm1, %v6393_v28  ;;  %v6506_v19 = vpack.c.bf16 %v800_v18, %v796_v17  ;;  %v6552_v55 = vpack.c.bf16 %v779_v54, %v775_v53  ;;  %v783_v60 = vld [vmem:[#allocation6 + $0x158] sm:$0xff]  ;;  %v782_v2 = vld [vmem:[#allocation6 + $0x150] sm:$0xff] }
  0x72   :  { %279 = vmatprep.mubr.f32.mxu0 %v7487_v4  ;;  %303 = vmatprep.mubr.f32.mxu1 %v7487_v4  ;;  %v787_v61 = vld [vmem:[#allocation6 + $0x178] sm:$0xff]  ;;  %v786_v3 = vld [vmem:[#allocation6 + $0x170] sm:$0xff] }
  0x73   :  { %v6563_v0 = vpack.c.bf16 %v787_v61, %v783_v60  ;;  %v791_v6 = vld [vmem:[#allocation6 + $0x198] sm:$0xff]  ;;  %v790_v11 = vld [vmem:[#allocation6 + $0x190] sm:$0xff] }
  0x74   :  { %v795_v9 = vld [vmem:[#allocation6 + $0x1b8] sm:$0xff]  ;;  %v794_v12 = vld [vmem:[#allocation6 + $0x1b0] sm:$0xff] }
  0x75   :  { %4437 = vmatmul.mubr.msk.f32.gmra.mrb[6].mxu0 %vm163_vm1, %v6406_v29  ;;  %4441 = vmatmul.mubr.msk.f32.gmra.mrb[6].mxu1 %vm163_vm1, %v6411_v30  ;;  %v6574_v10 = vpack.c.bf16 %v795_v9, %v791_v6  ;;  %v799_v17 = vld [vmem:[#allocation6 + $0x1d8] sm:$0xff]  ;;  %v802_v22 = vld [vmem:[#allocation6 + $0x1f0] sm:$0xff] }
  0x76   :  { %374 = vmatprep.mubr.f32.mxu1 %v7487_v4  ;;  %546 = vmatprep.mubr.f32.mxu0 %v7487_v4  ;;  %v803_v18 = vld [vmem:[#allocation6 + $0x1f8] sm:$0xff] }
  0x79   :  { %4444 = vmatmul.mubr.msk.f32.vlgmr.msra.gmra.mrb[8].mxu1 %vm163_vm1, %v6346_v14  ;;  %4454 = vmatmul.mubr.msk.f32.vlgmr.msra.gmra.mrb[8].mxu0 %vm163_vm1, %v6346_v14 }
  0x7a   :  { %4463 = vmatpush1.msk.msra.mxu1 %vm188_vm0, %v471_v20  ;;  %380 = vmatprep.mubr.f32.mxu1 %v7487_v4  ;;  %v742_v20 = vld [vmem:[#allocation6 + $0x10] sm:$0xff] }
  0x7b   :  { %552 = vmatprep.mubr.f32.mxu0 %v7487_v4  ;;  %4528 = vmatpush1.bf16.msra.mxu0 %v6419_v37  ;;  %v6517_v31 = vpack.c.bf16 %v746_v21, %v742_v20  ;;  %v6585_v20 = vpack.c.bf16 %v803_v18, %v799_v17  ;;  %v798_v21 = vld [vmem:[#allocation6 + $0x1d0] sm:$0xff] }
  0x7c   :  { %4530 = vmatprep.subr.bf16.mxu0 %v6421_v38  ;;  %4558 = vmatprep.subr.bf16.mxu1 %v6423_v41 }
  0x7d   :  { %4445 = vmatmul.mubr.msk.f32.gmra.mrb[10].mxu1 %vm163_vm1, %v6366_v23  ;;  %4455 = vmatmul.mubr.msk.f32.gmra.mrb[10].mxu0 %vm163_vm1, %v6366_v23 }
  0x7e   :  { %386 = vmatprep.mubr.f32.mxu1 %v7487_v4  ;;  %558 = vmatprep.mubr.f32.mxu0 %v7487_v4 }
  0x7f   :  { %4532 = vmatpush1.bf16.msra.mxu0 %v6433_v44 }
  0x80   :  { %4534 = vmatprep.subr.bf16.mxu0 %v6436_v45 }
  0x81   :  { %4446 = vmatmul.mubr.msk.f32.gmra.mrb[12].mxu1 %vm163_vm1, %v6388_v27  ;;  %4456 = vmatmul.mubr.msk.f32.gmra.mrb[12].mxu0 %vm163_vm1, %v6388_v27 }
  0x82   :  { %392 = vmatprep.mubr.f32.mxu1 %v7487_v4  ;;  %564 = vmatprep.mubr.f32.mxu0 %v7487_v4 }
  0x83   :  { %4536 = vmatpush1.bf16.msra.mxu0 %v6446_v50 }
  0x84   :  { %4538 = vmatprep.subr.bf16.mxu0 %v6449_v51 }
  0x85   :  { %4447 = vmatmul.mubr.msk.f32.gmra.mrb[14].mxu1 %vm163_vm1, %v6406_v29  ;;  %4457 = vmatmul.mubr.msk.f32.gmra.mrb[14].mxu0 %vm163_vm1, %v6406_v29 }
  0x86   :  { %398 = vmatprep.mubr.f32.mxu1 %v7487_v4  ;;  %570 = vmatprep.mubr.f32.mxu0 %v7487_v4 }
  0x87   :  { %4540 = vmatpush1.bf16.msra.mxu0 %v6458_v56 }
  0x88   :  { %4542 = vmatprep.subr.bf16.mxu0 %v6461_v57 }
  0x89   :  { %4448 = vmatmul.mubr.msk.f32.gmra.mrb[16].mxu1 %vm163_vm1, %v6351_v15  ;;  %4458 = vmatmul.mubr.msk.f32.gmra.mrb[6].mxu0 %vm163_vm1, %v6351_v15 }
  0x8a   :  { %404 = vmatprep.mubr.f32.mxu1 %v7487_v4  ;;  %576 = vmatprep.mubr.f32.mxu0 %v7487_v4 }
  0x8b   :  { %4544 = vmatpush1.bf16.msra.mxu0 %v6470_v62 }
  0x8c   :  { %4546 = vmatprep.subr.bf16.mxu0 %v6473_v63 }
  0x8d   :  { %4449 = vmatmul.mubr.msk.f32.gmra.mrb[18].mxu1 %vm163_vm1, %v6371_v24  ;;  %4459 = vmatmul.mubr.msk.f32.gmra.mrb[4].mxu0 %vm163_vm1, %v6371_v24 }
  0x8e   :  { %410 = vmatprep.mubr.f32.mxu1 %v7487_v4  ;;  %582 = vmatprep.mubr.f32.mxu0 %v7487_v4 }
  0x8f   :  { %4548 = vmatpush1.bf16.msra.mxu0 %v6482_v7 }
  0x90   :  { %4550 = vmatprep.subr.bf16.mxu0 %v6485_v8 }
  0x91   :  { %4450 = vmatmul.mubr.msk.f32.gmra.mrb[20].mxu1 %vm163_vm1, %v6393_v28  ;;  %4460 = vmatmul.mubr.msk.f32.gmra.mrb[2].mxu0 %vm163_vm1, %v6393_v28 }
  0x92   :  { %416 = vmatprep.mubr.f32.mxu1 %v7487_v4  ;;  %588 = vmatprep.mubr.f32.mxu0 %v7487_v4 }
  0x93   :  { %4552 = vmatpush1.bf16.msra.mxu0 %v6494_v13 }
  0x94   :  { %4554 = vmatprep.subr.bf16.mxu0 %v6497_v16 }
  0x95   :  { %4451 = vmatmul.mubr.msk.f32.gmra.mrb[22].mxu1 %vm163_vm1, %v6411_v30  ;;  %4461 = vmatmul.mubr.msk.f32.gmra.mrb[0].mxu0 %vm163_vm1, %v6411_v30 }
  0x96   :  { %659 = vmatprep.mubr.f32.mxu1 %v7487_v4  ;;  %886 = vmatprep.mubr.f32.mxu0 %v7487_v4 }
  0x97   :  { %4556 = vmatpush1.bf16.msra.mxu0 %v6506_v19 }
  0x98   :  { %4590 = vmatprep.subr.bf16.mxu0 %v6377_v26 }
  0x9d   :  { %4464 = vmatmul.mubr.msk.f32.vlgmr.msra.gmra.mrb[22].mxu1 %vm163_vm1, %v6346_v14  ;;  %887 = vmatmul.mubr.f32.vlgmr.msra.gmra.mrb[0].mxu0 %v7487_v4  ;;  %v6538_v14 = vpack.c.bf16 %v762_v43, %v758_v42 }
  0x9e   :  { %4560 = vmatpush1.bf16.msra.mxu1 %v6517_v31  ;;  %665 = vmatprep.mubr.f32.mxu1 %v7487_v4 }
  0x9f   :  { %4562 = vmatprep.subr.bf16.mxu1 %v6519_v32  ;;  %4592 = vmatpush1.bf16.msra.mxu0 %v6419_v37 }
  0xa0   :  { %4594 = vmatprep.subr.bf16.mxu0 %v6421_v38  ;;  %1075 = vmatprep.mubr.f32.mxu0 %v7487_v4 }
  0xa1   :  { %4465 = vmatmul.mubr.msk.f32.gmra.mrb[20].mxu1 %vm163_vm1, %v6366_v23  ;;  %v6549_v23 = vpack.c.bf16 %v770_v52, %v766_v49  ;;  %v123_v49 = vld [vmem:[%s7476_s3] sm:$0xf]  ;;  %v6646_v52 = vsub.s32 0, %v6334_v5 }
  0xa2   :  { %4564 = vmatpush1.bf16.msra.mxu1 %v6526_v39  ;;  %671 = vmatprep.mubr.f32.mxu1 %v7487_v4  ;;  %v6649_v53 = vrot.slane %v123_v49, %v6640_v47 }
  0xa3   :  { %4566 = vmatprep.subr.bf16.mxu1 %v6529_v40  ;;  %4596 = vmatpush1.bf16.msra.mxu0 %v6433_v44  ;;  %7502 = vst [vmem:[#allocation20_spill] sm:$0xff] %v6646_v52  ;;  %v6652_v54 = vrot.slane %v123_v49, %v6646_v52 }
  0xa4   :  { %4598 = vmatprep.subr.bf16.mxu0 %v6436_v45 }
  0xa5   :  { %4466 = vmatmul.mubr.msk.f32.gmra.mrb[18].mxu1 %vm163_vm1, %v6388_v27  ;;  %v6560_v27 = vpack.c.bf16 %v778_v59, %v774_v58 }
  0xa6   :  { %4568 = vmatpush1.bf16.msra.mxu1 %v6538_v14  ;;  %677 = vmatprep.mubr.f32.mxu1 %v7487_v4 }
  0xa7   :  { %4570 = vmatprep.subr.bf16.mxu1 %v6541_v48  ;;  %4600 = vmatpush1.bf16.msra.mxu0 %v6446_v50 }
  0xa8   :  { %4602 = vmatprep.subr.bf16.mxu0 %v6449_v51 }
  0xa9   :  { %4467 = vmatmul.mubr.msk.f32.gmra.mrb[16].mxu1 %vm163_vm1, %v6406_v29  ;;  %v6571_v29 = vpack.c.bf16 %v786_v3, %v782_v2  ;;  %v6657_v2 = vsub.s32 2, %v6334_v5  ;;  %v6660_v3 = vsub.s32 3, %v6334_v5 }
  0xaa   :  { %683 = vmatprep.mubr.f32.mxu1 %v7487_v4  ;;  %4572 = vmatpush1.bf16.msra.mxu1 %v6549_v23 }
  0xab   :  { %4574 = vmatprep.subr.bf16.mxu1 %v6552_v55  ;;  %4604 = vmatpush1.bf16.msra.mxu0 %v6458_v56  ;;  %7503 = vst [vmem:[#allocation21_spill] sm:$0xff] %v6657_v2  ;;  %7504 = vst [vmem:[#allocation22_spill] sm:$0xff] %v6660_v3  ;;  %v6663_v6 = vrot.slane %v123_v49, %v6657_v2  ;;  %v6666_v9 = vrot.slane %v123_v49, %v6660_v3 }
  0xac   :  { %4606 = vmatprep.subr.bf16.mxu0 %v6461_v57 }
  0xad   :  { %4468 = vmatmul.mubr.msk.f32.gmra.mrb[14].mxu1 %vm163_vm1, %v6351_v15  ;;  %v6582_v15 = vpack.c.bf16 %v794_v12, %v790_v11 }
  0xae   :  { %689 = vmatprep.mubr.f32.mxu1 %v7487_v4  ;;  %4576 = vmatpush1.bf16.msra.mxu1 %v6560_v27 }
  0xaf   :  { %4578 = vmatprep.subr.bf16.mxu1 %v6563_v0  ;;  %4608 = vmatpush1.bf16.msra.mxu0 %v6470_v62 }
  0xb0   :  { %4610 = vmatprep.subr.bf16.mxu0 %v6473_v63 }
  0xb1   :  { %4469 = vmatmul.mubr.msk.f32.gmra.mrb[12].mxu1 %vm163_vm1, %v6371_v24  ;;  %v6593_v24 = vpack.c.bf16 %v802_v22, %v798_v21 }
  0xb2   :  { %695 = vmatprep.mubr.f32.mxu1 %v7487_v4  ;;  %4580 = vmatpush1.bf16.msra.mxu1 %v6571_v29 }
  0xb3   :  { %4582 = vmatprep.subr.bf16.mxu1 %v6574_v10  ;;  %4612 = vmatpush1.bf16.msra.mxu0 %v6482_v7 }
  0xb4   :  { %4614 = vmatprep.subr.bf16.mxu0 %v6485_v8 }
  0xb5   :  { %4470 = vmatmul.mubr.msk.f32.gmra.mrb[10].mxu1 %vm163_vm1, %v6393_v28 }
  0xb6   :  { %701 = vmatprep.mubr.f32.mxu1 %v7487_v4  ;;  %4584 = vmatpush1.bf16.msra.mxu1 %v6582_v15 }
  0xb7   :  { %4586 = vmatprep.subr.bf16.mxu1 %v6585_v20  ;;  %4616 = vmatpush1.bf16.msra.mxu0 %v6494_v13 }
  0xb8   :  { %4618 = vmatprep.subr.bf16.mxu0 %v6497_v16 }
  0xb9   :  { %4471 = vmatmul.mubr.msk.f32.gmra.mrb[8].mxu1 %vm163_vm1, %v6411_v30 }
  0xba   :  { %4588 = vmatpush1.bf16.msra.mxu1 %v6593_v24  ;;  %957 = vmatprep.mubr.f32.mxu1 %v7487_v4 }
  0xbb   :  { %4622 = vmatprep.subr.bf16.mxu1 %v6423_v41  ;;  %4620 = vmatpush1.bf16.msra.mxu0 %v6506_v19 }
  0xbc   :  { %4654 = vmatprep.subr.bf16.mxu0 %v6377_v26 }
  0xc1   :  { %958 = vmatmul.mubr.f32.vlgmr.msra.gmra.mrb[8].mxu1 %v7487_v4 }
  0xc2   :  { %4624 = vmatpush1.bf16.msra.mxu1 %v6517_v31  ;;  %1146 = vmatprep.mubr.f32.mxu1 %v7487_v4 }
  0xc3   :  { %4626 = vmatprep.subr.bf16.mxu1 %v6519_v32 }
  0xc6   :  { %4628 = vmatpush1.bf16.msra.mxu1 %v6526_v39 }
  0xc7   :  { %4630 = vmatprep.subr.bf16.mxu1 %v6529_v40 }
  0xca   :  { %4632 = vmatpush1.bf16.msra.mxu1 %v6538_v14 }
  0xcb   :  { %4634 = vmatprep.subr.bf16.mxu1 %v6541_v48 }
  0xce   :  { %4636 = vmatpush1.bf16.msra.mxu1 %v6549_v23 }
  0xcf   :  { %4638 = vmatprep.subr.bf16.mxu1 %v6552_v55 }
  0xd2   :  { %4640 = vmatpush1.bf16.msra.mxu1 %v6560_v27 }
  0xd3   :  { %4642 = vmatprep.subr.bf16.mxu1 %v6563_v0 }
  0xd6   :  { %4644 = vmatpush1.bf16.msra.mxu1 %v6571_v29 }
  0xd7   :  { %4646 = vmatprep.subr.bf16.mxu1 %v6574_v10 }
  0xda   :  { %4648 = vmatpush1.bf16.msra.mxu1 %v6582_v15 }
  0xdb   :  { %4650 = vmatprep.subr.bf16.mxu1 %v6585_v20 }
  0xde   :  { %4652 = vmatpush1.bf16.msra.mxu1 %v6593_v24 }
  0xdf   :  { %4686 = vmatprep.subr.bf16.mxu1 %v6423_v41 }
 0x13c   :  { %v6623_v28 = vpop.f32.mrb[0].mxu1 }
 0x13d   :  { %v6625_v30 = vpop.f32.mrb[1].mxu1 }
 0x140   :  { %v6627_v25 = vpop.f32.mrb[2].mxu1 }
 0x141   :  { %v6629_v33 = vpop.f32.mrb[3].mxu1 }
 0x144   :  { %v6631_v34 = vpop.f32.mrb[4].mxu1 }
 0x145   :  { %v6633_v35 = vpop.f32.mrb[5].mxu1 }
 0x148   :  { %v6635_v36 = vpop.f32.mrb[6].mxu1 }
 0x149   :  { %7499 = vst [vmem:[#allocation17_spill] sm:$0xff] %v6635_v36  ;;  %v6637_v42 = vpop.f32.mrb[7].mxu1 }
 0x14a   :  { %7500 = vst [vmem:[#allocation18_spill] sm:$0xff] %v6637_v42 }
 0x170   :  { %v888_v43 = vpop.f32.mrb[0].mxu0 }
 0x171   :  { %v890_v46 = vpop.f32.mrb[1].mxu0  ;;  %v5703_v59 = vadd.f32 %v888_v43, %v6652_v54 }
 0x172   :  { %v5704_v58 = vadd.f32 %v890_v46, %v6649_v53 }
 0x173   :  { %v968_v61 = vmul.f32 0.5, %v5703_v59 }
 0x174   :  { %v972_v60 = vmul.f32 0.5, %v5704_v58 }
 0x176   :  { %5878 = vtanh.f32 %v972_v60 }
 0x177   :  { %5880 = vtanh.f32 %v968_v61 }
 0x180   :  { %v5879_v21 = vpop.eup %5878 }
 0x181   :  { %v5881_v22 = vpop.eup %5880  ;;  %v974_v43 = vmul.f32 0.5, %v5879_v21 }
 0x182   :  { %v970_v5 = vmul.f32 0.5, %v5881_v22 }
 0x183   :  { %v975_v58 = vadd.f32 0.5, %v974_v43 }
 0x184   :  { %v971_v59 = vadd.f32 0.5, %v970_v5 }
 0x185   :  { %v981_v61 = vmul.f32 0.0, %v975_v58 }
 0x194   :  { %v959_v11 = vpop.f32.mrb[8].mxu1 }
 0x195   :  { %v5727_v12 = vadd.f32 %v959_v11, %v6663_v6  ;;  %v961_v17 = vpop.f32.mrb[9].mxu1 }
 0x196   :  { %v5728_v18 = vadd.f32 %v961_v17, %v6666_v9 }
 0x197   :  { %5882 = vtanh.f32 %v5727_v12 }
 0x198   :  { %v977_v46 = vmul.f32 0.5, %v5728_v18 }
 0x19a   :  { %5884 = vtanh.f32 %v977_v46 }
 0x1a1   :  { %v5883_v60 = vpop.eup %5882 }
 0x1a2   :  { %v982_v1 = vmul.f32 %v5883_v60, %v971_v59 }
 0x1a4   :  { %v6670_v49 = vadd.f32 %v982_v1, %v981_v61  ;;  %v5885_v11 = vpop.eup %5884  ;;  %v7506_v1 = vmov 0.0  }
 0x1a5   :  { %v979_v4 = vmul.f32 0.5, %v5885_v11 }
 0x1a6   :  { %5886 = vtanh.f32 %v6670_v49 }
 0x1a7   :  { %v980_v3 = vadd.f32 0.5, %v979_v4 }
 0x1b0   :  { %v5887_v17 = vpop.eup %5886 }
 0x1b1   :  { %v6673_v2 = vmul.f32 %v5887_v17, %v980_v3 }
 0x1b3   :  { %7505 = vst [vmem:[#allocation23_spill] sm:$0xff] %v6673_v2  ;;  %1076 = vmatmul.mubr.f32.vlgmr.msra.gmra.mrb[2].mxu0 %v6673_v2  ;;  %1147 = vmatmul.mubr.f32.vlgmr.msra.gmra.mrb[10].mxu1 %v6673_v2 }
 0x1b4   :  { %4656 = vmatpush1.bf16.msra.mxu0 %v6419_v37  ;;  %4688 = vmatpush1.bf16.msra.mxu1 %v6517_v31 }
 0x1b5   :  { %4658 = vmatprep.subr.bf16.mxu0 %v6421_v38  ;;  %4690 = vmatprep.subr.bf16.mxu1 %v6519_v32 }
 0x1b6   :  { %1265 = vmatprep.mubr.f32.mxu0 %v7506_v1  ;;  %1336 = vmatprep.mubr.f32.mxu1 %v7506_v1 }
 0x1b8   :  { %4660 = vmatpush1.bf16.msra.mxu0 %v6433_v44  ;;  %4692 = vmatpush1.bf16.msra.mxu1 %v6526_v39 }
 0x1b9   :  { %4662 = vmatprep.subr.bf16.mxu0 %v6436_v45  ;;  %4694 = vmatprep.subr.bf16.mxu1 %v6529_v40 }
 0x1bc   :  { %4664 = vmatpush1.bf16.msra.mxu0 %v6446_v50  ;;  %4696 = vmatpush1.bf16.msra.mxu1 %v6538_v14 }
 0x1bd   :  { %4666 = vmatprep.subr.bf16.mxu0 %v6449_v51  ;;  %4698 = vmatprep.subr.bf16.mxu1 %v6541_v48 }
 0x1c0   :  { %4668 = vmatpush1.bf16.msra.mxu0 %v6458_v56  ;;  %4700 = vmatpush1.bf16.msra.mxu1 %v6549_v23 }
 0x1c1   :  { %4670 = vmatprep.subr.bf16.mxu0 %v6461_v57  ;;  %4702 = vmatprep.subr.bf16.mxu1 %v6552_v55 }
 0x1c4   :  { %4672 = vmatpush1.bf16.msra.mxu0 %v6470_v62  ;;  %4704 = vmatpush1.bf16.msra.mxu1 %v6560_v27 }
 0x1c5   :  { %4674 = vmatprep.subr.bf16.mxu0 %v6473_v63  ;;  %4706 = vmatprep.subr.bf16.mxu1 %v6563_v0 }
 0x1c8   :  { %4676 = vmatpush1.bf16.msra.mxu0 %v6482_v7  ;;  %4708 = vmatpush1.bf16.msra.mxu1 %v6571_v29 }
 0x1c9   :  { %4678 = vmatprep.subr.bf16.mxu0 %v6485_v8  ;;  %4710 = vmatprep.subr.bf16.mxu1 %v6574_v10 }
 0x1cc   :  { %4680 = vmatpush1.bf16.msra.mxu0 %v6494_v13  ;;  %4712 = vmatpush1.bf16.msra.mxu1 %v6582_v15 }
 0x1cd   :  { %4682 = vmatprep.subr.bf16.mxu0 %v6497_v16  ;;  %4714 = vmatprep.subr.bf16.mxu1 %v6585_v20 }
 0x1d0   :  { %4684 = vmatpush1.bf16.msra.mxu0 %v6506_v19  ;;  %4716 = vmatpush1.bf16.msra.mxu1 %v6593_v24 }
 0x1d1   :  { %4718 = vmatprep.subr.bf16.mxu0 %v6377_v26  ;;  %4750 = vmatprep.subr.bf16.mxu1 %v6423_v41 }
 0x286   :  { %v1077_v4 = vpop.f32.mrb[2].mxu0  ;;  %v1148_v3 = vpop.f32.mrb[10].mxu1 }
 0x287   :  { %v5705_v12 = vadd.f32 %v1077_v4, %v6652_v54  ;;  %v1079_v18 = vpop.f32.mrb[3].mxu0  ;;  %v1150_v21 = vpop.f32.mrb[11].mxu1  ;;  %v5729_v5 = vadd.f32 %v1148_v3, %v6663_v6 }
 0x288   :  { %v5706_v22 = vadd.f32 %v1079_v18, %v6649_v53  ;;  %v5730_v58 = vadd.f32 %v1150_v21, %v6666_v9 }
 0x289   :  { %v1157_v43 = vmul.f32 0.5, %v5705_v12 }
 0x28a   :  { %v1161_v46 = vmul.f32 0.5, %v5706_v22  ;;  %v1166_v59 = vmul.f32 0.5, %v5730_v58 }
 0x28b   :  { %5888 = vtanh.f32 %v1157_v43 }
 0x28c   :  { %5890 = vtanh.f32 %v1161_v46 }
 0x28d   :  { %5892 = vtanh.f32 %v5729_v5 }
 0x28e   :  { %5894 = vtanh.f32 %v1166_v59 }
 0x295   :  { %v5889_v60 = vpop.eup %5888 }
 0x296   :  { %v5891_v61 = vpop.eup %5890  ;;  %v1159_v11 = vmul.f32 0.5, %v5889_v60 }
 0x297   :  { %v1163_v17 = vmul.f32 0.5, %v5891_v61  ;;  %v5893_v47 = vpop.eup %5892 }
 0x298   :  { %v1160_v4 = vadd.f32 0.5, %v1159_v11  ;;  %v5895_v3 = vpop.eup %5894 }
 0x299   :  { %v1164_v52 = vadd.f32 0.5, %v1163_v17  ;;  %v1168_v22 = vmul.f32 0.5, %v5895_v3 }
 0x29a   :  { %v1171_v2 = vmul.f32 %v5893_v47, %v1160_v4 }
 0x29b   :  { %v1170_v12 = vmul.f32 %v1164_v52, %v6670_v49  ;;  %v1169_v43 = vadd.f32 0.5, %v1168_v22 }
 0x29d   :  { %v6716_v18 = vadd.f32 %v1171_v2, %v1170_v12 }
 0x29f   :  { %5896 = vtanh.f32 %v6716_v18 }
 0x2a9   :  { %v5897_v21 = vpop.eup %5896 }
 0x2aa   :  { %v6719_v46 = vmul.f32 %v5897_v21, %v1169_v43 }
 0x2ac   :  { %1266 = vmatmul.mubr.f32.vlgmr.msra.gmra.mrb[4].mxu0 %v6719_v46  ;;  %1337 = vmatmul.mubr.f32.vlgmr.msra.gmra.mrb[12].mxu1 %v6719_v46 }
 0x2ad   :  { %4720 = vmatpush1.bf16.msra.mxu0 %v6419_v37  ;;  %4752 = vmatpush1.bf16.msra.mxu1 %v6517_v31 }
 0x2ae   :  { %4722 = vmatprep.subr.bf16.mxu0 %v6421_v38  ;;  %4754 = vmatprep.subr.bf16.mxu1 %v6519_v32 }
 0x2af   :  { %1455 = vmatprep.mubr.f32.mxu0 %v7506_v1  ;;  %1526 = vmatprep.mubr.f32.mxu1 %v7506_v1 }
 0x2b1   :  { %4724 = vmatpush1.bf16.msra.mxu0 %v6433_v44  ;;  %4756 = vmatpush1.bf16.msra.mxu1 %v6526_v39 }
 0x2b2   :  { %4726 = vmatprep.subr.bf16.mxu0 %v6436_v45  ;;  %4758 = vmatprep.subr.bf16.mxu1 %v6529_v40 }
 0x2b5   :  { %4728 = vmatpush1.bf16.msra.mxu0 %v6446_v50  ;;  %4760 = vmatpush1.bf16.msra.mxu1 %v6538_v14 }
 0x2b6   :  { %4730 = vmatprep.subr.bf16.mxu0 %v6449_v51  ;;  %4762 = vmatprep.subr.bf16.mxu1 %v6541_v48 }
 0x2b9   :  { %4732 = vmatpush1.bf16.msra.mxu0 %v6458_v56  ;;  %4764 = vmatpush1.bf16.msra.mxu1 %v6549_v23 }
 0x2ba   :  { %4734 = vmatprep.subr.bf16.mxu0 %v6461_v57  ;;  %4766 = vmatprep.subr.bf16.mxu1 %v6552_v55 }
 0x2bd   :  { %4736 = vmatpush1.bf16.msra.mxu0 %v6470_v62  ;;  %4768 = vmatpush1.bf16.msra.mxu1 %v6560_v27 }
 0x2be   :  { %4738 = vmatprep.subr.bf16.mxu0 %v6473_v63  ;;  %4770 = vmatprep.subr.bf16.mxu1 %v6563_v0 }
 0x2c1   :  { %4740 = vmatpush1.bf16.msra.mxu0 %v6482_v7  ;;  %4772 = vmatpush1.bf16.msra.mxu1 %v6571_v29 }
 0x2c2   :  { %4742 = vmatprep.subr.bf16.mxu0 %v6485_v8  ;;  %4774 = vmatprep.subr.bf16.mxu1 %v6574_v10 }
 0x2c5   :  { %4744 = vmatpush1.bf16.msra.mxu0 %v6494_v13  ;;  %4776 = vmatpush1.bf16.msra.mxu1 %v6582_v15 }
 0x2c6   :  { %4746 = vmatprep.subr.bf16.mxu0 %v6497_v16  ;;  %4778 = vmatprep.subr.bf16.mxu1 %v6585_v20 }
 0x2c9   :  { %4748 = vmatpush1.bf16.msra.mxu0 %v6506_v19  ;;  %4780 = vmatpush1.bf16.msra.mxu1 %v6593_v24 }
 0x2ca   :  { %4782 = vmatprep.subr.bf16.mxu0 %v6377_v26  ;;  %4814 = vmatprep.subr.bf16.mxu1 %v6423_v41 }
 0x37f   :  { %v1267_v47 = vpop.f32.mrb[4].mxu0  ;;  %v1338_v52 = vpop.f32.mrb[12].mxu1 }
 0x380   :  { %v5707_v2 = vadd.f32 %v1267_v47, %v6652_v54  ;;  %v1269_v49 = vpop.f32.mrb[5].mxu0  ;;  %v1340_v5 = vpop.f32.mrb[13].mxu1  ;;  %v5731_v61 = vadd.f32 %v1338_v52, %v6663_v6 }
 0x381   :  { %v5708_v58 = vadd.f32 %v1269_v49, %v6649_v53  ;;  %v5732_v11 = vadd.f32 %v1340_v5, %v6666_v9 }
 0x382   :  { %v1347_v59 = vmul.f32 0.5, %v5707_v2 }
 0x383   :  { %v1351_v60 = vmul.f32 0.5, %v5708_v58  ;;  %v1356_v17 = vmul.f32 0.5, %v5732_v11 }
 0x384   :  { %5898 = vtanh.f32 %v1347_v59 }
 0x385   :  { %5900 = vtanh.f32 %v1351_v60 }
 0x386   :  { %5902 = vtanh.f32 %v5731_v61 }
 0x387   :  { %5904 = vtanh.f32 %v1356_v17 }
 0x38e   :  { %v5899_v4 = vpop.eup %5898 }
 0x38f   :  { %v5901_v12 = vpop.eup %5900  ;;  %v1349_v3 = vmul.f32 0.5, %v5899_v4 }
 0x390   :  { %v1353_v22 = vmul.f32 0.5, %v5901_v12  ;;  %v5903_v21 = vpop.eup %5902 }
 0x391   :  { %v1350_v43 = vadd.f32 0.5, %v1349_v3  ;;  %v5905_v52 = vpop.eup %5904 }
 0x392   :  { %v1354_v47 = vadd.f32 0.5, %v1353_v22  ;;  %v1358_v58 = vmul.f32 0.5, %v5905_v52 }
 0x393   :  { %v1361_v42 = vmul.f32 %v5903_v21, %v1350_v43 }
 0x394   :  { %v1360_v2 = vmul.f32 %v1354_v47, %v6716_v18  ;;  %v1359_v59 = vadd.f32 0.5, %v1358_v58 }
 0x396   :  { %v6762_v49 = vadd.f32 %v1361_v42, %v1360_v2 }
 0x398   :  { %5906 = vtanh.f32 %v6762_v49 }
 0x3a2   :  { %v5907_v5 = vpop.eup %5906 }
 0x3a3   :  { %v6765_v60 = vmul.f32 %v5907_v5, %v1359_v59 }
 0x3a5   :  { %1456 = vmatmul.mubr.f32.vlgmr.msra.gmra.mrb[6].mxu0 %v6765_v60  ;;  %1527 = vmatmul.mubr.f32.vlgmr.msra.gmra.mrb[14].mxu1 %v6765_v60 }
 0x3a6   :  { %4784 = vmatpush1.bf16.msra.mxu0 %v6419_v37  ;;  %4816 = vmatpush1.bf16.msra.mxu1 %v6517_v31 }
 0x3a7   :  { %4786 = vmatprep.subr.bf16.mxu0 %v6421_v38  ;;  %4818 = vmatprep.subr.bf16.mxu1 %v6519_v32 }
 0x3a8   :  { %1643 = vmatprep.mubr.f32.mxu0 %v7506_v1  ;;  %1714 = vmatprep.mubr.f32.mxu1 %v7506_v1 }
 0x3aa   :  { %4788 = vmatpush1.bf16.msra.mxu0 %v6433_v44  ;;  %4820 = vmatpush1.bf16.msra.mxu1 %v6526_v39 }
 0x3ab   :  { %4790 = vmatprep.subr.bf16.mxu0 %v6436_v45  ;;  %4822 = vmatprep.subr.bf16.mxu1 %v6529_v40 }
 0x3ae   :  { %4792 = vmatpush1.bf16.msra.mxu0 %v6446_v50  ;;  %4824 = vmatpush1.bf16.msra.mxu1 %v6538_v14 }
 0x3af   :  { %4794 = vmatprep.subr.bf16.mxu0 %v6449_v51  ;;  %4826 = vmatprep.subr.bf16.mxu1 %v6541_v48 }
 0x3b2   :  { %4796 = vmatpush1.bf16.msra.mxu0 %v6458_v56  ;;  %4828 = vmatpush1.bf16.msra.mxu1 %v6549_v23 }
 0x3b3   :  { %4798 = vmatprep.subr.bf16.mxu0 %v6461_v57  ;;  %4830 = vmatprep.subr.bf16.mxu1 %v6552_v55 }
 0x3b6   :  { %4800 = vmatpush1.bf16.msra.mxu0 %v6470_v62  ;;  %4832 = vmatpush1.bf16.msra.mxu1 %v6560_v27 }
 0x3b7   :  { %4802 = vmatprep.subr.bf16.mxu0 %v6473_v63  ;;  %4834 = vmatprep.subr.bf16.mxu1 %v6563_v0 }
 0x3ba   :  { %4804 = vmatpush1.bf16.msra.mxu0 %v6482_v7  ;;  %4836 = vmatpush1.bf16.msra.mxu1 %v6571_v29 }
 0x3bb   :  { %4806 = vmatprep.subr.bf16.mxu0 %v6485_v8  ;;  %4838 = vmatprep.subr.bf16.mxu1 %v6574_v10 }
 0x3be   :  { %4808 = vmatpush1.bf16.msra.mxu0 %v6494_v13  ;;  %4840 = vmatpush1.bf16.msra.mxu1 %v6582_v15 }
 0x3bf   :  { %4810 = vmatprep.subr.bf16.mxu0 %v6497_v16  ;;  %4842 = vmatprep.subr.bf16.mxu1 %v6585_v20 }
 0x3c2   :  { %4812 = vmatpush1.bf16.msra.mxu0 %v6506_v19  ;;  %4844 = vmatpush1.bf16.msra.mxu1 %v6593_v24 }
 0x3c3   :  { %4846 = vmatprep.subr.bf16.mxu0 %v6377_v26  ;;  %4878 = vmatprep.subr.bf16.mxu1 %v6423_v41 }
 0x478   :  { %v1457_v42 = vpop.f32.mrb[6].mxu0  ;;  %v1528_v18 = vpop.f32.mrb[14].mxu1 }
 0x479   :  { %v5709_v61 = vadd.f32 %v1457_v42, %v6652_v54  ;;  %v1459_v11 = vpop.f32.mrb[7].mxu0  ;;  %v1530_v17 = vpop.f32.mrb[15].mxu1  ;;  %v5733_v22 = vadd.f32 %v1528_v18, %v6663_v6 }
 0x47a   :  { %v5710_v4 = vadd.f32 %v1459_v11, %v6649_v53  ;;  %v5734_v43 = vadd.f32 %v1530_v17, %v6666_v9 }
 0x47b   :  { %v1537_v12 = vmul.f32 0.5, %v5709_v61 }
 0x47c   :  { %v1541_v3 = vmul.f32 0.5, %v5710_v4  ;;  %v1546_v21 = vmul.f32 0.5, %v5734_v43 }
 0x47d   :  { %5908 = vtanh.f32 %v1537_v12 }
 0x47e   :  { %5910 = vtanh.f32 %v1541_v3 }
 0x47f   :  { %5912 = vtanh.f32 %v5733_v22 }
 0x480   :  { %5914 = vtanh.f32 %v1546_v21 }
 0x487   :  { %v5909_v47 = vpop.eup %5908 }
 0x488   :  { %v5911_v2 = vpop.eup %5910  ;;  %v1539_v52 = vmul.f32 0.5, %v5909_v47 }
 0x489   :  { %v1543_v58 = vmul.f32 0.5, %v5911_v2  ;;  %v5913_v5 = vpop.eup %5912 }
 0x48a   :  { %v1540_v59 = vadd.f32 0.5, %v1539_v52  ;;  %v5915_v18 = vpop.eup %5914 }
 0x48b   :  { %v1544_v42 = vadd.f32 0.5, %v1543_v58  ;;  %v1548_v4 = vmul.f32 0.5, %v5915_v18 }
 0x48c   :  { %v1551_v36 = vmul.f32 %v5913_v5, %v1540_v59 }
 0x48d   :  { %v1550_v61 = vmul.f32 %v1544_v42, %v6762_v49  ;;  %v1549_v12 = vadd.f32 0.5, %v1548_v4  ;;  %v290_v49 = vadd.f32 %v6625_v30, %v6649_v53 }
 0x48f   :  { %v6808_v11 = vadd.f32 %v1551_v36, %v1550_v61  ;;  %v288_v36 = vadd.f32 %v6623_v28, %v6652_v54 }
 0x491   :  { %5916 = vtanh.f32 %v6808_v11 }
 0x49b   :  { %v5917_v17 = vpop.eup %5916 }
 0x49c   :  { %v6811_v3 = vmul.f32 %v5917_v17, %v1549_v12 }
 0x49e   :  { %1644 = vmatmul.mubr.f32.vlgmr.msra.gmra.mrb[14].mxu0 %v6811_v3  ;;  %1715 = vmatmul.mubr.f32.vlgmr.msra.gmra.mrb[16].mxu1 %v6811_v3 }
 0x49f   :  { %4848 = vmatpush1.bf16.msra.mxu0 %v6419_v37  ;;  %4880 = vmatpush1.bf16.msra.mxu1 %v6517_v31 }
 0x4a0   :  { %4850 = vmatprep.subr.bf16.mxu0 %v6421_v38  ;;  %4882 = vmatprep.subr.bf16.mxu1 %v6519_v32 }
 0x4a1   :  { %1829 = vmatprep.mubr.f32.mxu0 %v7506_v1  ;;  %1900 = vmatprep.mubr.f32.mxu1 %v7506_v1 }
 0x4a3   :  { %4852 = vmatpush1.bf16.msra.mxu0 %v6433_v44  ;;  %4884 = vmatpush1.bf16.msra.mxu1 %v6526_v39 }
 0x4a4   :  { %4854 = vmatprep.subr.bf16.mxu0 %v6436_v45  ;;  %4886 = vmatprep.subr.bf16.mxu1 %v6529_v40 }
 0x4a7   :  { %4856 = vmatpush1.bf16.msra.mxu0 %v6446_v50  ;;  %4888 = vmatpush1.bf16.msra.mxu1 %v6538_v14 }
 0x4a8   :  { %4858 = vmatprep.subr.bf16.mxu0 %v6449_v51  ;;  %4890 = vmatprep.subr.bf16.mxu1 %v6541_v48 }
 0x4ab   :  { %4860 = vmatpush1.bf16.msra.mxu0 %v6458_v56  ;;  %4892 = vmatpush1.bf16.msra.mxu1 %v6549_v23 }
 0x4ac   :  { %4862 = vmatprep.subr.bf16.mxu0 %v6461_v57  ;;  %4894 = vmatprep.subr.bf16.mxu1 %v6552_v55 }
 0x4af   :  { %4864 = vmatpush1.bf16.msra.mxu0 %v6470_v62  ;;  %4896 = vmatpush1.bf16.msra.mxu1 %v6560_v27 }
 0x4b0   :  { %4866 = vmatprep.subr.bf16.mxu0 %v6473_v63  ;;  %4898 = vmatprep.subr.bf16.mxu1 %v6563_v0 }
 0x4b3   :  { %4868 = vmatpush1.bf16.msra.mxu0 %v6482_v7  ;;  %4900 = vmatpush1.bf16.msra.mxu1 %v6571_v29 }
 0x4b4   :  { %4870 = vmatprep.subr.bf16.mxu0 %v6485_v8  ;;  %4902 = vmatprep.subr.bf16.mxu1 %v6574_v10 }
 0x4b7   :  { %4872 = vmatpush1.bf16.msra.mxu0 %v6494_v13  ;;  %4904 = vmatpush1.bf16.msra.mxu1 %v6582_v15 }
 0x4b8   :  { %4874 = vmatprep.subr.bf16.mxu0 %v6497_v16  ;;  %4906 = vmatprep.subr.bf16.mxu1 %v6585_v20 }
 0x4bb   :  { %4876 = vmatpush1.bf16.msra.mxu0 %v6506_v19  ;;  %4908 = vmatpush1.bf16.msra.mxu1 %v6593_v24 }
 0x4bc   :  { %4910 = vmatprep.subr.bf16.mxu0 %v6377_v26  ;;  %4942 = vmatprep.subr.bf16.mxu1 %v6423_v41 }
 0x571   :  { %v1645_v22 = vpop.f32.mrb[14].mxu0  ;;  %v1716_v43 = vpop.f32.mrb[16].mxu1 }
 0x572   :  { %v5712_v21 = vadd.f32 %v1645_v22, %v288_v36  ;;  %v1647_v47 = vpop.f32.mrb[15].mxu0  ;;  %v1718_v2 = vpop.f32.mrb[17].mxu1  ;;  %v5735_v5 = vadd.f32 %v1716_v43, %v6663_v6 }
 0x573   :  { %v5714_v52 = vadd.f32 %v1647_v47, %v290_v49  ;;  %v5736_v42 = vadd.f32 %v1718_v2, %v6666_v9 }
 0x574   :  { %v1725_v58 = vmul.f32 0.5, %v5712_v21 }
 0x575   :  { %v1729_v59 = vmul.f32 0.5, %v5714_v52  ;;  %v1734_v61 = vmul.f32 0.5, %v5736_v42  ;;  %v7507_v52 = vlaneseq }
 0x576   :  { %5918 = vtanh.f32 %v1725_v58  ;;  %v1556_v58 = vld [vmem:[#allocation4 + $0x18] sm:$0xff] }
 0x577   :  { %5920 = vtanh.f32 %v1729_v59  ;;  %v6860_v2 = vand.u32 127, %v7507_v52  ;;  %v1560_v59 = vld [vmem:[#allocation4 + $0x20] sm:$0xff] }
 0x578   :  { %5922 = vtanh.f32 %v5735_v5 }
 0x579   :  { %5924 = vtanh.f32 %v1734_v61  ;;  %vm113_vm2 = vcmp.lt.s32.totalorder %v6860_v2, 64 }
 0x580   :  { %v5919_v28 = vpop.eup %5918 }
 0x581   :  { %v5921_v18 = vpop.eup %5920  ;;  %v1727_v4 = vmul.f32 0.5, %v5919_v28  ;;  %v1561_v28 = vsel %vm113_vm2, %v1560_v59, %v6811_v3 }
 0x582   :  { %v1731_v30 = vmul.f32 0.5, %v5921_v18  ;;  %v5923_v17 = vpop.eup %5922 }
 0x583   :  { %v1728_v12 = vadd.f32 0.5, %v1727_v4  ;;  %v5925_v43 = vpop.eup %5924 }
 0x584   :  { %v1732_v36 = vadd.f32 0.5, %v1731_v30  ;;  %v1736_v47 = vmul.f32 0.5, %v5925_v43  ;;  %v296_v30 = vadd.f32 %v6629_v33, %v6649_v53 }
 0x585   :  { %v1739_v22 = vmul.f32 %v5923_v17, %v1728_v12 }
 0x586   :  { %v1738_v49 = vmul.f32 %v1732_v36, %v6808_v11  ;;  %v1737_v5 = vadd.f32 0.5, %v1736_v47  ;;  %v1557_v11 = vsel %vm113_vm2, %v6811_v3, %v1556_v58  ;;  %v294_v3 = vadd.f32 %v6627_v25, %v6652_v54 }
 0x588   :  { %v6856_v21 = vadd.f32 %v1739_v22, %v1738_v49 }
 0x58a   :  { %5926 = vtanh.f32 %v6856_v21 }
 0x594   :  { %v5927_v42 = vpop.eup %5926 }
 0x595   :  { %v1742_v61 = vmul.f32 %v5927_v42, %v1737_v5 }
 0x597   :  { %v6871_v18 = vsel %vm113_vm2, %v1742_v61, %v1561_v28  ;;  %v6875_v4 = vsel %vm113_vm2, %v1557_v11, %v1742_v61  ;;  %1830 = vmatmul.mubr.f32.vlgmr.msra.gmra.mrb[12].mxu0 %v1742_v61  ;;  %1901 = vmatmul.mubr.f32.vlgmr.msra.gmra.mrb[18].mxu1 %v1742_v61 }
 0x598   :  { %1745 = vst [vmem:[#allocation4 + $0x20] sm:$0xff] %v6871_v18  ;;  %1748 = vst [vmem:[#allocation4 + $0x18] sm:$0xff] %v6875_v4  ;;  %4912 = vmatpush1.bf16.msra.mxu0 %v6419_v37  ;;  %4944 = vmatpush1.bf16.msra.mxu1 %v6517_v31 }
 0x599   :  { %4914 = vmatprep.subr.bf16.mxu0 %v6421_v38  ;;  %4946 = vmatprep.subr.bf16.mxu1 %v6519_v32 }
 0x59a   :  { %2015 = vmatprep.mubr.f32.mxu0 %v7506_v1  ;;  %2086 = vmatprep.mubr.f32.mxu1 %v7506_v1 }
 0x59c   :  { %4916 = vmatpush1.bf16.msra.mxu0 %v6433_v44  ;;  %4948 = vmatpush1.bf16.msra.mxu1 %v6526_v39 }
 0x59d   :  { %4918 = vmatprep.subr.bf16.mxu0 %v6436_v45  ;;  %4950 = vmatprep.subr.bf16.mxu1 %v6529_v40 }
 0x5a0   :  { %4920 = vmatpush1.bf16.msra.mxu0 %v6446_v50  ;;  %4952 = vmatpush1.bf16.msra.mxu1 %v6538_v14 }
 0x5a1   :  { %4922 = vmatprep.subr.bf16.mxu0 %v6449_v51  ;;  %4954 = vmatprep.subr.bf16.mxu1 %v6541_v48 }
 0x5a4   :  { %4924 = vmatpush1.bf16.msra.mxu0 %v6458_v56  ;;  %4956 = vmatpush1.bf16.msra.mxu1 %v6549_v23 }
 0x5a5   :  { %4926 = vmatprep.subr.bf16.mxu0 %v6461_v57  ;;  %4958 = vmatprep.subr.bf16.mxu1 %v6552_v55 }
 0x5a8   :  { %4928 = vmatpush1.bf16.msra.mxu0 %v6470_v62  ;;  %4960 = vmatpush1.bf16.msra.mxu1 %v6560_v27 }
 0x5a9   :  { %4930 = vmatprep.subr.bf16.mxu0 %v6473_v63  ;;  %4962 = vmatprep.subr.bf16.mxu1 %v6563_v0 }
 0x5ac   :  { %4932 = vmatpush1.bf16.msra.mxu0 %v6482_v7  ;;  %4964 = vmatpush1.bf16.msra.mxu1 %v6571_v29 }
 0x5ad   :  { %4934 = vmatprep.subr.bf16.mxu0 %v6485_v8  ;;  %4966 = vmatprep.subr.bf16.mxu1 %v6574_v10 }
 0x5b0   :  { %4936 = vmatpush1.bf16.msra.mxu0 %v6494_v13  ;;  %4968 = vmatpush1.bf16.msra.mxu1 %v6582_v15 }
 0x5b1   :  { %4938 = vmatprep.subr.bf16.mxu0 %v6497_v16  ;;  %4970 = vmatprep.subr.bf16.mxu1 %v6585_v20 }
 0x5b4   :  { %4940 = vmatpush1.bf16.msra.mxu0 %v6506_v19  ;;  %4972 = vmatpush1.bf16.msra.mxu1 %v6593_v24 }
 0x5b5   :  { %4974 = vmatprep.subr.bf16.mxu0 %v6377_v26  ;;  %5006 = vmatprep.subr.bf16.mxu1 %v6423_v41 }
 0x66a   :  { %v1831_v12 = vpop.f32.mrb[12].mxu0  ;;  %v1902_v17 = vpop.f32.mrb[18].mxu1 }
 0x66b   :  { %v5716_v36 = vadd.f32 %v1831_v12, %v294_v3  ;;  %v1833_v22 = vpop.f32.mrb[13].mxu0  ;;  %v1904_v49 = vpop.f32.mrb[19].mxu1  ;;  %v5737_v58 = vadd.f32 %v1902_v17, %v6663_v6 }
 0x66c   :  { %v5718_v43 = vadd.f32 %v1833_v22, %v296_v30  ;;  %v5738_v26 = vadd.f32 %v1904_v49, %v6666_v9  ;;  %v1370_v22 = vld [vmem:[#allocation4 + $0x28] sm:$0xff] }
 0x66d   :  { %v1911_v47 = vmul.f32 0.5, %v5716_v36  ;;  %v1366_v36 = vld [vmem:[#allocation4 + $0x10] sm:$0xff] }
 0x66e   :  { %v1915_v52 = vmul.f32 0.5, %v5718_v43  ;;  %v1920_v41 = vmul.f32 0.5, %v5738_v26 }
 0x66f   :  { %5928 = vtanh.f32 %v1911_v47 }
 0x670   :  { %5930 = vtanh.f32 %v1915_v52  ;;  %v1367_v52 = vsel %vm113_vm2, %v6765_v60, %v1366_v36  ;;  %v2328_v36 = vld [vmem:[#allocation8 + $0x68] sm:$0xff] }
 0x671   :  { %5932 = vtanh.f32 %v5737_v58  ;;  %v1371_v58 = vsel %vm113_vm2, %v1370_v22, %v6765_v60  ;;  %v2326_v22 = vld [vmem:[#allocation8 + $0x58] sm:$0xff] }
 0x672   :  { %5934 = vtanh.f32 %v1920_v41 }
 0x679   :  { %v5929_v25 = vpop.eup %5928 }
 0x67a   :  { %v5931_v59 = vpop.eup %5930  ;;  %v1913_v5 = vmul.f32 0.5, %v5929_v25  ;;  %v2316_v25 = vld [vmem:[#allocation8 + $0x8] sm:$0xff] }
 0x67b   :  { %v1917_v33 = vmul.f32 0.5, %v5931_v59  ;;  %v5933_v61 = vpop.eup %5932  ;;  %v2318_v59 = vld [vmem:[#allocation8 + $0x18] sm:$0xff] }
 0x67c   :  { %v1914_v42 = vadd.f32 0.5, %v1913_v5  ;;  %v5935_v12 = vpop.eup %5934 }
 0x67d   :  { %v1918_v11 = vadd.f32 0.5, %v1917_v33  ;;  %v1922_v17 = vmul.f32 0.5, %v5935_v12  ;;  %v2322_v33 = vld [vmem:[#allocation8 + $0x38] sm:$0xff] }
 0x67e   :  { %v1925_v28 = vmul.f32 %v5933_v61, %v1914_v42  ;;  %v2315_v42 = vld [vmem:[#allocation8] sm:$0xff] }
 0x67f   :  { %v1924_v3 = vmul.f32 %v1918_v11, %v6856_v21  ;;  %v1923_v49 = vadd.f32 0.5, %v1922_v17  ;;  %v2319_v61 = vld [vmem:[#allocation8 + $0x20] sm:$0xff]  ;;  %v5069_v11 = vpack.c.bf16 %v2322_v33, %v2318_v59  ;;  %v2324_v17 = vld [vmem:[#allocation8 + $0x48] sm:$0xff] }
 0x680   :  { %v2347_v59 = vld [vmem:[#allocation8 + $0x100] sm:$0xff] }
 0x681   :  { %v6920_v30 = vadd.f32 %v1925_v28, %v1924_v3  ;;  %v5039_v28 = vpack.c.bf16 %v2319_v61, %v2315_v42  ;;  %v2317_v3 = vld [vmem:[#allocation8 + $0x10] sm:$0xff] }
 0x682   :  { %v2349_v61 = vld [vmem:[#allocation8 + $0x110] sm:$0xff] }
 0x683   :  { %5936 = vtanh.f32 %v6920_v30 }
 0x68d   :  { %v5937_v43 = vpop.eup %5936 }
 0x68e   :  { %v1928_v47 = vmul.f32 %v5937_v43, %v1923_v49  ;;  %v5041_v49 = vpack.c.bf16 %v2328_v36, %v2324_v17  ;;  %v2330_v43 = vld [vmem:[#allocation8 + $0x78] sm:$0xff] }
 0x68f   :  { %v2362_v36 = vld [vmem:[#allocation8 + $0x178] sm:$0xff] }
 0x690   :  { %v6931_v21 = vsel %vm113_vm2, %v1928_v47, %v1371_v58  ;;  %v6935_v26 = vsel %vm113_vm2, %v1367_v52, %v1928_v47  ;;  %2016 = vmatmul.mubr.f32.vlgmr.msra.gmra.mrb[10].mxu0 %v1928_v47  ;;  %2087 = vmatmul.mubr.f32.vlgmr.msra.gmra.mrb[20].mxu1 %v1928_v47  ;;  %v2323_v47 = vld [vmem:[#allocation8 + $0x40] sm:$0xff]  ;;  %v5073_v58 = vpack.c.bf16 %v2330_v43, %v2326_v22 }
 0x691   :  { %1931 = vst [vmem:[#allocation4 + $0x28] sm:$0xff] %v6931_v21  ;;  %1934 = vst [vmem:[#allocation4 + $0x10] sm:$0xff] %v6935_v26  ;;  %4976 = vmatpush1.bf16.msra.mxu0 %v6419_v37  ;;  %5008 = vmatpush1.bf16.msra.mxu1 %v6517_v31  ;;  %v300_v37 = vadd.f32 %v6631_v34, %v6652_v54  ;;  %v2327_v52 = vld [vmem:[#allocation8 + $0x60] sm:$0xff] }
 0x692   :  { %4978 = vmatprep.subr.bf16.mxu0 %v6421_v38  ;;  %5010 = vmatprep.subr.bf16.mxu1 %v6519_v32  ;;  %v302_v38 = vadd.f32 %v6633_v35, %v6649_v53  ;;  %v2355_v22 = vld [vmem:[#allocation8 + $0x140] sm:$0xff] }
 0x693   :  { %2201 = vmatprep.mubr.f32.mxu0 %v7506_v1  ;;  %2272 = vmatprep.mubr.f32.mxu1 %v7506_v1 }
 0x695   :  { %4980 = vmatpush1.bf16.msra.mxu0 %v6433_v44  ;;  %5012 = vmatpush1.bf16.msra.mxu1 %v6526_v39 }
 0x696   :  { %4982 = vmatprep.subr.bf16.mxu0 %v6436_v45  ;;  %5014 = vmatprep.subr.bf16.mxu1 %v6529_v40 }
 0x699   :  { %4984 = vmatpush1.bf16.msra.mxu0 %v6446_v50  ;;  %5016 = vmatpush1.bf16.msra.mxu1 %v6538_v14 }
 0x69a   :  { %4986 = vmatprep.subr.bf16.mxu0 %v6449_v51  ;;  %5018 = vmatprep.subr.bf16.mxu1 %v6541_v48 }
 0x69d   :  { %4988 = vmatpush1.bf16.msra.mxu0 %v6458_v56  ;;  %5020 = vmatpush1.bf16.msra.mxu1 %v6549_v23 }
 0x69e   :  { %4990 = vmatprep.subr.bf16.mxu0 %v6461_v57  ;;  %5022 = vmatprep.subr.bf16.mxu1 %v6552_v55 }
 0x6a1   :  { %4992 = vmatpush1.bf16.msra.mxu0 %v6470_v62  ;;  %5024 = vmatpush1.bf16.msra.mxu1 %v6560_v27 }
 0x6a2   :  { %4994 = vmatprep.subr.bf16.mxu0 %v6473_v63  ;;  %5026 = vmatprep.subr.bf16.mxu1 %v6563_v0 }
 0x6a5   :  { %4996 = vmatpush1.bf16.msra.mxu0 %v6482_v7  ;;  %5028 = vmatpush1.bf16.msra.mxu1 %v6571_v29  ;;  %v1176_v29 = vld [vmem:[#allocation4 + $0x8] sm:$0xff] }
 0x6a6   :  { %4998 = vmatprep.subr.bf16.mxu0 %v6485_v8  ;;  %5030 = vmatprep.subr.bf16.mxu1 %v6574_v10  ;;  %v1180_v10 = vld [vmem:[#allocation4 + $0x30] sm:$0xff]  ;;  %v1177_v34 = vsel %vm113_vm2, %v6719_v46, %v1176_v29 }
 0x6a7   :  { %v1181_v35 = vsel %vm113_vm2, %v1180_v10, %v6719_v46  ;;  %v2320_v46 = vld [vmem:[#allocation8 + $0x28] sm:$0xff]  ;;  %v2341_v10 = vld [vmem:[#allocation8 + $0xd0] sm:$0xff] }
 0x6a8   :  { %v5037_v5 = vpack.c.bf16 %v2320_v46, %v2316_v25  ;;  %v2354_v46 = vld [vmem:[#allocation8 + $0x138] sm:$0xff] }
 0x6a9   :  { %5000 = vmatpush1.bf16.msra.mxu0 %v6494_v13  ;;  %5032 = vmatpush1.bf16.msra.mxu1 %v6582_v15 }
 0x6aa   :  { %5002 = vmatprep.subr.bf16.mxu0 %v6497_v16  ;;  %5034 = vmatprep.subr.bf16.mxu1 %v6585_v20 }
 0x6ad   :  { %5004 = vmatpush1.bf16.msra.mxu0 %v6506_v19  ;;  %5036 = vmatpush1.bf16.msra.mxu1 %v6593_v24 }
 0x6ae   :  { %5038 = vmatprep.subr.bf16.mxu0 %v5037_v5  ;;  %5070 = vmatprep.subr.bf16.mxu1 %v5069_v11  ;;  %v2351_v5 = vld [vmem:[#allocation8 + $0x120] sm:$0xff]  ;;  %v2353_v11 = vld [vmem:[#allocation8 + $0x130] sm:$0xff] }
 0x6af   :  { %v5055_v42 = vpack.c.bf16 %v2351_v5, %v2347_v59  ;;  %v7509_v59 = vld [vmem:[#allocation18_spill] sm:$0xff] }
 0x6b0   :  { %v308_v5 = vadd.f32 %v7509_v59, %v6649_v53  ;;  %v2682_v59 = vld [vmem:[#allocation10 + $0xb8] sm:$0xff] }
 0x763   :  { %v2017_v44 = vpop.f32.mrb[10].mxu0  ;;  %v2088_v45 = vpop.f32.mrb[20].mxu1 }
 0x764   :  { %v5720_v50 = vadd.f32 %v2017_v44, %v300_v37  ;;  %v2019_v51 = vpop.f32.mrb[11].mxu0  ;;  %v2090_v56 = vpop.f32.mrb[21].mxu1  ;;  %v5739_v7 = vadd.f32 %v2088_v45, %v6663_v6  ;;  %v5043_v37 = vpack.c.bf16 %v2327_v52, %v2323_v47  ;;  %v2329_v44 = vld [vmem:[#allocation8 + $0x70] sm:$0xff] }
 0x765   :  { %v5722_v57 = vadd.f32 %v2019_v51, %v302_v38  ;;  %v5740_v8 = vadd.f32 %v2090_v56, %v6666_v9  ;;  %v2325_v38 = vld [vmem:[#allocation8 + $0x50] sm:$0xff]  ;;  %v2336_v51 = vld [vmem:[#allocation8 + $0xa8] sm:$0xff]  ;;  %v2334_v56 = vld [vmem:[#allocation8 + $0x98] sm:$0xff] }
 0x766   :  { %v2097_v62 = vmul.f32 0.5, %v5720_v50  ;;  %v5075_v45 = vpack.c.bf16 %v2329_v44, %v2325_v38  ;;  %v2332_v50 = vld [vmem:[#allocation8 + $0x88] sm:$0xff]  ;;  %v2357_v52 = vld [vmem:[#allocation8 + $0x150] sm:$0xff] }
 0x767   :  { %v2101_v63 = vmul.f32 0.5, %v5722_v57  ;;  %v2106_v13 = vmul.f32 0.5, %v5740_v8  ;;  %v5045_v57 = vpack.c.bf16 %v2336_v51, %v2332_v50  ;;  %v2364_v38 = vld [vmem:[#allocation8 + $0x188] sm:$0xff]  ;;  %v2370_v51 = vld [vmem:[#allocation8 + $0x1b8] sm:$0xff] }
 0x768   :  { %5938 = vtanh.f32 %v2097_v62  ;;  %v2338_v62 = vld [vmem:[#allocation8 + $0xb8] sm:$0xff]  ;;  %v2368_v44 = vld [vmem:[#allocation8 + $0x1a8] sm:$0xff] }
 0x769   :  { %5940 = vtanh.f32 %v2101_v63  ;;  %v2331_v63 = vld [vmem:[#allocation8 + $0x80] sm:$0xff]  ;;  %v5077_v8 = vpack.c.bf16 %v2338_v62, %v2334_v56  ;;  %v5061_v50 = vpack.c.bf16 %v2368_v44, %v2364_v38 }
 0x76a   :  { %5942 = vtanh.f32 %v5739_v7  ;;  %v2335_v7 = vld [vmem:[#allocation8 + $0xa0] sm:$0xff] }
 0x76b   :  { %5944 = vtanh.f32 %v2106_v13  ;;  %v5047_v13 = vpack.c.bf16 %v2335_v7, %v2331_v63  ;;  %v2363_v56 = vld [vmem:[#allocation8 + $0x180] sm:$0xff]  ;;  %v2365_v7 = vld [vmem:[#allocation8 + $0x190] sm:$0xff] }
 0x772   :  { %v5939_v16 = vpop.eup %5938 }
 0x773   :  { %v5941_v19 = vpop.eup %5940  ;;  %v2099_v31 = vmul.f32 0.5, %v5939_v16  ;;  %v2333_v16 = vld [vmem:[#allocation8 + $0x90] sm:$0xff] }
 0x774   :  { %v2103_v32 = vmul.f32 0.5, %v5941_v19  ;;  %v5943_v40 = vpop.eup %5942  ;;  %v2337_v19 = vld [vmem:[#allocation8 + $0xb0] sm:$0xff] }
 0x775   :  { %v2100_v39 = vadd.f32 0.5, %v2099_v31  ;;  %v5945_v27 = vpop.eup %5944  ;;  %v5079_v31 = vpack.c.bf16 %v2337_v19, %v2333_v16  ;;  %v2372_v16 = vld [vmem:[#allocation8 + $0x1c8] sm:$0xff] }
 0x776   :  { %v2104_v14 = vadd.f32 0.5, %v2103_v32  ;;  %v2108_v0 = vmul.f32 0.5, %v5945_v27  ;;  %v2340_v32 = vld [vmem:[#allocation8 + $0xc8] sm:$0xff]  ;;  %v2343_v27 = vld [vmem:[#allocation8 + $0xe0] sm:$0xff] }
 0x777   :  { %v2111_v48 = vmul.f32 %v5943_v40, %v2100_v39  ;;  %v2344_v39 = vld [vmem:[#allocation8 + $0xe8] sm:$0xff]  ;;  %v2342_v40 = vld [vmem:[#allocation8 + $0xd8] sm:$0xff] }
 0x778   :  { %v2110_v23 = vmul.f32 %v2104_v14, %v6920_v30  ;;  %v2109_v15 = vadd.f32 0.5, %v2108_v0  ;;  %v2321_v30 = vld [vmem:[#allocation8 + $0x30] sm:$0xff]  ;;  %v5049_v14 = vpack.c.bf16 %v2344_v39, %v2340_v32  ;;  %v2376_v19 = vld [vmem:[#allocation8 + $0x1e8] sm:$0xff]  ;;  %v2378_v39 = vld [vmem:[#allocation8 + $0x1f8] sm:$0xff] }
 0x779   :  { %v5071_v12 = vpack.c.bf16 %v2321_v30, %v2317_v3  ;;  %v2356_v3 = vld [vmem:[#allocation8 + $0x148] sm:$0xff]  ;;  %v5065_v32 = vpack.c.bf16 %v2376_v19, %v2372_v16  ;;  %v2670_v16 = vld [vmem:[#allocation10 + $0x58] sm:$0xff] }
 0x77a   :  { %v6978_v55 = vadd.f32 %v2111_v48, %v2110_v23  ;;  %v2346_v48 = vld [vmem:[#allocation8 + $0xf8] sm:$0xff]  ;;  %v2339_v23 = vld [vmem:[#allocation8 + $0xc0] sm:$0xff]  ;;  %v2360_v30 = vld [vmem:[#allocation8 + $0x168] sm:$0xff] }
 0x77b   :  { %v5081_v0 = vpack.c.bf16 %v2346_v48, %v2342_v40  ;;  %v5051_v29 = vpack.c.bf16 %v2343_v27, %v2339_v23  ;;  %v5057_v17 = vpack.c.bf16 %v2360_v30, %v2356_v3  ;;  %v2371_v40 = vld [vmem:[#allocation8 + $0x1c0] sm:$0xff]  ;;  %v2373_v27 = vld [vmem:[#allocation8 + $0x1d0] sm:$0xff]  ;;  %v2674_v19 = vld [vmem:[#allocation10 + $0x78] sm:$0xff] }
 0x77c   :  { %5946 = vtanh.f32 %v6978_v55 }
 0x786   :  { %v5947_v20 = vpop.eup %5946 }
 0x787   :  { %v2114_v24 = vmul.f32 %v5947_v20, %v2109_v15  ;;  %v2345_v15 = vld [vmem:[#allocation8 + $0xf0] sm:$0xff] }
 0x788   :  { %v5083_v20 = vpack.c.bf16 %v2345_v15, %v2341_v10  ;;  %v2660_v10 = vld [vmem:[#allocation10 + $0x8] sm:$0xff] }
 0x789   :  { %v6989_v60 = vsel %vm113_vm2, %v2114_v24, %v1181_v35  ;;  %v6993_v41 = vsel %vm113_vm2, %v1177_v34, %v2114_v24  ;;  %2202 = vmatmul.mubr.f32.vlgmr.msra.gmra.mrb[8].mxu0 %v2114_v24  ;;  %2273 = vmatmul.mubr.f32.vlgmr.msra.gmra.mrb[22].mxu1 %v2114_v24  ;;  %v2348_v24 = vld [vmem:[#allocation8 + $0x108] sm:$0xff]  ;;  %v2350_v35 = vld [vmem:[#allocation8 + $0x118] sm:$0xff] }
 0x78a   :  { %2117 = vst [vmem:[#allocation4 + $0x30] sm:$0xff] %v6989_v60  ;;  %2120 = vst [vmem:[#allocation4 + $0x8] sm:$0xff] %v6993_v41  ;;  %2465 = vmatprep.mubr.f32.mxu0 %v7506_v1  ;;  %2578 = vmatprep.mubr.f32.mxu1 %v7506_v1  ;;  %v2352_v34 = vld [vmem:[#allocation8 + $0x128] sm:$0xff]  ;;  %v5085_v33 = vpack.c.bf16 %v2354_v46, %v2350_v35 }
 0x78b   :  { %5040 = vmatpush1.bf16.msra.mxu0 %v5039_v28  ;;  %5072 = vmatpush1.bf16.msra.mxu1 %v5071_v12  ;;  %v5053_v25 = vpack.c.bf16 %v2352_v34, %v2348_v24  ;;  %v5087_v28 = vpack.c.bf16 %v2353_v11, %v2349_v61  ;;  %v2358_v12 = vld [vmem:[#allocation8 + $0x158] sm:$0xff]  ;;  %v2664_v15 = vld [vmem:[#allocation10 + $0x28] sm:$0xff] }
 0x78c   :  { %5042 = vmatprep.subr.bf16.mxu0 %v5041_v49  ;;  %5074 = vmatprep.subr.bf16.mxu1 %v5073_v58  ;;  %v2359_v49 = vld [vmem:[#allocation8 + $0x160] sm:$0xff]  ;;  %v5089_v43 = vpack.c.bf16 %v2362_v36, %v2358_v12  ;;  %v2361_v58 = vld [vmem:[#allocation8 + $0x170] sm:$0xff]  ;;  %v6999_v24 = vpack.c.bf16 %v2664_v15, %v2660_v10  ;;  %v2666_v34 = vld [vmem:[#allocation10 + $0x38] sm:$0xff] }
 0x78d   :  { %v5059_v47 = vpack.c.bf16 %v2359_v49, %v2355_v22 }
 0x78f   :  { %5044 = vmatpush1.bf16.msra.mxu0 %v5043_v37  ;;  %5076 = vmatpush1.bf16.msra.mxu1 %v5075_v45  ;;  %v5091_v37 = vpack.c.bf16 %v2361_v58, %v2357_v52  ;;  %v2366_v45 = vld [vmem:[#allocation8 + $0x198] sm:$0xff] }
 0x790   :  { %5046 = vmatprep.subr.bf16.mxu0 %v5045_v57  ;;  %5078 = vmatprep.subr.bf16.mxu1 %v5077_v8  ;;  %v2367_v57 = vld [vmem:[#allocation8 + $0x1a0] sm:$0xff]  ;;  %v5093_v62 = vpack.c.bf16 %v2370_v51, %v2366_v45  ;;  %v2369_v8 = vld [vmem:[#allocation8 + $0x1b0] sm:$0xff] }
 0x791   :  { %v5063_v63 = vpack.c.bf16 %v2367_v57, %v2363_v56  ;;  %v2663_v51 = vld [vmem:[#allocation10 + $0x20] sm:$0xff]  ;;  %v2661_v56 = vld [vmem:[#allocation10 + $0x10] sm:$0xff] }
 0x792   :  { %v986_v57 = vld [vmem:[#allocation4] sm:$0xff] }
 0x793   :  { %5048 = vmatpush1.bf16.msra.mxu0 %v5047_v13  ;;  %5080 = vmatpush1.bf16.msra.mxu1 %v5079_v31  ;;  %v5095_v13 = vpack.c.bf16 %v2369_v8, %v2365_v7  ;;  %v2374_v31 = vld [vmem:[#allocation8 + $0x1d8] sm:$0xff]  ;;  %v2668_v7 = vld [vmem:[#allocation10 + $0x48] sm:$0xff] }
 0x794   :  { %5050 = vmatprep.subr.bf16.mxu0 %v5049_v14  ;;  %5082 = vmatprep.subr.bf16.mxu1 %v5081_v0  ;;  %v2375_v14 = vld [vmem:[#allocation8 + $0x1e0] sm:$0xff]  ;;  %v5097_v48 = vpack.c.bf16 %v2378_v39, %v2374_v31  ;;  %v2377_v0 = vld [vmem:[#allocation8 + $0x1f0] sm:$0xff] }
 0x795   :  { %v5067_v23 = vpack.c.bf16 %v2375_v14, %v2371_v40  ;;  %v2667_v39 = vld [vmem:[#allocation10 + $0x40] sm:$0xff]  ;;  %v7510_v40 = vld [vmem:[#allocation23_spill] sm:$0xff] }
 0x796   :  { %v987_v14 = vsel %vm113_vm2, %v7510_v40, %v986_v57 }
 0x797   :  { %5052 = vmatpush1.bf16.msra.mxu0 %v5051_v29  ;;  %5084 = vmatpush1.bf16.msra.mxu1 %v5083_v20  ;;  %v5099_v29 = vpack.c.bf16 %v2377_v0, %v2373_v27  ;;  %v2662_v20 = vld [vmem:[#allocation10 + $0x18] sm:$0xff]  ;;  %v2669_v27 = vld [vmem:[#allocation10 + $0x50] sm:$0xff] }
 0x798   :  { %5054 = vmatprep.subr.bf16.mxu0 %v5053_v25  ;;  %5086 = vmatprep.subr.bf16.mxu1 %v5085_v33  ;;  %v7001_v35 = vpack.c.bf16 %v2666_v34, %v2662_v20  ;;  %v7508_v25 = vld [vmem:[#allocation17_spill] sm:$0xff]  ;;  %v2673_v0 = vld [vmem:[#allocation10 + $0x70] sm:$0xff]  ;;  %v7030_v20 = vpack.c.bf16 %v2674_v19, %v2670_v16  ;;  %v2676_v34 = vld [vmem:[#allocation10 + $0x88] sm:$0xff] }
 0x799   :  { %v306_v46 = vadd.f32 %v7508_v25, %v6652_v54  ;;  %v2680_v25 = vld [vmem:[#allocation10 + $0xa8] sm:$0xff]  ;;  %v7037_v2 = vpack.c.bf16 %v2673_v0, %v2669_v27  ;;  %v2699_v19 = vld [vmem:[#allocation10 + $0x140] sm:$0xff]  ;;  %v2710_v27 = vld [vmem:[#allocation10 + $0x198] sm:$0xff] }
 0x79a   :  { %v2714_v0 = vld [vmem:[#allocation10 + $0x1b8] sm:$0xff] }
 0x79b   :  { %5056 = vmatpush1.bf16.msra.mxu0 %v5055_v42  ;;  %5088 = vmatpush1.bf16.msra.mxu1 %v5087_v28 }
 0x79c   :  { %5058 = vmatprep.subr.bf16.mxu0 %v5057_v17  ;;  %5090 = vmatprep.subr.bf16.mxu1 %v5089_v43 }
 0x79f   :  { %5060 = vmatpush1.bf16.msra.mxu0 %v5059_v47  ;;  %5092 = vmatpush1.bf16.msra.mxu1 %v5091_v37 }
 0x7a0   :  { %5062 = vmatprep.subr.bf16.mxu0 %v5061_v50  ;;  %5094 = vmatprep.subr.bf16.mxu1 %v5093_v62  ;;  %v2659_v50 = vld [vmem:[#allocation10] sm:$0xff]  ;;  %v990_v62 = vld [vmem:[#allocation4 + $0x38] sm:$0xff] }
 0x7a3   :  { %5064 = vmatpush1.bf16.msra.mxu0 %v5063_v63  ;;  %5096 = vmatpush1.bf16.msra.mxu1 %v5095_v13  ;;  %v2672_v13 = vld [vmem:[#allocation10 + $0x68] sm:$0xff] }
 0x7a4   :  { %5066 = vmatprep.subr.bf16.mxu0 %v5065_v32  ;;  %5098 = vmatprep.subr.bf16.mxu1 %v5097_v48  ;;  %v7012_v32 = vpack.c.bf16 %v2663_v51, %v2659_v50  ;;  %v991_v48 = vsel %vm113_vm2, %v990_v62, %v7510_v40  ;;  %v7028_v15 = vpack.c.bf16 %v2672_v13, %v2668_v7  ;;  %v2691_v50 = vld [vmem:[#allocation10 + $0x100] sm:$0xff]  ;;  %v2700_v62 = vld [vmem:[#allocation10 + $0x148] sm:$0xff]  ;;  %v2702_v7 = vld [vmem:[#allocation10 + $0x158] sm:$0xff] }
 0x7a5   :  { %v2695_v51 = vld [vmem:[#allocation10 + $0x120] sm:$0xff]  ;;  %v2705_v40 = vld [vmem:[#allocation10 + $0x170] sm:$0xff] }
 0x7a6   :  { %v7083_v13 = vpack.c.bf16 %v2695_v51, %v2691_v50  ;;  %v7512_v50 = vld [vmem:[#allocation19_spill] sm:$0xff] }
 0x7a7   :  { %5068 = vmatpush1.bf16.msra.mxu0 %v5067_v23  ;;  %5100 = vmatpush1.bf16.msra.mxu1 %v5099_v29  ;;  %v2671_v23 = vld [vmem:[#allocation10 + $0x60] sm:$0xff] }
 0x7a8   :  { %5102 = vmatprep.subr.bf16.mxu0 %v6999_v24  ;;  %5134 = vmatprep.subr.bf16.mxu1 %v7001_v35 }
 0x85c   :  { %v2203_v33 = vpop.f32.mrb[8].mxu0  ;;  %v2274_v42 = vpop.f32.mrb[22].mxu1 }
 0x85d   :  { %v5724_v61 = vadd.f32 %v2203_v33, %v306_v46  ;;  %v2205_v11 = vpop.f32.mrb[9].mxu0  ;;  %v2276_v28 = vpop.f32.mrb[23].mxu1  ;;  %v5741_v17 = vadd.f32 %v2274_v42, %v6663_v6  ;;  %v2678_v46 = vld [vmem:[#allocation10 + $0x98] sm:$0xff]  ;;  %v2675_v33 = vld [vmem:[#allocation10 + $0x80] sm:$0xff] }
 0x85e   :  { %v5726_v3 = vadd.f32 %v2205_v11, %v308_v5  ;;  %v5742_v36 = vadd.f32 %v2276_v28, %v6666_v9  ;;  %v2665_v9 = vld [vmem:[#allocation10 + $0x30] sm:$0xff]  ;;  %v7035_v5 = vpack.c.bf16 %v2671_v23, %v2667_v39  ;;  %v2679_v42 = vld [vmem:[#allocation10 + $0xa0] sm:$0xff]  ;;  %v7043_v28 = vpack.c.bf16 %v2680_v25, %v2676_v34  ;;  %v2712_v23 = vld [vmem:[#allocation10 + $0x1a8] sm:$0xff] }
 0x85f   :  { %v2283_v30 = vmul.f32 0.5, %v5724_v61  ;;  %v2677_v61 = vld [vmem:[#allocation10 + $0x90] sm:$0xff]  ;;  %v2707_v25 = vld [vmem:[#allocation10 + $0x180] sm:$0xff] }
 0x860   :  { %v2287_v12 = vmul.f32 0.5, %v5726_v3  ;;  %v2292_v22 = vmul.f32 0.5, %v5742_v36  ;;  %v2681_v11 = vld [vmem:[#allocation10 + $0xb0] sm:$0xff]  ;;  %v7045_v3 = vpack.c.bf16 %v2682_v59, %v2678_v46  ;;  %v2690_v36 = vld [vmem:[#allocation10 + $0xf8] sm:$0xff]  ;;  %v2711_v46 = vld [vmem:[#allocation10 + $0x1a0] sm:$0xff] }
 0x861   :  { %5948 = vtanh.f32 %v2283_v30  ;;  %v2684_v30 = vld [vmem:[#allocation10 + $0xc8] sm:$0xff]  ;;  %v2701_v39 = vld [vmem:[#allocation10 + $0x150] sm:$0xff] }
 0x862   :  { %5950 = vtanh.f32 %v2287_v12  ;;  %v2688_v12 = vld [vmem:[#allocation10 + $0xe8] sm:$0xff]  ;;  %v7101_v34 = vpack.c.bf16 %v2705_v40, %v2701_v39  ;;  %v2709_v59 = vld [vmem:[#allocation10 + $0x190] sm:$0xff] }
 0x863   :  { %5952 = vtanh.f32 %v5741_v17  ;;  %v2686_v17 = vld [vmem:[#allocation10 + $0xd8] sm:$0xff] }
 0x864   :  { %5954 = vtanh.f32 %v2292_v22  ;;  %v7051_v22 = vpack.c.bf16 %v2679_v42, %v2675_v33  ;;  %v2713_v33 = vld [vmem:[#allocation10 + $0x1b0] sm:$0xff]  ;;  %v7109_v42 = vpack.c.bf16 %v2714_v0, %v2710_v27 }
 0x86b   :  { %v5949_v54 = vpop.eup %5948 }
 0x86c   :  { %v5951_v49 = vpop.eup %5950  ;;  %v2285_v43 = vmul.f32 0.5, %v5949_v54  ;;  %v7053_v54 = vpack.c.bf16 %v2681_v11, %v2677_v61  ;;  %v2716_v61 = vld [vmem:[#allocation10 + $0x1c8] sm:$0xff] }
 0x86d   :  { %v2289_v53 = vmul.f32 0.5, %v5951_v49  ;;  %v5953_v52 = vpop.eup %5952  ;;  %v2683_v49 = vld [vmem:[#allocation10 + $0xc0] sm:$0xff]  ;;  %v2720_v11 = vld [vmem:[#allocation10 + $0x1e8] sm:$0xff] }
 0x86e   :  { %v2286_v47 = vadd.f32 0.5, %v2285_v43  ;;  %v5955_v45 = vpop.eup %5954  ;;  %v2687_v43 = vld [vmem:[#allocation10 + $0xe0] sm:$0xff] }
 0x86f   :  { %v2290_v58 = vadd.f32 0.5, %v2289_v53  ;;  %v2294_v6 = vmul.f32 0.5, %v5955_v45  ;;  %v2685_v53 = vld [vmem:[#allocation10 + $0xd0] sm:$0xff]  ;;  %v7067_v45 = vpack.c.bf16 %v2687_v43, %v2683_v49  ;;  %v2715_v49 = vld [vmem:[#allocation10 + $0x1c0] sm:$0xff] }
 0x870   :  { %v2297_v37 = vmul.f32 %v5953_v52, %v2286_v47  ;;  %v2689_v47 = vld [vmem:[#allocation10 + $0xf0] sm:$0xff]  ;;  %v7061_v52 = vpack.c.bf16 %v2690_v36, %v2686_v17  ;;  %v7115_v17 = vpack.c.bf16 %v2711_v46, %v2707_v25  ;;  %v7117_v36 = vpack.c.bf16 %v2713_v33, %v2709_v59  ;;  %v2719_v43 = vld [vmem:[#allocation10 + $0x1e0] sm:$0xff] }
 0x871   :  { %v2296_v38 = vmul.f32 %v2290_v58, %v6978_v55  ;;  %v2295_v63 = vadd.f32 0.5, %v2294_v6  ;;  %v7014_v55 = vpack.c.bf16 %v2665_v9, %v2661_v56  ;;  %v2692_v58 = vld [vmem:[#allocation10 + $0x108] sm:$0xff]  ;;  %v7069_v6 = vpack.c.bf16 %v2689_v47, %v2685_v53  ;;  %v2693_v56 = vld [vmem:[#allocation10 + $0x110] sm:$0xff] }
 0x872   :  { %v2697_v9 = vld [vmem:[#allocation10 + $0x130] sm:$0xff] }
 0x873   :  { %v2298_v44 = vadd.f32 %v2297_v37, %v2296_v38  ;;  %v2696_v37 = vld [vmem:[#allocation10 + $0x128] sm:$0xff]  ;;  %v2694_v38 = vld [vmem:[#allocation10 + $0x118] sm:$0xff]  ;;  %v7085_v16 = vpack.c.bf16 %v2697_v9, %v2693_v56  ;;  %v2717_v53 = vld [vmem:[#allocation10 + $0x1d0] sm:$0xff] }
 0x874   :  { %v2721_v47 = vld [vmem:[#allocation10 + $0x1f0] sm:$0xff] }
 0x875   :  { %5956 = vtanh.f32 %v2298_v44  ;;  %v2698_v44 = vld [vmem:[#allocation10 + $0x138] sm:$0xff] }
 0x876   :  { %v7077_v57 = vpack.c.bf16 %v2698_v44, %v2694_v38  ;;  %v7133_v38 = vpack.c.bf16 %v2721_v47, %v2717_v53 }
 0x87f   :  { %v5957_v8 = vpop.eup %5956 }
 0x880   :  { %v2300_v31 = vmul.f32 %v5957_v8, %v2295_v63  ;;  %v2704_v63 = vld [vmem:[#allocation10 + $0x168] sm:$0xff]  ;;  %v2706_v8 = vld [vmem:[#allocation10 + $0x178] sm:$0xff] }
 0x882   :  { %v7024_v29 = vsel %vm113_vm2, %v2300_v31, %v991_v48  ;;  %v2305_v10 = vsel %vm113_vm2, %v987_v14, %v2300_v31  ;;  %v2703_v31 = vld [vmem:[#allocation10 + $0x160] sm:$0xff]  ;;  %v7093_v14 = vpack.c.bf16 %v2706_v8, %v2702_v7  ;;  %v2708_v48 = vld [vmem:[#allocation10 + $0x188] sm:$0xff] }
 0x883   :  { %2303 = vst [vmem:[#allocation4 + $0x38] sm:$0xff] %v7024_v29  ;;  %2306 = vst [vmem:[#allocation4] sm:$0xff] %v2305_v10  ;;  %2466 = vmatmul.mubr.f32.vlgmr.msra.gmra.mrb[16].mxu0 %v2305_v10  ;;  %2579 = vmatmul.mubr.f32.vlgmr.msra.gmra.mrb[24].mxu1 %v2305_v10  ;;  %v7099_v10 = vpack.c.bf16 %v2703_v31, %v2699_v19 }
 0x884   :  { %5104 = vmatpush1.bf16.msra.mxu0 %v7012_v32  ;;  %5136 = vmatpush1.bf16.msra.mxu1 %v7014_v55 }
 0x885   :  { %2471 = vmatprep.mubr.f32.mxu0 %v7506_v1  ;;  %2584 = vmatprep.mubr.f32.mxu1 %v7506_v1 }
 0x886   :  { %5106 = vmatprep.subr.bf16.mxu0 %v7028_v15  ;;  %5138 = vmatprep.subr.bf16.mxu1 %v7030_v20 }
 0x887   :  { %2472 = vmatmul.mubr.f32.gmra.mrb[18].mxu0 %v6993_v41  ;;  %2585 = vmatmul.mubr.f32.gmra.mrb[26].mxu1 %v6993_v41  ;;  %v7059_v41 = vpack.c.bf16 %v2688_v12, %v2684_v30  ;;  %v2718_v30 = vld [vmem:[#allocation10 + $0x1d8] sm:$0xff] }
 0x888   :  { %5108 = vmatpush1.bf16.msra.mxu0 %v7035_v5  ;;  %5140 = vmatpush1.bf16.msra.mxu1 %v7037_v2  ;;  %v2722_v12 = vld [vmem:[#allocation10 + $0x1f8] sm:$0xff] }
 0x889   :  { %2477 = vmatprep.mubr.f32.mxu0 %v7506_v1  ;;  %2590 = vmatprep.mubr.f32.mxu1 %v7506_v1 }
 0x88a   :  { %5110 = vmatprep.subr.bf16.mxu0 %v7043_v28  ;;  %5142 = vmatprep.subr.bf16.mxu1 %v7045_v3 }
 0x88b   :  { %2478 = vmatmul.mubr.f32.gmra.mrb[20].mxu0 %v6935_v26  ;;  %2591 = vmatmul.mubr.f32.gmra.mrb[28].mxu1 %v6935_v26  ;;  %v7075_v26 = vpack.c.bf16 %v2696_v37, %v2692_v58  ;;  %v7125_v58 = vpack.c.bf16 %v2722_v12, %v2718_v30  ;;  %v7131_v37 = vpack.c.bf16 %v2719_v43, %v2715_v49 }
 0x88c   :  { %5112 = vmatpush1.bf16.msra.mxu0 %v7051_v22  ;;  %5144 = vmatpush1.bf16.msra.mxu1 %v7053_v54 }
 0x88d   :  { %2483 = vmatprep.mubr.f32.mxu0 %v7506_v1  ;;  %2596 = vmatprep.mubr.f32.mxu1 %v7506_v1 }
 0x88e   :  { %5114 = vmatprep.subr.bf16.mxu0 %v7059_v41  ;;  %5146 = vmatprep.subr.bf16.mxu1 %v7061_v52 }
 0x88f   :  { %2484 = vmatmul.mubr.f32.gmra.mrb[22].mxu0 %v6875_v4  ;;  %2597 = vmatmul.mubr.f32.gmra.mrb[30].mxu1 %v6875_v4  ;;  %v7091_v4 = vpack.c.bf16 %v2704_v63, %v2700_v62  ;;  %v7513_v63 = vld [vmem:[#allocation21_spill] sm:$0xff] }
 0x890   :  { %5116 = vmatpush1.bf16.msra.mxu0 %v7067_v45  ;;  %5148 = vmatpush1.bf16.msra.mxu1 %v7069_v6 }
 0x891   :  { %2489 = vmatprep.mubr.f32.mxu0 %v7506_v1  ;;  %2602 = vmatprep.mubr.f32.mxu1 %v7506_v1 }
 0x892   :  { %5118 = vmatprep.subr.bf16.mxu0 %v7075_v26  ;;  %5150 = vmatprep.subr.bf16.mxu1 %v7077_v57 }
 0x893   :  { %2490 = vmatmul.mubr.f32.gmra.mrb[24].mxu0 %v6871_v18  ;;  %2603 = vmatmul.mubr.f32.gmra.mrb[32].mxu1 %v6871_v18  ;;  %v7107_v18 = vpack.c.bf16 %v2712_v23, %v2708_v48  ;;  %v7514_v23 = vld [vmem:[#allocation22_spill] sm:$0xff] }
 0x894   :  { %5120 = vmatpush1.bf16.msra.mxu0 %v7083_v13  ;;  %5152 = vmatpush1.bf16.msra.mxu1 %v7085_v16 }
 0x895   :  { %2495 = vmatprep.mubr.f32.mxu0 %v7506_v1  ;;  %2608 = vmatprep.mubr.f32.mxu1 %v7506_v1 }
 0x896   :  { %5122 = vmatprep.subr.bf16.mxu0 %v7091_v4  ;;  %5154 = vmatprep.subr.bf16.mxu1 %v7093_v14 }
 0x897   :  { %2496 = vmatmul.mubr.f32.gmra.mrb[26].mxu0 %v6931_v21  ;;  %2609 = vmatmul.mubr.f32.gmra.mrb[34].mxu1 %v6931_v21  ;;  %v7123_v21 = vpack.c.bf16 %v2720_v11, %v2716_v61 }
 0x898   :  { %5124 = vmatpush1.bf16.msra.mxu0 %v7099_v10  ;;  %5156 = vmatpush1.bf16.msra.mxu1 %v7101_v34 }
 0x899   :  { %2501 = vmatprep.mubr.f32.mxu0 %v7506_v1  ;;  %2614 = vmatprep.mubr.f32.mxu1 %v7506_v1 }
 0x89a   :  { %5126 = vmatprep.subr.bf16.mxu0 %v7107_v18  ;;  %5158 = vmatprep.subr.bf16.mxu1 %v7109_v42 }
 0x89b   :  { %2502 = vmatmul.mubr.f32.gmra.mrb[28].mxu0 %v6989_v60  ;;  %2615 = vmatmul.mubr.f32.gmra.mrb[36].mxu1 %v6989_v60  ;;  %v2379_v60 = vld [vmem:[%s7479_s6] sm:$0xf] }
 0x89c   :  { %5128 = vmatpush1.bf16.msra.mxu0 %v7115_v17  ;;  %5160 = vmatpush1.bf16.msra.mxu1 %v7117_v36  ;;  %v7190_v51 = vrot.slane %v2379_v60, %v7512_v50  ;;  %v7194_v7 = vrot.slane %v2379_v60, %v7513_v63  ;;  %v7199_v27 = vrot.slane %v2379_v60, %v7514_v23 }
 0x89d   :  { %2507 = vmatprep.mubr.f32.mxu0 %v7506_v1  ;;  %2620 = vmatprep.mubr.f32.mxu1 %v7506_v1 }
 0x89e   :  { %5130 = vmatprep.subr.bf16.mxu0 %v7123_v21  ;;  %5162 = vmatprep.subr.bf16.mxu1 %v7125_v58 }
 0x89f   :  { %2508 = vmatmul.mubr.f32.gmra.mrb[30].mxu0 %v7024_v29  ;;  %2621 = vmatmul.mubr.f32.gmra.mrb[38].mxu1 %v7024_v29  ;;  %v7511_v29 = vld [vmem:[#allocation20_spill] sm:$0xff] }
 0x8a0   :  { %5132 = vmatpush1.bf16.msra.mxu0 %v7131_v37  ;;  %5164 = vmatpush1.bf16.msra.mxu1 %v7133_v38  ;;  %v7187_v44 = vrot.slane %v2379_v60, %v7511_v29 }
 0x8a1   :  { %2791 = vmatprep.mubr.f32.mxu0 %v7506_v1  ;;  %2862 = vmatprep.mubr.f32.mxu1 %v7506_v1 }
 0x8a2   :  { %5166 = vmatprep.subr.bf16.mxu0 %v6999_v24  ;;  %5198 = vmatprep.subr.bf16.mxu1 %v7001_v35 }
 0x8a3   :  { %2792 = vmatmul.mubr.f32.vlgmr.msra.gmra.mrb[16].mxu0 %v7506_v1  ;;  %2863 = vmatmul.mubr.f32.vlgmr.msra.gmra.mrb[24].mxu1 %v7506_v1 }
 0x8a4   :  { %5168 = vmatpush1.bf16.msra.mxu0 %v7012_v32  ;;  %5200 = vmatpush1.bf16.msra.mxu1 %v7014_v55 }
 0x8a5   :  { %5170 = vmatprep.subr.bf16.mxu0 %v7028_v15  ;;  %5202 = vmatprep.subr.bf16.mxu1 %v7030_v20 }
 0x8a6   :  { %2959 = vmatprep.mubr.f32.mxu0 %v7506_v1  ;;  %3030 = vmatprep.mubr.f32.mxu1 %v7506_v1 }
 0x8a8   :  { %5172 = vmatpush1.bf16.msra.mxu0 %v7035_v5  ;;  %5204 = vmatpush1.bf16.msra.mxu1 %v7037_v2 }
 0x8a9   :  { %5174 = vmatprep.subr.bf16.mxu0 %v7043_v28  ;;  %5206 = vmatprep.subr.bf16.mxu1 %v7045_v3 }
 0x8ac   :  { %5176 = vmatpush1.bf16.msra.mxu0 %v7051_v22  ;;  %5208 = vmatpush1.bf16.msra.mxu1 %v7053_v54 }
 0x8ad   :  { %5178 = vmatprep.subr.bf16.mxu0 %v7059_v41  ;;  %5210 = vmatprep.subr.bf16.mxu1 %v7061_v52 }
 0x8b0   :  { %5180 = vmatpush1.bf16.msra.mxu0 %v7067_v45  ;;  %5212 = vmatpush1.bf16.msra.mxu1 %v7069_v6 }
 0x8b1   :  { %5182 = vmatprep.subr.bf16.mxu0 %v7075_v26  ;;  %5214 = vmatprep.subr.bf16.mxu1 %v7077_v57 }
 0x8b4   :  { %5184 = vmatpush1.bf16.msra.mxu0 %v7083_v13  ;;  %5216 = vmatpush1.bf16.msra.mxu1 %v7085_v16 }
 0x8b5   :  { %5186 = vmatprep.subr.bf16.mxu0 %v7091_v4  ;;  %5218 = vmatprep.subr.bf16.mxu1 %v7093_v14 }
 0x8b8   :  { %5188 = vmatpush1.bf16.msra.mxu0 %v7099_v10  ;;  %5220 = vmatpush1.bf16.msra.mxu1 %v7101_v34 }
 0x8b9   :  { %5190 = vmatprep.subr.bf16.mxu0 %v7107_v18  ;;  %5222 = vmatprep.subr.bf16.mxu1 %v7109_v42 }
 0x8bc   :  { %5192 = vmatpush1.bf16.msra.mxu0 %v7115_v17  ;;  %5224 = vmatpush1.bf16.msra.mxu1 %v7117_v36 }
 0x8bd   :  { %5194 = vmatprep.subr.bf16.mxu0 %v7123_v21  ;;  %5226 = vmatprep.subr.bf16.mxu1 %v7125_v58 }
 0x8c0   :  { %5196 = vmatpush1.bf16.msra.mxu0 %v7131_v37  ;;  %5228 = vmatpush1.bf16.msra.mxu1 %v7133_v38 }
 0x8c1   :  { %5230 = vmatprep.subr.bf16.mxu0 %v6999_v24  ;;  %5262 = vmatprep.subr.bf16.mxu1 %v7001_v35 }
 0x976   :  { %v2793_v56 = vpop.f32.mrb[16].mxu0  ;;  %v2864_v9 = vpop.f32.mrb[24].mxu1 }
 0x977   :  { %v5743_v62 = vadd.f32 %v2793_v56, %v7187_v44  ;;  %v2795_v8 = vpop.f32.mrb[17].mxu0  ;;  %v2866_v19 = vpop.f32.mrb[25].mxu1  ;;  %v5759_v48 = vadd.f32 %v2864_v9, %v7194_v7 }
 0x978   :  { %v5744_v31 = vadd.f32 %v2795_v8, %v7190_v51  ;;  %v5760_v0 = vadd.f32 %v2866_v19, %v7199_v27 }
 0x979   :  { %v2873_v39 = vmul.f32 0.5, %v5743_v62 }
 0x97a   :  { %v2877_v40 = vmul.f32 0.5, %v5744_v31  ;;  %v2882_v25 = vmul.f32 0.5, %v5760_v0 }
 0x97b   :  { %5958 = vtanh.f32 %v2873_v39 }
 0x97c   :  { %5960 = vtanh.f32 %v2877_v40 }
 0x97d   :  { %5962 = vtanh.f32 %v5759_v48 }
 0x97e   :  { %5964 = vtanh.f32 %v2882_v25 }
 0x985   :  { %v5959_v46 = vpop.eup %5958 }
 0x986   :  { %v5961_v59 = vpop.eup %5960  ;;  %v2875_v33 = vmul.f32 0.5, %v5959_v46 }
 0x987   :  { %v2879_v61 = vmul.f32 0.5, %v5961_v59  ;;  %v5963_v30 = vpop.eup %5962 }
 0x988   :  { %v2876_v11 = vadd.f32 0.5, %v2875_v33  ;;  %v5965_v47 = vpop.eup %5964 }
 0x989   :  { %v2880_v12 = vadd.f32 0.5, %v2879_v61  ;;  %v2884_v60 = vmul.f32 0.5, %v5965_v47 }
 0x98a   :  { %v2887_v49 = vmul.f32 %v5963_v30, %v2876_v11 }
 0x98b   :  { %v2886_v43 = vmul.f32 0.0, %v2880_v12  ;;  %v2885_v56 = vadd.f32 0.5, %v2884_v60 }
 0x98d   :  { %v7202_v53 = vadd.f32 %v2887_v49, %v2886_v43 }
 0x98f   :  { %5966 = vtanh.f32 %v7202_v53 }
 0x999   :  { %v5967_v9 = vpop.eup %5966 }
 0x99a   :  { %v2890_v62 = vmul.f32 %v5967_v9, %v2885_v56 }
 0x99c   :  { %2960 = vmatmul.mubr.f32.vlgmr.msra.gmra.mrb[18].mxu0 %v2890_v62  ;;  %3031 = vmatmul.mubr.f32.vlgmr.msra.gmra.mrb[26].mxu1 %v2890_v62 }
 0x99d   :  { %5232 = vmatpush1.bf16.msra.mxu0 %v7012_v32  ;;  %5264 = vmatpush1.bf16.msra.mxu1 %v7014_v55 }
 0x99e   :  { %5234 = vmatprep.subr.bf16.mxu0 %v7028_v15  ;;  %5266 = vmatprep.subr.bf16.mxu1 %v7030_v20 }
 0x99f   :  { %3127 = vmatprep.mubr.f32.mxu0 %v7506_v1  ;;  %3198 = vmatprep.mubr.f32.mxu1 %v7506_v1 }
 0x9a1   :  { %5236 = vmatpush1.bf16.msra.mxu0 %v7035_v5  ;;  %5268 = vmatpush1.bf16.msra.mxu1 %v7037_v2 }
 0x9a2   :  { %5238 = vmatprep.subr.bf16.mxu0 %v7043_v28  ;;  %5270 = vmatprep.subr.bf16.mxu1 %v7045_v3 }
 0x9a5   :  { %5240 = vmatpush1.bf16.msra.mxu0 %v7051_v22  ;;  %5272 = vmatpush1.bf16.msra.mxu1 %v7053_v54 }
 0x9a6   :  { %5242 = vmatprep.subr.bf16.mxu0 %v7059_v41  ;;  %5274 = vmatprep.subr.bf16.mxu1 %v7061_v52 }
 0x9a9   :  { %5244 = vmatpush1.bf16.msra.mxu0 %v7067_v45  ;;  %5276 = vmatpush1.bf16.msra.mxu1 %v7069_v6 }
 0x9aa   :  { %5246 = vmatprep.subr.bf16.mxu0 %v7075_v26  ;;  %5278 = vmatprep.subr.bf16.mxu1 %v7077_v57 }
 0x9ad   :  { %5248 = vmatpush1.bf16.msra.mxu0 %v7083_v13  ;;  %5280 = vmatpush1.bf16.msra.mxu1 %v7085_v16 }
 0x9ae   :  { %5250 = vmatprep.subr.bf16.mxu0 %v7091_v4  ;;  %5282 = vmatprep.subr.bf16.mxu1 %v7093_v14 }
 0x9b1   :  { %5252 = vmatpush1.bf16.msra.mxu0 %v7099_v10  ;;  %5284 = vmatpush1.bf16.msra.mxu1 %v7101_v34 }
 0x9b2   :  { %5254 = vmatprep.subr.bf16.mxu0 %v7107_v18  ;;  %5286 = vmatprep.subr.bf16.mxu1 %v7109_v42 }
 0x9b5   :  { %5256 = vmatpush1.bf16.msra.mxu0 %v7115_v17  ;;  %5288 = vmatpush1.bf16.msra.mxu1 %v7117_v36 }
 0x9b6   :  { %5258 = vmatprep.subr.bf16.mxu0 %v7123_v21  ;;  %5290 = vmatprep.subr.bf16.mxu1 %v7125_v58 }
 0x9b9   :  { %5260 = vmatpush1.bf16.msra.mxu0 %v7131_v37  ;;  %5292 = vmatpush1.bf16.msra.mxu1 %v7133_v38 }
 0x9ba   :  { %5294 = vmatprep.subr.bf16.mxu0 %v6999_v24  ;;  %5326 = vmatprep.subr.bf16.mxu1 %v7001_v35 }
 0xa6f   :  { %v2961_v8 = vpop.f32.mrb[18].mxu0  ;;  %v3032_v19 = vpop.f32.mrb[26].mxu1 }
 0xa70   :  { %v5745_v31 = vadd.f32 %v2961_v8, %v7187_v44  ;;  %v2963_v39 = vpop.f32.mrb[19].mxu0  ;;  %v3034_v40 = vpop.f32.mrb[27].mxu1  ;;  %v5761_v46 = vadd.f32 %v3032_v19, %v7194_v7 }
 0xa71   :  { %v5746_v48 = vadd.f32 %v2963_v39, %v7190_v51  ;;  %v5762_v59 = vadd.f32 %v3034_v40, %v7199_v27 }
 0xa72   :  { %v3041_v0 = vmul.f32 0.5, %v5745_v31 }
 0xa73   :  { %v3045_v25 = vmul.f32 0.5, %v5746_v48  ;;  %v3050_v33 = vmul.f32 0.5, %v5762_v59 }
 0xa74   :  { %5968 = vtanh.f32 %v3041_v0 }
 0xa75   :  { %5970 = vtanh.f32 %v3045_v25 }
 0xa76   :  { %5972 = vtanh.f32 %v5761_v46 }
 0xa77   :  { %5974 = vtanh.f32 %v3050_v33 }
 0xa7e   :  { %v5969_v61 = vpop.eup %5968 }
 0xa7f   :  { %v5971_v11 = vpop.eup %5970  ;;  %v3043_v30 = vmul.f32 0.5, %v5969_v61 }
 0xa80   :  { %v3047_v12 = vmul.f32 0.5, %v5971_v11  ;;  %v5973_v43 = vpop.eup %5972 }
 0xa81   :  { %v3044_v49 = vadd.f32 0.5, %v3043_v30  ;;  %v5975_v62 = vpop.eup %5974 }
 0xa82   :  { %v3048_v47 = vadd.f32 0.5, %v3047_v12  ;;  %v3052_v8 = vmul.f32 0.5, %v5975_v62 }
 0xa83   :  { %v3055_v60 = vmul.f32 %v5973_v43, %v3044_v49 }
 0xa84   :  { %v3054_v56 = vmul.f32 %v3048_v47, %v7202_v53  ;;  %v3053_v19 = vadd.f32 0.5, %v3052_v8 }
 0xa86   :  { %v7244_v9 = vadd.f32 %v3055_v60, %v3054_v56 }
 0xa88   :  { %5976 = vtanh.f32 %v7244_v9 }
 0xa92   :  { %v5977_v31 = vpop.eup %5976 }
 0xa93   :  { %v3058_v39 = vmul.f32 %v5977_v31, %v3053_v19 }
 0xa95   :  { %3128 = vmatmul.mubr.f32.vlgmr.msra.gmra.mrb[20].mxu0 %v3058_v39  ;;  %3199 = vmatmul.mubr.f32.vlgmr.msra.gmra.mrb[28].mxu1 %v3058_v39 }
 0xa96   :  { %5296 = vmatpush1.bf16.msra.mxu0 %v7012_v32  ;;  %5328 = vmatpush1.bf16.msra.mxu1 %v7014_v55 }
 0xa97   :  { %5298 = vmatprep.subr.bf16.mxu0 %v7028_v15  ;;  %5330 = vmatprep.subr.bf16.mxu1 %v7030_v20 }
 0xa98   :  { %3295 = vmatprep.mubr.f32.mxu0 %v7506_v1  ;;  %3366 = vmatprep.mubr.f32.mxu1 %v7506_v1 }
 0xa9a   :  { %5300 = vmatpush1.bf16.msra.mxu0 %v7035_v5  ;;  %5332 = vmatpush1.bf16.msra.mxu1 %v7037_v2 }
 0xa9b   :  { %5302 = vmatprep.subr.bf16.mxu0 %v7043_v28  ;;  %5334 = vmatprep.subr.bf16.mxu1 %v7045_v3 }
 0xa9e   :  { %5304 = vmatpush1.bf16.msra.mxu0 %v7051_v22  ;;  %5336 = vmatpush1.bf16.msra.mxu1 %v7053_v54 }
 0xa9f   :  { %5306 = vmatprep.subr.bf16.mxu0 %v7059_v41  ;;  %5338 = vmatprep.subr.bf16.mxu1 %v7061_v52 }
 0xaa2   :  { %5308 = vmatpush1.bf16.msra.mxu0 %v7067_v45  ;;  %5340 = vmatpush1.bf16.msra.mxu1 %v7069_v6 }
 0xaa3   :  { %5310 = vmatprep.subr.bf16.mxu0 %v7075_v26  ;;  %5342 = vmatprep.subr.bf16.mxu1 %v7077_v57 }
 0xaa6   :  { %5312 = vmatpush1.bf16.msra.mxu0 %v7083_v13  ;;  %5344 = vmatpush1.bf16.msra.mxu1 %v7085_v16 }
 0xaa7   :  { %5314 = vmatprep.subr.bf16.mxu0 %v7091_v4  ;;  %5346 = vmatprep.subr.bf16.mxu1 %v7093_v14 }
 0xaaa   :  { %5316 = vmatpush1.bf16.msra.mxu0 %v7099_v10  ;;  %5348 = vmatpush1.bf16.msra.mxu1 %v7101_v34 }
 0xaab   :  { %5318 = vmatprep.subr.bf16.mxu0 %v7107_v18  ;;  %5350 = vmatprep.subr.bf16.mxu1 %v7109_v42 }
 0xaae   :  { %5320 = vmatpush1.bf16.msra.mxu0 %v7115_v17  ;;  %5352 = vmatpush1.bf16.msra.mxu1 %v7117_v36 }
 0xaaf   :  { %5322 = vmatprep.subr.bf16.mxu0 %v7123_v21  ;;  %5354 = vmatprep.subr.bf16.mxu1 %v7125_v58 }
 0xab2   :  { %5324 = vmatpush1.bf16.msra.mxu0 %v7131_v37  ;;  %5356 = vmatpush1.bf16.msra.mxu1 %v7133_v38 }
 0xab3   :  { %5358 = vmatprep.subr.bf16.mxu0 %v6999_v24  ;;  %5390 = vmatprep.subr.bf16.mxu1 %v7001_v35 }
 0xb68   :  { %v3129_v53 = vpop.f32.mrb[20].mxu0  ;;  %v3200_v40 = vpop.f32.mrb[28].mxu1 }
 0xb69   :  { %v5747_v48 = vadd.f32 %v3129_v53, %v7187_v44  ;;  %v3131_v0 = vpop.f32.mrb[21].mxu0  ;;  %v3202_v25 = vpop.f32.mrb[29].mxu1  ;;  %v5763_v61 = vadd.f32 %v3200_v40, %v7194_v7 }
 0xb6a   :  { %v5748_v46 = vadd.f32 %v3131_v0, %v7190_v51  ;;  %v5764_v11 = vadd.f32 %v3202_v25, %v7199_v27 }
 0xb6b   :  { %v3209_v59 = vmul.f32 0.5, %v5747_v48 }
 0xb6c   :  { %v3213_v33 = vmul.f32 0.5, %v5748_v46  ;;  %v3218_v30 = vmul.f32 0.5, %v5764_v11 }
 0xb6d   :  { %5978 = vtanh.f32 %v3209_v59 }
 0xb6e   :  { %5980 = vtanh.f32 %v3213_v33 }
 0xb6f   :  { %5982 = vtanh.f32 %v5763_v61 }
 0xb70   :  { %5984 = vtanh.f32 %v3218_v30 }
 0xb77   :  { %v5979_v12 = vpop.eup %5978 }
 0xb78   :  { %v5981_v49 = vpop.eup %5980  ;;  %v3211_v43 = vmul.f32 0.5, %v5979_v12 }
 0xb79   :  { %v3215_v47 = vmul.f32 0.5, %v5981_v49  ;;  %v5983_v56 = vpop.eup %5982 }
 0xb7a   :  { %v3212_v60 = vadd.f32 0.5, %v3211_v43  ;;  %v5985_v39 = vpop.eup %5984 }
 0xb7b   :  { %v3216_v62 = vadd.f32 0.5, %v3215_v47  ;;  %v3220_v53 = vmul.f32 0.5, %v5985_v39 }
 0xb7c   :  { %v3223_v8 = vmul.f32 %v5983_v56, %v3212_v60 }
 0xb7d   :  { %v3222_v19 = vmul.f32 %v3216_v62, %v7244_v9  ;;  %v3221_v40 = vadd.f32 0.5, %v3220_v53 }
 0xb7f   :  { %v7286_v31 = vadd.f32 %v3223_v8, %v3222_v19 }
 0xb81   :  { %5986 = vtanh.f32 %v7286_v31 }
 0xb8b   :  { %v5987_v48 = vpop.eup %5986 }
 0xb8c   :  { %v3226_v0 = vmul.f32 %v5987_v48, %v3221_v40 }
 0xb8e   :  { %3296 = vmatmul.mubr.f32.vlgmr.msra.gmra.mrb[22].mxu0 %v3226_v0  ;;  %3367 = vmatmul.mubr.f32.vlgmr.msra.gmra.mrb[30].mxu1 %v3226_v0 }
 0xb8f   :  { %5360 = vmatpush1.bf16.msra.mxu0 %v7012_v32  ;;  %5392 = vmatpush1.bf16.msra.mxu1 %v7014_v55 }
 0xb90   :  { %5362 = vmatprep.subr.bf16.mxu0 %v7028_v15  ;;  %5394 = vmatprep.subr.bf16.mxu1 %v7030_v20 }
 0xb91   :  { %3463 = vmatprep.mubr.f32.mxu0 %v7506_v1  ;;  %3534 = vmatprep.mubr.f32.mxu1 %v7506_v1 }
 0xb93   :  { %5364 = vmatpush1.bf16.msra.mxu0 %v7035_v5  ;;  %5396 = vmatpush1.bf16.msra.mxu1 %v7037_v2 }
 0xb94   :  { %5366 = vmatprep.subr.bf16.mxu0 %v7043_v28  ;;  %5398 = vmatprep.subr.bf16.mxu1 %v7045_v3 }
 0xb97   :  { %5368 = vmatpush1.bf16.msra.mxu0 %v7051_v22  ;;  %5400 = vmatpush1.bf16.msra.mxu1 %v7053_v54 }
 0xb98   :  { %5370 = vmatprep.subr.bf16.mxu0 %v7059_v41  ;;  %5402 = vmatprep.subr.bf16.mxu1 %v7061_v52 }
 0xb9b   :  { %5372 = vmatpush1.bf16.msra.mxu0 %v7067_v45  ;;  %5404 = vmatpush1.bf16.msra.mxu1 %v7069_v6 }
 0xb9c   :  { %5374 = vmatprep.subr.bf16.mxu0 %v7075_v26  ;;  %5406 = vmatprep.subr.bf16.mxu1 %v7077_v57 }
 0xb9f   :  { %5376 = vmatpush1.bf16.msra.mxu0 %v7083_v13  ;;  %5408 = vmatpush1.bf16.msra.mxu1 %v7085_v16 }
 0xba0   :  { %5378 = vmatprep.subr.bf16.mxu0 %v7091_v4  ;;  %5410 = vmatprep.subr.bf16.mxu1 %v7093_v14 }
 0xba3   :  { %5380 = vmatpush1.bf16.msra.mxu0 %v7099_v10  ;;  %5412 = vmatpush1.bf16.msra.mxu1 %v7101_v34 }
 0xba4   :  { %5382 = vmatprep.subr.bf16.mxu0 %v7107_v18  ;;  %5414 = vmatprep.subr.bf16.mxu1 %v7109_v42 }
 0xba7   :  { %5384 = vmatpush1.bf16.msra.mxu0 %v7115_v17  ;;  %5416 = vmatpush1.bf16.msra.mxu1 %v7117_v36 }
 0xba8   :  { %5386 = vmatprep.subr.bf16.mxu0 %v7123_v21  ;;  %5418 = vmatprep.subr.bf16.mxu1 %v7125_v58 }
 0xbab   :  { %5388 = vmatpush1.bf16.msra.mxu0 %v7131_v37  ;;  %5420 = vmatpush1.bf16.msra.mxu1 %v7133_v38 }
 0xbac   :  { %5422 = vmatprep.subr.bf16.mxu0 %v6999_v24  ;;  %5454 = vmatprep.subr.bf16.mxu1 %v7001_v35 }
 0xc61   :  { %v3297_v9 = vpop.f32.mrb[22].mxu0  ;;  %v3368_v25 = vpop.f32.mrb[30].mxu1 }
 0xc62   :  { %v5749_v46 = vadd.f32 %v3297_v9, %v7187_v44  ;;  %v3299_v59 = vpop.f32.mrb[23].mxu0  ;;  %v3370_v33 = vpop.f32.mrb[31].mxu1  ;;  %v5765_v12 = vadd.f32 %v3368_v25, %v7194_v7 }
 0xc63   :  { %v5750_v61 = vadd.f32 %v3299_v59, %v7190_v51  ;;  %v5766_v49 = vadd.f32 %v3370_v33, %v7199_v27 }
 0xc64   :  { %v3377_v11 = vmul.f32 0.5, %v5749_v46 }
 0xc65   :  { %v3381_v30 = vmul.f32 0.5, %v5750_v61  ;;  %v3386_v43 = vmul.f32 0.5, %v5766_v49 }
 0xc66   :  { %5988 = vtanh.f32 %v3377_v11 }
 0xc67   :  { %5990 = vtanh.f32 %v3381_v30 }
 0xc68   :  { %5992 = vtanh.f32 %v5765_v12 }
 0xc69   :  { %5994 = vtanh.f32 %v3386_v43 }
 0xc70   :  { %v5989_v47 = vpop.eup %5988 }
 0xc71   :  { %v5991_v60 = vpop.eup %5990  ;;  %v3379_v56 = vmul.f32 0.5, %v5989_v47 }
 0xc72   :  { %v3383_v62 = vmul.f32 0.5, %v5991_v60  ;;  %v5993_v19 = vpop.eup %5992 }
 0xc73   :  { %v3380_v8 = vadd.f32 0.5, %v3379_v56  ;;  %v5995_v0 = vpop.eup %5994 }
 0xc74   :  { %v3384_v39 = vadd.f32 0.5, %v3383_v62  ;;  %v3388_v9 = vmul.f32 0.5, %v5995_v0 }
 0xc75   :  { %v3391_v53 = vmul.f32 %v5993_v19, %v3380_v8 }
 0xc76   :  { %v3390_v40 = vmul.f32 %v3384_v39, %v7286_v31  ;;  %v3389_v25 = vadd.f32 0.5, %v3388_v9 }
 0xc78   :  { %v7328_v48 = vadd.f32 %v3391_v53, %v3390_v40 }
 0xc7a   :  { %5996 = vtanh.f32 %v7328_v48 }
 0xc84   :  { %v5997_v46 = vpop.eup %5996 }
 0xc85   :  { %v3394_v59 = vmul.f32 %v5997_v46, %v3389_v25 }
 0xc87   :  { %3464 = vmatmul.mubr.f32.vlgmr.msra.gmra.mrb[24].mxu0 %v3394_v59  ;;  %3535 = vmatmul.mubr.f32.vlgmr.msra.gmra.mrb[32].mxu1 %v3394_v59 }
 0xc88   :  { %5424 = vmatpush1.bf16.msra.mxu0 %v7012_v32  ;;  %5456 = vmatpush1.bf16.msra.mxu1 %v7014_v55 }
 0xc89   :  { %5426 = vmatprep.subr.bf16.mxu0 %v7028_v15  ;;  %5458 = vmatprep.subr.bf16.mxu1 %v7030_v20 }
 0xc8a   :  { %3631 = vmatprep.mubr.f32.mxu0 %v7506_v1  ;;  %3702 = vmatprep.mubr.f32.mxu1 %v7506_v1 }
 0xc8c   :  { %5428 = vmatpush1.bf16.msra.mxu0 %v7035_v5  ;;  %5460 = vmatpush1.bf16.msra.mxu1 %v7037_v2 }
 0xc8d   :  { %5430 = vmatprep.subr.bf16.mxu0 %v7043_v28  ;;  %5462 = vmatprep.subr.bf16.mxu1 %v7045_v3 }
 0xc90   :  { %5432 = vmatpush1.bf16.msra.mxu0 %v7051_v22  ;;  %5464 = vmatpush1.bf16.msra.mxu1 %v7053_v54 }
 0xc91   :  { %5434 = vmatprep.subr.bf16.mxu0 %v7059_v41  ;;  %5466 = vmatprep.subr.bf16.mxu1 %v7061_v52 }
 0xc94   :  { %5436 = vmatpush1.bf16.msra.mxu0 %v7067_v45  ;;  %5468 = vmatpush1.bf16.msra.mxu1 %v7069_v6 }
 0xc95   :  { %5438 = vmatprep.subr.bf16.mxu0 %v7075_v26  ;;  %5470 = vmatprep.subr.bf16.mxu1 %v7077_v57 }
 0xc98   :  { %5440 = vmatpush1.bf16.msra.mxu0 %v7083_v13  ;;  %5472 = vmatpush1.bf16.msra.mxu1 %v7085_v16 }
 0xc99   :  { %5442 = vmatprep.subr.bf16.mxu0 %v7091_v4  ;;  %5474 = vmatprep.subr.bf16.mxu1 %v7093_v14 }
 0xc9c   :  { %5444 = vmatpush1.bf16.msra.mxu0 %v7099_v10  ;;  %5476 = vmatpush1.bf16.msra.mxu1 %v7101_v34 }
 0xc9d   :  { %5446 = vmatprep.subr.bf16.mxu0 %v7107_v18  ;;  %5478 = vmatprep.subr.bf16.mxu1 %v7109_v42 }
 0xca0   :  { %5448 = vmatpush1.bf16.msra.mxu0 %v7115_v17  ;;  %5480 = vmatpush1.bf16.msra.mxu1 %v7117_v36 }
 0xca1   :  { %5450 = vmatprep.subr.bf16.mxu0 %v7123_v21  ;;  %5482 = vmatprep.subr.bf16.mxu1 %v7125_v58 }
 0xca4   :  { %5452 = vmatpush1.bf16.msra.mxu0 %v7131_v37  ;;  %5484 = vmatpush1.bf16.msra.mxu1 %v7133_v38 }
 0xca5   :  { %5486 = vmatprep.subr.bf16.mxu0 %v6999_v24  ;;  %5518 = vmatprep.subr.bf16.mxu1 %v7001_v35 }
 0xd5a   :  { %v3465_v31 = vpop.f32.mrb[24].mxu0  ;;  %v3536_v33 = vpop.f32.mrb[32].mxu1 }
 0xd5b   :  { %v5751_v61 = vadd.f32 %v3465_v31, %v7187_v44  ;;  %v3467_v11 = vpop.f32.mrb[25].mxu0  ;;  %v3538_v30 = vpop.f32.mrb[33].mxu1  ;;  %v5767_v47 = vadd.f32 %v3536_v33, %v7194_v7 }
 0xd5c   :  { %v5752_v12 = vadd.f32 %v3467_v11, %v7190_v51  ;;  %v5768_v60 = vadd.f32 %v3538_v30, %v7199_v27 }
 0xd5d   :  { %v3545_v49 = vmul.f32 0.5, %v5751_v61 }
 0xd5e   :  { %v3549_v43 = vmul.f32 0.5, %v5752_v12  ;;  %v3554_v56 = vmul.f32 0.5, %v5768_v60 }
 0xd5f   :  { %5998 = vtanh.f32 %v3545_v49 }
 0xd60   :  { %6000 = vtanh.f32 %v3549_v43 }
 0xd61   :  { %6002 = vtanh.f32 %v5767_v47 }
 0xd62   :  { %6004 = vtanh.f32 %v3554_v56 }
 0xd69   :  { %v5999_v62 = vpop.eup %5998 }
 0xd6a   :  { %v6001_v8 = vpop.eup %6000  ;;  %v3547_v19 = vmul.f32 0.5, %v5999_v62 }
 0xd6b   :  { %v3551_v39 = vmul.f32 0.5, %v6001_v8  ;;  %v6003_v40 = vpop.eup %6002 }
 0xd6c   :  { %v3548_v53 = vadd.f32 0.5, %v3547_v19  ;;  %v6005_v59 = vpop.eup %6004 }
 0xd6d   :  { %v3552_v0 = vadd.f32 0.5, %v3551_v39  ;;  %v3556_v31 = vmul.f32 0.5, %v6005_v59 }
 0xd6e   :  { %v3559_v9 = vmul.f32 %v6003_v40, %v3548_v53 }
 0xd6f   :  { %v3558_v25 = vmul.f32 %v3552_v0, %v7328_v48  ;;  %v3557_v33 = vadd.f32 0.5, %v3556_v31 }
 0xd71   :  { %v7370_v46 = vadd.f32 %v3559_v9, %v3558_v25 }
 0xd73   :  { %6006 = vtanh.f32 %v7370_v46 }
 0xd7d   :  { %v6007_v61 = vpop.eup %6006 }
 0xd7e   :  { %v3562_v11 = vmul.f32 %v6007_v61, %v3557_v33 }
 0xd80   :  { %3632 = vmatmul.mubr.f32.vlgmr.msra.gmra.mrb[26].mxu0 %v3562_v11  ;;  %3703 = vmatmul.mubr.f32.vlgmr.msra.gmra.mrb[34].mxu1 %v3562_v11 }
 0xd81   :  { %5488 = vmatpush1.bf16.msra.mxu0 %v7012_v32  ;;  %5520 = vmatpush1.bf16.msra.mxu1 %v7014_v55 }
 0xd82   :  { %5490 = vmatprep.subr.bf16.mxu0 %v7028_v15  ;;  %5522 = vmatprep.subr.bf16.mxu1 %v7030_v20 }
 0xd83   :  { %3799 = vmatprep.mubr.f32.mxu0 %v7506_v1  ;;  %3870 = vmatprep.mubr.f32.mxu1 %v7506_v1 }
 0xd85   :  { %5492 = vmatpush1.bf16.msra.mxu0 %v7035_v5  ;;  %5524 = vmatpush1.bf16.msra.mxu1 %v7037_v2 }
 0xd86   :  { %5494 = vmatprep.subr.bf16.mxu0 %v7043_v28  ;;  %5526 = vmatprep.subr.bf16.mxu1 %v7045_v3 }
 0xd89   :  { %5496 = vmatpush1.bf16.msra.mxu0 %v7051_v22  ;;  %5528 = vmatpush1.bf16.msra.mxu1 %v7053_v54 }
 0xd8a   :  { %5498 = vmatprep.subr.bf16.mxu0 %v7059_v41  ;;  %5530 = vmatprep.subr.bf16.mxu1 %v7061_v52 }
 0xd8d   :  { %5500 = vmatpush1.bf16.msra.mxu0 %v7067_v45  ;;  %5532 = vmatpush1.bf16.msra.mxu1 %v7069_v6 }
 0xd8e   :  { %5502 = vmatprep.subr.bf16.mxu0 %v7075_v26  ;;  %5534 = vmatprep.subr.bf16.mxu1 %v7077_v57 }
 0xd91   :  { %5504 = vmatpush1.bf16.msra.mxu0 %v7083_v13  ;;  %5536 = vmatpush1.bf16.msra.mxu1 %v7085_v16 }
 0xd92   :  { %5506 = vmatprep.subr.bf16.mxu0 %v7091_v4  ;;  %5538 = vmatprep.subr.bf16.mxu1 %v7093_v14 }
 0xd95   :  { %5508 = vmatpush1.bf16.msra.mxu0 %v7099_v10  ;;  %5540 = vmatpush1.bf16.msra.mxu1 %v7101_v34 }
 0xd96   :  { %5510 = vmatprep.subr.bf16.mxu0 %v7107_v18  ;;  %5542 = vmatprep.subr.bf16.mxu1 %v7109_v42 }
 0xd99   :  { %5512 = vmatpush1.bf16.msra.mxu0 %v7115_v17  ;;  %5544 = vmatpush1.bf16.msra.mxu1 %v7117_v36 }
 0xd9a   :  { %5514 = vmatprep.subr.bf16.mxu0 %v7123_v21  ;;  %5546 = vmatprep.subr.bf16.mxu1 %v7125_v58 }
 0xd9d   :  { %5516 = vmatpush1.bf16.msra.mxu0 %v7131_v37  ;;  %5548 = vmatpush1.bf16.msra.mxu1 %v7133_v38 }
 0xd9e   :  { %5550 = vmatprep.subr.bf16.mxu0 %v6999_v24  ;;  %5582 = vmatprep.subr.bf16.mxu1 %v7001_v35 }
 0xe53   :  { %v3633_v48 = vpop.f32.mrb[26].mxu0  ;;  %v3704_v30 = vpop.f32.mrb[34].mxu1 }
 0xe54   :  { %v5753_v12 = vadd.f32 %v3633_v48, %v7187_v44  ;;  %v3635_v49 = vpop.f32.mrb[27].mxu0  ;;  %v3706_v43 = vpop.f32.mrb[35].mxu1  ;;  %v5769_v62 = vadd.f32 %v3704_v30, %v7194_v7 }
 0xe55   :  { %v5754_v47 = vadd.f32 %v3635_v49, %v7190_v51  ;;  %v5770_v8 = vadd.f32 %v3706_v43, %v7199_v27  ;;  %v4074_v49 = vld [vmem:[#allocation11 + $0x30] sm:$0xff]  ;;  %v4077_v43 = vld [vmem:[#allocation11 + $0x48] sm:$0xff] }
 0xe56   :  { %v3713_v60 = vmul.f32 0.5, %v5753_v12  ;;  %v4070_v12 = vld [vmem:[#allocation11 + $0x10] sm:$0xff] }
 0xe57   :  { %v3717_v56 = vmul.f32 0.5, %v5754_v47  ;;  %v3722_v24 = vmul.f32 0.5, %v5770_v8  ;;  %v4081_v47 = vld [vmem:[#allocation11 + $0x68] sm:$0xff] }
 0xe58   :  { %6008 = vtanh.f32 %v3713_v60  ;;  %v4079_v60 = vld [vmem:[#allocation11 + $0x58] sm:$0xff] }
 0xe59   :  { %6010 = vtanh.f32 %v3717_v56  ;;  %v4083_v56 = vld [vmem:[#allocation11 + $0x78] sm:$0xff] }
 0xe5a   :  { %6012 = vtanh.f32 %v5769_v62 }
 0xe5b   :  { %6014 = vtanh.f32 %v3722_v24 }
 0xe62   :  { %v6009_v19 = vpop.eup %6008 }
 0xe63   :  { %v6011_v35 = vpop.eup %6010  ;;  %v3715_v39 = vmul.f32 0.5, %v6009_v19  ;;  %v5647_v19 = vpack.c.bf16 %v4074_v49, %v4070_v12  ;;  %v4113_v12 = vld [vmem:[#allocation11 + $0x168] sm:$0xff]  ;;  %v4111_v49 = vld [vmem:[#allocation11 + $0x158] sm:$0xff] }
 0xe64   :  { %v3719_v53 = vmul.f32 0.5, %v6011_v35  ;;  %v6013_v0 = vpop.eup %6012  ;;  %v4076_v35 = vld [vmem:[#allocation11 + $0x40] sm:$0xff] }
 0xe65   :  { %v3716_v40 = vadd.f32 0.5, %v3715_v39  ;;  %v6015_v33 = vpop.eup %6014  ;;  %v4080_v39 = vld [vmem:[#allocation11 + $0x60] sm:$0xff] }
 0xe66   :  { %v3720_v9 = vadd.f32 0.5, %v3719_v53  ;;  %v3724_v61 = vmul.f32 0.5, %v6015_v33  ;;  %v4087_v33 = vld [vmem:[#allocation11 + $0x98] sm:$0xff] }
 0xe67   :  { %v3727_v25 = vmul.f32 %v6013_v0, %v3716_v40  ;;  %v5617_v40 = vpack.c.bf16 %v4081_v47, %v4077_v43  ;;  %v5649_v0 = vpack.c.bf16 %v4083_v56, %v4079_v60  ;;  %v4115_v43 = vld [vmem:[#allocation11 + $0x178] sm:$0xff]  ;;  %v4108_v56 = vld [vmem:[#allocation11 + $0x140] sm:$0xff] }
 0xe68   :  { %v3726_v59 = vmul.f32 %v3720_v9, %v7370_v46  ;;  %v3725_v11 = vadd.f32 0.5, %v3724_v61  ;;  %v4072_v46 = vld [vmem:[#allocation11 + $0x20] sm:$0xff]  ;;  %v4078_v9 = vld [vmem:[#allocation11 + $0x50] sm:$0xff]  ;;  %v4091_v61 = vld [vmem:[#allocation11 + $0xb8] sm:$0xff] }
 0xe6a   :  { %v7412_v31 = vadd.f32 %v3727_v25, %v3726_v59  ;;  %v4082_v25 = vld [vmem:[#allocation11 + $0x70] sm:$0xff]  ;;  %v4085_v59 = vld [vmem:[#allocation11 + $0x88] sm:$0xff] }
 0xe6c   :  { %6016 = vtanh.f32 %v7412_v31 }
 0xe76   :  { %v6017_v48 = vpop.eup %6016 }
 0xe77   :  { %v3730_v30 = vmul.f32 %v6017_v48, %v3725_v11  ;;  %v5619_v11 = vpack.c.bf16 %v4080_v39, %v4076_v35  ;;  %v5651_v48 = vpack.c.bf16 %v4082_v25, %v4078_v9  ;;  %v4114_v35 = vld [vmem:[#allocation11 + $0x170] sm:$0xff]  ;;  %v4117_v39 = vld [vmem:[#allocation11 + $0x188] sm:$0xff] }
 0xe79   :  { %3800 = vmatmul.mubr.f32.vlgmr.msra.gmra.mrb[28].mxu0 %v3730_v30  ;;  %3871 = vmatmul.mubr.f32.vlgmr.msra.gmra.mrb[36].mxu1 %v3730_v30  ;;  %v4084_v30 = vld [vmem:[#allocation11 + $0x80] sm:$0xff] }
 0xe7a   :  { %5552 = vmatpush1.bf16.msra.mxu0 %v7012_v32  ;;  %5584 = vmatpush1.bf16.msra.mxu1 %v7014_v55  ;;  %v4069_v32 = vld [vmem:[#allocation11 + $0x8] sm:$0xff] }
 0xe7b   :  { %5554 = vmatprep.subr.bf16.mxu0 %v7028_v15  ;;  %5586 = vmatprep.subr.bf16.mxu1 %v7030_v20  ;;  %v4073_v55 = vld [vmem:[#allocation11 + $0x28] sm:$0xff]  ;;  %v4071_v15 = vld [vmem:[#allocation11 + $0x18] sm:$0xff] }
 0xe7c   :  { %3967 = vmatprep.mubr.f32.mxu0 %v7506_v1  ;;  %4038 = vmatprep.mubr.f32.mxu1 %v7506_v1  ;;  %v5613_v20 = vpack.c.bf16 %v4073_v55, %v4069_v32  ;;  %v4088_v32 = vld [vmem:[#allocation11 + $0xa0] sm:$0xff] }
 0xe7e   :  { %5556 = vmatpush1.bf16.msra.mxu0 %v7035_v5  ;;  %5588 = vmatpush1.bf16.msra.mxu1 %v7037_v2  ;;  %v4075_v5 = vld [vmem:[#allocation11 + $0x38] sm:$0xff] }
 0xe7f   :  { %5558 = vmatprep.subr.bf16.mxu0 %v7043_v28  ;;  %5590 = vmatprep.subr.bf16.mxu1 %v7045_v3  ;;  %v5645_v2 = vpack.c.bf16 %v4075_v5, %v4071_v15  ;;  %v5653_v15 = vpack.c.bf16 %v4091_v61, %v4087_v33  ;;  %v4090_v5 = vld [vmem:[#allocation11 + $0xb0] sm:$0xff] }
 0xe82   :  { %5560 = vmatpush1.bf16.msra.mxu0 %v7051_v22  ;;  %5592 = vmatpush1.bf16.msra.mxu1 %v7053_v54 }
 0xe83   :  { %5562 = vmatprep.subr.bf16.mxu0 %v7059_v41  ;;  %5594 = vmatprep.subr.bf16.mxu1 %v7061_v52 }
 0xe86   :  { %5564 = vmatpush1.bf16.msra.mxu0 %v7067_v45  ;;  %5596 = vmatpush1.bf16.msra.mxu1 %v7069_v6 }
 0xe87   :  { %5566 = vmatprep.subr.bf16.mxu0 %v7075_v26  ;;  %5598 = vmatprep.subr.bf16.mxu1 %v7077_v57 }
 0xe8a   :  { %5568 = vmatpush1.bf16.msra.mxu0 %v7083_v13  ;;  %5600 = vmatpush1.bf16.msra.mxu1 %v7085_v16 }
 0xe8b   :  { %5570 = vmatprep.subr.bf16.mxu0 %v7091_v4  ;;  %5602 = vmatprep.subr.bf16.mxu1 %v7093_v14 }
 0xe8e   :  { %5572 = vmatpush1.bf16.msra.mxu0 %v7099_v10  ;;  %5604 = vmatpush1.bf16.msra.mxu1 %v7101_v34 }
 0xe8f   :  { %5574 = vmatprep.subr.bf16.mxu0 %v7107_v18  ;;  %5606 = vmatprep.subr.bf16.mxu1 %v7109_v42 }
 0xe92   :  { %5576 = vmatpush1.bf16.msra.mxu0 %v7115_v17  ;;  %5608 = vmatpush1.bf16.msra.mxu1 %v7117_v36 }
 0xe93   :  { %5578 = vmatprep.subr.bf16.mxu0 %v7123_v21  ;;  %5610 = vmatprep.subr.bf16.mxu1 %v7125_v58 }
 0xe96   :  { %5580 = vmatpush1.bf16.msra.mxu0 %v7131_v37  ;;  %5612 = vmatpush1.bf16.msra.mxu1 %v7133_v38  ;;  %v4068_v38 = vld [vmem:[#allocation11] sm:$0xff] }
 0xe97   :  { %5614 = vmatprep.subr.bf16.mxu0 %v5613_v20  ;;  %5646 = vmatprep.subr.bf16.mxu1 %v5645_v2  ;;  %v5615_v24 = vpack.c.bf16 %v4072_v46, %v4068_v38  ;;  %v4086_v20 = vld [vmem:[#allocation11 + $0x90] sm:$0xff]  ;;  %v4093_v2 = vld [vmem:[#allocation11 + $0xc8] sm:$0xff] }
 0xe98   :  { %v4106_v38 = vld [vmem:[#allocation11 + $0x130] sm:$0xff]  ;;  %v4109_v46 = vld [vmem:[#allocation11 + $0x148] sm:$0xff] }
 0xf4c   :  { %v3801_v28 = vpop.f32.mrb[28].mxu0  ;;  %v3872_v3 = vpop.f32.mrb[36].mxu1 }
 0xf4d   :  { %v5755_v22 = vadd.f32 %v3801_v28, %v7187_v44  ;;  %v3803_v54 = vpop.f32.mrb[29].mxu0  ;;  %v3874_v41 = vpop.f32.mrb[37].mxu1  ;;  %v5771_v26 = vadd.f32 %v3872_v3, %v7194_v7  ;;  %v4097_v28 = vld [vmem:[#allocation11 + $0xe8] sm:$0xff]  ;;  %v4095_v3 = vld [vmem:[#allocation11 + $0xd8] sm:$0xff] }
 0xf4e   :  { %v5756_v52 = vadd.f32 %v3803_v54, %v7190_v51  ;;  %v5772_v57 = vadd.f32 %v3874_v41, %v7199_v27  ;;  %v5623_v54 = vpack.c.bf16 %v4088_v32, %v4084_v30  ;;  %v5655_v41 = vpack.c.bf16 %v4090_v5, %v4086_v20  ;;  %v4125_v30 = vld [vmem:[#allocation11 + $0x1c8] sm:$0xff] }
 0xf4f   :  { %v3881_v45 = vmul.f32 0.5, %v5755_v22  ;;  %v4099_v22 = vld [vmem:[#allocation11 + $0xf8] sm:$0xff]  ;;  %v4129_v32 = vld [vmem:[#allocation11 + $0x1e8] sm:$0xff] }
 0xf50   :  { %v3885_v6 = vmul.f32 0.5, %v5756_v52  ;;  %v3890_v13 = vmul.f32 0.5, %v5772_v57  ;;  %v4092_v52 = vld [vmem:[#allocation11 + $0xc0] sm:$0xff]  ;;  %v4094_v57 = vld [vmem:[#allocation11 + $0xd0] sm:$0xff] }
 0xf51   :  { %6018 = vtanh.f32 %v3881_v45  ;;  %v4096_v45 = vld [vmem:[#allocation11 + $0xe0] sm:$0xff] }
 0xf52   :  { %6020 = vtanh.f32 %v3885_v6  ;;  %v5625_v6 = vpack.c.bf16 %v4097_v28, %v4093_v2  ;;  %v4124_v2 = vld [vmem:[#allocation11 + $0x1c0] sm:$0xff]  ;;  %v5641_v28 = vpack.c.bf16 %v4129_v32, %v4125_v30 }
 0xf53   :  { %6022 = vtanh.f32 %v5771_v26  ;;  %v5657_v26 = vpack.c.bf16 %v4099_v22, %v4095_v3  ;;  %v4128_v22 = vld [vmem:[#allocation11 + $0x1e0] sm:$0xff] }
 0xf54   :  { %6024 = vtanh.f32 %v3890_v13  ;;  %v4098_v13 = vld [vmem:[#allocation11 + $0xf0] sm:$0xff] }
 0xf5b   :  { %v6019_v16 = vpop.eup %6018 }
 0xf5c   :  { %v6021_v4 = vpop.eup %6020  ;;  %v3883_v14 = vmul.f32 0.5, %v6019_v16  ;;  %v4101_v16 = vld [vmem:[#allocation11 + $0x108] sm:$0xff] }
 0xf5d   :  { %v3887_v10 = vmul.f32 0.5, %v6021_v4  ;;  %v6023_v18 = vpop.eup %6022  ;;  %v4105_v4 = vld [vmem:[#allocation11 + $0x128] sm:$0xff] }
 0xf5e   :  { %v3884_v34 = vadd.f32 0.5, %v3883_v14  ;;  %v6025_v58 = vpop.eup %6024  ;;  %v4103_v14 = vld [vmem:[#allocation11 + $0x118] sm:$0xff] }
 0xf5f   :  { %v3888_v42 = vadd.f32 0.5, %v3887_v10  ;;  %v3892_v37 = vmul.f32 0.5, %v6025_v58  ;;  %v4107_v10 = vld [vmem:[#allocation11 + $0x138] sm:$0xff] }
 0xf60   :  { %v3895_v17 = vmul.f32 %v6023_v18, %v3884_v34  ;;  %v5627_v34 = vpack.c.bf16 %v4096_v45, %v4092_v52  ;;  %v5659_v18 = vpack.c.bf16 %v4098_v13, %v4094_v57  ;;  %v5661_v58 = vpack.c.bf16 %v4107_v10, %v4103_v14  ;;  %v4316_v57 = vld [vmem:[#allocation13 + $0x8] sm:$0xff]  ;;  %v4318_v14 = vld [vmem:[#allocation13 + $0x18] sm:$0xff] }
 0xf61   :  { %v3894_v36 = vmul.f32 %v3888_v42, %v7412_v31  ;;  %v3893_v62 = vadd.f32 0.5, %v3892_v37  ;;  %v4089_v31 = vld [vmem:[#allocation11 + $0xa8] sm:$0xff]  ;;  %v4100_v42 = vld [vmem:[#allocation11 + $0x100] sm:$0xff]  ;;  %v4102_v37 = vld [vmem:[#allocation11 + $0x110] sm:$0xff]  ;;  %v5643_v52 = vpack.c.bf16 %v4128_v22, %v4124_v2 }
 0xf62   :  { %v5621_v55 = vpack.c.bf16 %v4089_v31, %v4085_v59  ;;  %v5663_v60 = vpack.c.bf16 %v4106_v38, %v4102_v37  ;;  %v4116_v59 = vld [vmem:[#allocation11 + $0x180] sm:$0xff]  ;;  %v4324_v38 = vld [vmem:[#allocation13 + $0x48] sm:$0xff] }
 0xf63   :  { %v7452_v21 = vadd.f32 %v3895_v17, %v3894_v36  ;;  %v4104_v17 = vld [vmem:[#allocation11 + $0x120] sm:$0xff]  ;;  %v5629_v36 = vpack.c.bf16 %v4105_v4, %v4101_v16  ;;  %v6175_v16 = vmov 0.0|0.0   ;;  %v4317_v4 = vld [vmem:[#allocation13 + $0x10] sm:$0xff] }
 0xf64   :  { %v5631_v47 = vpack.c.bf16 %v4104_v17, %v4100_v42  ;;  %v4120_v31 = vld [vmem:[#allocation11 + $0x1a0] sm:$0xff]  ;;  %v5681_v10 = vpack.c.bf16 %v4318_v14, %v4317_v4  ;;  %v4321_v17 = vld [vmem:[#allocation13 + $0x30] sm:$0xff] }
 0xf65   :  { %6026 = vtanh.f32 %v7452_v21  ;;  %v5639_v20 = vpack.c.bf16 %v4120_v31, %v4116_v59  ;;  %v4323_v37 = vld [vmem:[#allocation13 + $0x40] sm:$0xff] }
 0xf6f   :  { %v6027_v8 = vpop.eup %6026 }
 0xf70   :  { %v3898_v53 = vmul.f32 %v6027_v8, %v3893_v62  ;;  %v4112_v62 = vld [vmem:[#allocation11 + $0x160] sm:$0xff]  ;;  %v5633_v8 = vpack.c.bf16 %v4113_v12, %v4109_v46  ;;  %v5690_v46 = vpack.c.bf16 %v4324_v38, %v4323_v37  ;;  %v4325_v12 = vld [vmem:[#allocation13 + $0x50] sm:$0xff] }
 0xf71   :  { %v5635_v9 = vpack.c.bf16 %v4112_v62, %v4108_v56  ;;  %v4329_v62 = vld [vmem:[#allocation13 + $0x70] sm:$0xff] }
 0xf72   :  { %3968 = vmatmul.mubr.f32.vlgmr.msra.gmra.mrb[30].mxu0 %v3898_v53  ;;  %4039 = vmatmul.mubr.f32.vlgmr.msra.gmra.mrb[38].mxu1 %v3898_v53  ;;  %v4121_v53 = vld [vmem:[#allocation11 + $0x1a8] sm:$0xff] }
 0xf73   :  { %5616 = vmatpush1.bf16.msra.mxu0 %v5615_v24  ;;  %5648 = vmatpush1.bf16.msra.mxu1 %v5647_v19  ;;  %v5665_v24 = vpack.c.bf16 %v4115_v43, %v4111_v49  ;;  %v4110_v19 = vld [vmem:[#allocation11 + $0x150] sm:$0xff]  ;;  %v5637_v33 = vpack.c.bf16 %v4121_v53, %v4117_v39  ;;  %v4326_v49 = vld [vmem:[#allocation13 + $0x58] sm:$0xff] }
 0xf74   :  { %5618 = vmatprep.subr.bf16.mxu0 %v5617_v40  ;;  %5650 = vmatprep.subr.bf16.mxu1 %v5649_v0  ;;  %v4119_v40 = vld [vmem:[#allocation11 + $0x198] sm:$0xff]  ;;  %v5667_v25 = vpack.c.bf16 %v4114_v35, %v4110_v19  ;;  %v5693_v43 = vpack.c.bf16 %v4326_v49, %v4325_v12 }
 0xf75   :  { %4218 = vmatprep.mubr.f32.mxu0 %v7506_v1  ;;  %4289 = vmatprep.mubr.f32.mxu1 %v7506_v1  ;;  %v4123_v0 = vld [vmem:[#allocation11 + $0x1b8] sm:$0xff] }
 0xf76   :  { %v5669_v61 = vpack.c.bf16 %v4123_v0, %v4119_v40 }
 0xf77   :  { %5620 = vmatpush1.bf16.msra.mxu0 %v5619_v11  ;;  %5652 = vmatpush1.bf16.msra.mxu1 %v5651_v48  ;;  %v4118_v11 = vld [vmem:[#allocation11 + $0x190] sm:$0xff] }
 0xf78   :  { %5622 = vmatprep.subr.bf16.mxu0 %v5621_v55  ;;  %5654 = vmatprep.subr.bf16.mxu1 %v5653_v15  ;;  %v4122_v48 = vld [vmem:[#allocation11 + $0x1b0] sm:$0xff]  ;;  %v4127_v55 = vld [vmem:[#allocation11 + $0x1d8] sm:$0xff] }
 0xf79   :  { %v4131_v15 = vld [vmem:[#allocation11 + $0x1f8] sm:$0xff]  ;;  %v5671_v5 = vpack.c.bf16 %v4122_v48, %v4118_v11 }
 0xf7a   :  { %v5673_v3 = vpack.c.bf16 %v4131_v15, %v4127_v55 }
 0xf7b   :  { %5624 = vmatpush1.bf16.msra.mxu0 %v5623_v54  ;;  %5656 = vmatpush1.bf16.msra.mxu1 %v5655_v41  ;;  %v4126_v54 = vld [vmem:[#allocation11 + $0x1d0] sm:$0xff] }
 0xf7c   :  { %5626 = vmatprep.subr.bf16.mxu0 %v5625_v6  ;;  %5658 = vmatprep.subr.bf16.mxu1 %v5657_v26  ;;  %v4130_v41 = vld [vmem:[#allocation11 + $0x1f0] sm:$0xff]  ;;  %v4315_v26 = vld [vmem:[#allocation13] sm:$0xff] }
 0xf7d   :  { %v5675_v45 = vpack.c.bf16 %v4130_v41, %v4126_v54  ;;  %v4067_v6 = vld [vmem:[#allocation4 + $0x38] sm:$0xff]  ;;  %v5678_v13 = vpack.c.bf16 %v4316_v57, %v4315_v26 }
 0xf7f   :  { %5628 = vmatpush1.bf16.msra.mxu0 %v5627_v34  ;;  %5660 = vmatpush1.bf16.msra.mxu1 %v5659_v18  ;;  %v4319_v34 = vld [vmem:[#allocation13 + $0x20] sm:$0xff]  ;;  %v4320_v18 = vld [vmem:[#allocation13 + $0x28] sm:$0xff] }
 0xf80   :  { %5630 = vmatprep.subr.bf16.mxu0 %v5629_v36  ;;  %5662 = vmatprep.subr.bf16.mxu1 %v5661_v58  ;;  %v5684_v42 = vpack.c.bf16 %v4320_v18, %v4319_v34  ;;  %v4322_v36 = vld [vmem:[#allocation13 + $0x38] sm:$0xff] }
 0xf81   :  { %v5687_v58 = vpack.c.bf16 %v4322_v36, %v4321_v17 }
 0xf83   :  { %5632 = vmatpush1.bf16.msra.mxu0 %v5631_v47  ;;  %5664 = vmatpush1.bf16.msra.mxu1 %v5663_v60  ;;  %v4327_v47 = vld [vmem:[#allocation13 + $0x60] sm:$0xff]  ;;  %v4328_v60 = vld [vmem:[#allocation13 + $0x68] sm:$0xff] }
 0xf84   :  { %5634 = vmatprep.subr.bf16.mxu0 %v5633_v8  ;;  %5666 = vmatprep.subr.bf16.mxu1 %v5665_v24  ;;  %v5696_v56 = vpack.c.bf16 %v4328_v60, %v4327_v47  ;;  %v4330_v8 = vld [vmem:[#allocation13 + $0x78] sm:$0xff] }
 0xf85   :  { %v5699_v24 = vpack.c.bf16 %v4330_v8, %v4329_v62  ;;  %v4472_v47 = vld [vmem:[#allocation5] ss:$0 sm:$0xff] }
 0xf87   :  { %5636 = vmatpush1.bf16.msra.mxu0 %v5635_v9  ;;  %5668 = vmatpush1.bf16.msra.mxu1 %v5667_v25 }
 0xf88   :  { %5638 = vmatprep.subr.bf16.mxu0 %v5637_v33  ;;  %5670 = vmatprep.subr.bf16.mxu1 %v5669_v61 }
 0xf8b   :  { %5640 = vmatpush1.bf16.msra.mxu0 %v5639_v20  ;;  %5672 = vmatpush1.bf16.msra.mxu1 %v5671_v5 }
 0xf8c   :  { %5642 = vmatprep.subr.bf16.mxu0 %v5641_v28  ;;  %5674 = vmatprep.subr.bf16.mxu1 %v5673_v3 }
 0xf8f   :  { %5644 = vmatpush1.bf16.msra.mxu0 %v5643_v52  ;;  %5676 = vmatpush1.bf16.msra.mxu1 %v5675_v45 }
 0xf90   :  { %5677 = vmatprep.subr.bf16.mxu0 %v6175_v16 }
 0xf92   :  { %4219 = vmatmul.mubr.f32.vlgmr.msra.gmra.mrb[32].mxu0 %v4067_v6  ;;  %4290 = vmatmul.mubr.f32.vlgmr.msra.gmra.mrb[40].mxu1 %v4067_v6 }
 0xf93   :  { %5679 = vmatpush3.bf16.msra.mxu0 %v5678_v13  ;;  %4522 = vmatprep.mubr.msk.f32.mxu0 %vm6176_vm3, %v7506_v1 }
 0xf94   :  { %5680 = vmatprep.subr.bf16.mxu0 %v6175_v16 }
 0xf97   :  { %5682 = vmatpush3.bf16.msra.mxu0 %v5681_v10 }
 0xf98   :  { %5683 = vmatprep.subr.bf16.mxu0 %v6175_v16 }
 0xf9b   :  { %5685 = vmatpush3.bf16.msra.mxu0 %v5684_v42 }
 0xf9c   :  { %5686 = vmatprep.subr.bf16.mxu0 %v6175_v16 }
 0xf9f   :  { %5688 = vmatpush3.bf16.msra.mxu0 %v5687_v58 }
 0xfa0   :  { %5689 = vmatprep.subr.bf16.mxu0 %v6175_v16 }
 0xfa3   :  { %5691 = vmatpush3.bf16.msra.mxu0 %v5690_v46 }
 0xfa4   :  { %5692 = vmatprep.subr.bf16.mxu0 %v6175_v16 }
 0xfa7   :  { %5694 = vmatpush3.bf16.msra.mxu0 %v5693_v43 }
 0xfa8   :  { %5695 = vmatprep.subr.bf16.mxu0 %v6175_v16 }
 0xfab   :  { %5697 = vmatpush3.bf16.msra.mxu0 %v5696_v56 }
 0xfac   :  { %5698 = vmatprep.subr.bf16.mxu0 %v6175_v16 }
 0xfaf   :  { %5700 = vmatpush3.bf16.msra.mxu0 %v5699_v24 }
0x1045   :  { %v3969_v19 = vpop.f32.mrb[30].mxu0  ;;  %v4040_v35 = vpop.f32.mrb[38].mxu1 }
0x1046   :  { %v5757_v39 = vadd.f32 %v3969_v19, %v7187_v44  ;;  %v3971_v53 = vpop.f32.mrb[31].mxu0  ;;  %v4042_v40 = vpop.f32.mrb[39].mxu1  ;;  %v5773_v59 = vadd.f32 %v4040_v35, %v7194_v7  ;;  %v4132_v7 = vld [vmem:[%s7482_s9] sm:$0xf] }
0x1047   :  { %v5758_v0 = vadd.f32 %v3971_v53, %v7190_v51  ;;  %v5774_v31 = vadd.f32 %v4042_v40, %v7199_v27  ;;  %v4137_v27 = vrot.slane %v4132_v7, %v7511_v29  ;;  %v4141_v2 = vrot.slane %v4132_v7, %v7512_v50 }
0x1048   :  { %v4049_v9 = vmul.f32 0.5, %v5757_v39  ;;  %v4145_v54 = vrot.slane %v4132_v7, %v7513_v63  ;;  %v4149_v29 = vrot.slane %v4132_v7, %v7514_v23 }
0x1049   :  { %v4053_v25 = vmul.f32 0.5, %v5758_v0  ;;  %v4058_v33 = vmul.f32 0.5, %v5774_v31 }
0x104a   :  { %6028 = vtanh.f32 %v4049_v9 }
0x104b   :  { %6030 = vtanh.f32 %v4053_v25 }
0x104c   :  { %6032 = vtanh.f32 %v5773_v59 }
0x104d   :  { %6034 = vtanh.f32 %v4058_v33 }
0x1054   :  { %v6029_v1 = vpop.eup %6028 }
0x1055   :  { %v6031_v61 = vpop.eup %6030  ;;  %v4051_v11 = vmul.f32 0.5, %v6029_v1 }
0x1056   :  { %v4055_v48 = vmul.f32 0.5, %v6031_v61  ;;  %v6033_v30 = vpop.eup %6032 }
0x1057   :  { %v4052_v44 = vadd.f32 0.5, %v4051_v11  ;;  %v6035_v20 = vpop.eup %6034 }
0x1058   :  { %v4056_v32 = vadd.f32 0.5, %v4055_v48  ;;  %v4060_v5 = vmul.f32 0.5, %v6035_v20 }
0x1059   :  { %v4063_v55 = vmul.f32 %v6033_v30, %v4052_v44 }
0x105a   :  { %v4062_v51 = vmul.f32 %v4056_v32, %v7452_v21  ;;  %v4061_v21 = vadd.f32 0.5, %v4060_v5 }
0x105c   :  { %v4064_v15 = vadd.f32 %v4063_v55, %v4062_v51 }
0x105e   :  { %6036 = vtanh.f32 %v4064_v15 }
0x1065   :  { %v4220_v28 = vpop.f32.mrb[32].mxu0  ;;  %v4291_v3 = vpop.f32.mrb[40].mxu1 }
0x1066   :  { %v4221_v22 = vadd.f32 %v4220_v28, %v4137_v27  ;;  %v4222_v41 = vpop.f32.mrb[33].mxu0  ;;  %v4293_v52 = vpop.f32.mrb[41].mxu1  ;;  %v4292_v16 = vadd.f32 %v4291_v3, %v4145_v54 }
0x1067   :  { %v4223_v45 = vadd.f32 %v4222_v41, %v4141_v2  ;;  %v4294_v50 = vadd.f32 %v4293_v52, %v4149_v29 }
0x1068   :  { %v6037_v6 = vpop.eup %6036  ;;  %v4296_v26 = vmul.f32 0.5, %v4221_v22 }
0x1069   :  { %v4066_v57 = vmul.f32 %v6037_v6, %v4061_v21  ;;  %v4300_v13 = vmul.f32 0.5, %v4223_v45  ;;  %v4305_v4 = vmul.f32 0.5, %v4294_v50 }
0x106a   :  { %6038 = vtanh.f32 %v4296_v26 }
0x106b   :  { %6040 = vtanh.f32 %v4300_v13 }
0x106c   :  { %6042 = vtanh.f32 %v4292_v16 }
0x106d   :  { %6044 = vtanh.f32 %v4305_v4 }
0x1074   :  { %v6039_v14 = vpop.eup %6038 }
0x1075   :  { %v6041_v10 = vpop.eup %6040  ;;  %v4298_v34 = vmul.f32 0.5, %v6039_v14 }
0x1076   :  { %v4302_v63 = vmul.f32 0.5, %v6041_v10  ;;  %v6043_v42 = vpop.eup %6042 }
0x1077   :  { %v4299_v18 = vadd.f32 0.5, %v4298_v34  ;;  %v6045_v38 = vpop.eup %6044 }
0x1078   :  { %v4303_v17 = vadd.f32 0.5, %v4302_v63  ;;  %v4307_v46 = vmul.f32 0.5, %v6045_v38 }
0x1079   :  { %v4310_v36 = vmul.f32 %v6043_v42, %v4299_v18 }
0x107a   :  { %v4309_v58 = vmul.f32 0.0, %v4303_v17  ;;  %v4308_v12 = vadd.f32 0.5, %v4307_v46 }
0x107c   :  { %v4311_v37 = vadd.f32 %v4310_v36, %v4309_v58 }
0x107e   :  { %6046 = vtanh.f32 %v4311_v37 }
0x1088   :  { %v6047_v23 = vpop.eup %6046 }
0x1089   :  { %v4313_v49 = vmul.f32 %v6047_v23, %v4308_v12 }
0x108b   :  { %v4314_v43 = vadd.f32 %v4313_v49, %v4066_v57 }
0x108d   :  { %4523 = vmatmul.mubr.f32.vlgmr.msra.gmra.mrb[34].mxu0 %v4314_v43 }
0x1160   :  { %v4397_v60 = vpop.f32.mrb[34].mxu0 }
0x1161   :  { %v4408_v56 = vadd.f32 %v4472_v47, %v4397_v60  ;;  %v4524_v62 = vpop.f32.mrb[35].mxu0 }
0x1163   :  { %4410 = vst.msk [vmem:[%s7485_s12] sm:$0x3] %vm4409_vm4, %v4408_v56 }
0x1164   :  { %4415 = vsyncpa [#allocation7], 1 }
0x1165   :  { %4416 = vsyncpa [#allocation9], 1 }
0x1166   :  { %4417 = vsyncpa [#allocation12], 1 }

</bundles_post_ra>
